<compile_context>
chip_gen: v6e
topology: v6e:2x2x1
jax: 0.10.0
libtpu: 0.0.40
codegen_flags: <defaults>
</compile_context>

<pallas_src>
import jax
import jax.numpy as jnp
from jax.experimental import pallas as pl
from jax.experimental.pallas import tpu as pltpu


def _round_up(x, m):
    return ((x + m - 1) // m) * m


def _pick_row_tile(H, W, nb_s, cf_p, budget_bytes=8 * 1024 * 1024):
    """Largest divisor of H whose per-step VMEM footprint stays in budget and
    whose pixel count (th*W) keeps the NCHW output store lane-dense."""
    per_row = W * (2 * nb_s * 4 + 6 * cf_p * 4)
    max_rows = max(1, budget_bytes // per_row)
    best = None
    for d in range(1, H + 1):
        if H % d != 0 or d > max_rows:
            continue
        if d != H and (d * W) % 128 != 0:     # lane-dense store unless full image
            continue
        best = d
    return best if best is not None else H


# ---------------------------------------------------------------------------
# Fused kernel: conv3x3+bias+ReLU -> FiLM+ReLU -> residual 1x1 -> 1x1 head
# One grid step = one (batch, row-tile); features never leave VMEM; the head
# is computed transposed so the store is unpadded, lane-dense, NCHW-ordered.
# ---------------------------------------------------------------------------
def _fused_colorize_kernel(x_ref, wc_ref, bc_ref, gb_ref,
                           wr_ref, br_ref, wot_ref, bo_ref, o_ref):
    th = x_ref.shape[1] - 2          # rows in this tile (static)
    w = x_ref.shape[2] - 2           # image width (static)
    cin = x_ref.shape[3]             # padded input channels
    cf = wc_ref.shape[2]             # padded feature channels (128)
    m = th * w                       # pixels in this tile

    x = x_ref[0]                     # (th+2, W+2, cin_p)  bf16, halo included

    # --- 3x3 conv: 9 shifted bf16 matmuls, f32 accumulation (no HBM im2col) ---
    acc = jnp.zeros((m, cf), jnp.float32)
    for dy in range(3):
        for dx in range(3):
            tap = x[dy:dy + th, dx:dx + w, :].reshape(m, cin)          # bf16
            acc = acc + jnp.dot(tap, wc_ref[dy * 3 + dx],
                                preferred_element_type=jnp.float32)
    feats = jnp.maximum(acc + bc_ref[...], 0.0)                        # (m, cf) f32

    # --- FiLM modulation (per-batch gamma/beta) + ReLU, f32 elementwise ---
    gb = gb_ref[0]                                                     # (2, cf) f32
    h = jnp.maximum(feats * gb[0:1, :] + gb[1:2, :], 0.0)

    # --- residual 1x1 block (bf16 matmul, f32 accumulate) ---
    r = jnp.dot(h.astype(jnp.bfloat16), wr_ref[...],
                preferred_element_type=jnp.float32) + br_ref[...]
    h2 = jnp.maximum(r, 0.0) + feats                                   # (m, cf) f32

    # --- transposed 1x1 head: (nb, cf) @ (cf, m) -> (nb, m) ---
    # Result rows = unpadded color bins, lanes = pixels (lane-dense NCHW store).
    h2_t = jnp.transpose(h2).astype(jnp.bfloat16)                      # (cf, m)
    logits_t = jnp.dot(wot_ref[...], h2_t,
                       preferred_element_type=jnp.float32) + bo_ref[...]
    o_ref[0] = logits_t.astype(o_ref.dtype)                            # (nb_s, m)


# ---------------------------------------------------------------------------
# Parameter init (deterministic, synthetic) + forward wrapper
# ---------------------------------------------------------------------------
def init_params(key, *, cin=3, use_loc=True, c_feat=32, vocab=50, emb=32, n_bins=64):
    ks = jax.random.split(key, 5)
    cin_eff = cin + (2 if use_loc else 0)
    s = 0.05
    return dict(
        conv_w=jax.random.normal(ks[0], (3, 3, cin_eff, c_feat), jnp.float32) * s,
        conv_b=jnp.zeros((c_feat,), jnp.float32),
        emb_w=jax.random.normal(ks[1], (vocab, emb), jnp.float32) * s,
        film_w=jax.random.normal(ks[2], (emb, 2 * c_feat), jnp.float32) * s,
        film_b=jnp.zeros((2 * c_feat,), jnp.float32),
        res_w=jax.random.normal(ks[3], (c_feat, c_feat), jnp.float32) * s,
        res_b=jnp.zeros((c_feat,), jnp.float32),
        out_w=jax.random.normal(ks[4], (c_feat, n_bins), jnp.float32) * s,
        out_b=jnp.zeros((n_bins,), jnp.float32),
    )


def colorization_baseline_forward(params, image, caption, caption_l, use_loc=True):
    """image: (N,C,H,W) NCHW; caption: (N,L) int32 ids; caption_l: (N,) int32.

    Returns per-pixel color-bin logits, NCHW: (N, n_bins, H, W)  == output[-1].
    """
    N, C, H, W = image.shape
    x = jnp.transpose(image, (0, 2, 3, 1))                            # NHWC
    if use_loc:
        ys = jnp.linspace(-1.0, 1.0, H)
        xs = jnp.linspace(-1.0, 1.0, W)
        yy, xx = jnp.meshgrid(ys, xs, indexing="ij")
        loc = jnp.broadcast_to(jnp.stack([yy, xx], -1)[None], (N, H, W, 2))
        x = jnp.concatenate([x, loc.astype(x.dtype)], axis=-1)
    cin_eff = x.shape[-1]

    cf = params["conv_w"].shape[-1]
    nb = params["out_w"].shape[-1]
    cin_p = max(16, _round_up(cin_eff, 16))
    cf_p = _round_up(cf, 128)      # lane-dense feature width
    nb_s = _round_up(nb, 8)        # sublane-aligned (unpadded-to-128) bin count

    # --- padded / bf16 weights (zero padding keeps padded channels exactly 0) ---
    wc = jnp.pad(params["conv_w"],
                 ((0, 0), (0, 0), (0, cin_p - cin_eff), (0, cf_p - cf)))
    wc = wc.reshape(9, cin_p, cf_p).astype(jnp.bfloat16)
    bc = jnp.pad(params["conv_b"], (0, cf_p - cf)).reshape(1, cf_p)
    wr = jnp.pad(params["res_w"], ((0, cf_p - cf), (0, cf_p - cf))).astype(jnp.bfloat16)
    br = jnp.pad(params["res_b"], (0, cf_p - cf)).reshape(1, cf_p)
    # head weight pre-transposed -> (nb_s, cf_p); bias as column (nb_s, 1)
    wot = jnp.pad(params["out_w"],
                  ((0, cf_p - cf), (0, nb_s - nb))).T.astype(jnp.bfloat16)
    bo = jnp.pad(params["out_b"], (0, nb_s - nb)).reshape(nb_s, 1)

    # --- caption -> FiLM (gamma, beta): tiny (N,L,E), plain JAX (no launch) ---
    # TODO(synk): real caption encoder is an LSTM; masked mean pool stands in.
    emb = jnp.take(params["emb_w"], caption, axis=0, mode="clip")      # (N, L, E)
    L = caption.shape[1]
    mask = (jnp.arange(L)[None, :] < caption_l[:, None]).astype(jnp.float32)
    pooled = (emb * mask[..., None]).sum(1) / jnp.maximum(mask.sum(1, keepdims=True), 1.0)
    gbv = pooled @ params["film_w"] + params["film_b"]                 # (N, 2*cf)
    gamma = jnp.pad(gbv[:, :cf], ((0, 0), (0, cf_p - cf)))
    beta = jnp.pad(gbv[:, cf:], ((0, 0), (0, cf_p - cf)))
    gb = jnp.stack([gamma, beta], axis=1)                              # (N, 2, cf_p)

    # --- padded bf16 image, row-tiled with a 1-row halo (no 9x im2col) ---
    xp = jnp.pad(x, ((0, 0), (1, 1), (1, 1), (0, cin_p - cin_eff))).astype(jnp.bfloat16)
    th = _pick_row_tile(H, W, nb_s, cf_p)
    nt = H // th
    if nt == 1:
        xt = xp                                                        # (N, H+2, W+2, cin_p)
    else:
        # TODO(synk): duplicates 2 halo rows per tile in HBM; an overlapping
        # (pl.Element) BlockSpec would avoid even this small duplication.
        xt = jnp.concatenate(
            [xp[:, i * th:i * th + th + 2][:, None] for i in range(nt)], axis=1)
        xt = xt.reshape(N * nt, th + 2, W + 2, cin_p)

    m = th * W
    logits = pl.pallas_call(
        _fused_colorize_kernel,
        out_shape=jax.ShapeDtypeStruct((N, nb_s, H * W), jnp.float32),
        grid=(N, nt),
        in_specs=[
            pl.BlockSpec((1, th + 2, W + 2, cin_p), lambda b, t: (b * nt + t, 0, 0, 0)),
            pl.BlockSpec((9, cin_p, cf_p), lambda b, t: (0, 0, 0)),    # conv weights
            pl.BlockSpec((1, cf_p), lambda b, t: (0, 0)),              # conv bias
            pl.BlockSpec((1, 2, cf_p), lambda b, t: (b, 0, 0)),        # gamma/beta
            pl.BlockSpec((cf_p, cf_p), lambda b, t: (0, 0)),           # res weight
            pl.BlockSpec((1, cf_p), lambda b, t: (0, 0)),              # res bias
            pl.BlockSpec((nb_s, cf_p), lambda b, t: (0, 0)),           # head weight^T
            pl.BlockSpec((nb_s, 1), lambda b, t: (0, 0)),              # head bias (col)
        ],
        out_specs=pl.BlockSpec((1, nb_s, m), lambda b, t: (b, 0, t)),
        compiler_params=pltpu.CompilerParams(
            dimension_semantics=("parallel", "parallel"),
            vmem_limit_bytes=32 * 1024 * 1024),
    )(xt, wc, bc, gb, wr, br, wot, bo)

    # Kernel output is already channel-major; this reshape is metadata-only.
    out = logits.reshape(N, nb_s, H, W)
    if nb_s != nb:
        out = out[:, :nb]
    # network returns intermediates; ColorizationBaseline takes output[-1]
    return out


if __name__ == "__main__":
    key = jax.random.PRNGKey(0)
    pk, ik, ck = jax.random.split(key, 3)

    params = init_params(pk, cin=3, use_loc=True, c_feat=32, vocab=50, emb=32, n_bins=64)

    image = jax.random.normal(ik, (2, 3, 16, 16), jnp.float32)         # NCHW like PyTorch
    caption = jax.random.randint(ck, (2, 8), 0, 50, dtype=jnp.int32)   # token ids
    caption_l = jnp.array([8, 5], dtype=jnp.int32)                     # caption lengths

    fwd = jax.jit(colorization_baseline_forward, static_argnames=("use_loc",))
    out = fwd(params, image, caption, caption_l, use_loc=True)
    jax.block_until_ready(out)
    assert out.shape == (2, 64, 16, 16) and out.dtype == jnp.float32
    print("KERNEL_OK")
</pallas_src>

<mosaic_0001>
module attributes {stable_mosaic.version = 11 : i64} {
  func.func @_fused_colorize_kernel(%arg0: i32, %arg1: i32, %arg2: memref<1x18x18x16xbf16, #tpu.memory_space<vmem>>, %arg3: memref<9x16x128xbf16, #tpu.memory_space<vmem>>, %arg4: memref<1x128xf32, #tpu.memory_space<vmem>>, %arg5: memref<1x2x128xf32, #tpu.memory_space<vmem>>, %arg6: memref<128x128xbf16, #tpu.memory_space<vmem>>, %arg7: memref<1x128xf32, #tpu.memory_space<vmem>>, %arg8: memref<64x128xbf16, #tpu.memory_space<vmem>>, %arg9: memref<64x1xf32, #tpu.memory_space<vmem>>, %arg10: memref<1x64x256xf32, #tpu.memory_space<vmem>>) attributes {dimension_semantics = [#tpu.dimension_semantics<parallel>, #tpu.dimension_semantics<parallel>], iteration_bounds = array<i64: 2, 1>, scalar_prefetch = 0 : i64, scratch_operands = 0 : i64, tpu.core_type = #tpu.core_type<tc>, window_params = [{transform_indices = @transform_0, window_bounds = array<i64: 1, 18, 18, 16>}, {pipeline_mode = #tpu.pipeline_mode<synchronous>, transform_indices = @transform_1, window_bounds = array<i64: 9, 16, 128>}, {pipeline_mode = #tpu.pipeline_mode<synchronous>, transform_indices = @transform_2, window_bounds = array<i64: 1, 128>}, {transform_indices = @transform_3, window_bounds = array<i64: 1, 2, 128>}, {pipeline_mode = #tpu.pipeline_mode<synchronous>, transform_indices = @transform_4, window_bounds = array<i64: 128, 128>}, {pipeline_mode = #tpu.pipeline_mode<synchronous>, transform_indices = @transform_5, window_bounds = array<i64: 1, 128>}, {pipeline_mode = #tpu.pipeline_mode<synchronous>, transform_indices = @transform_6, window_bounds = array<i64: 64, 128>}, {pipeline_mode = #tpu.pipeline_mode<synchronous>, transform_indices = @transform_7, window_bounds = array<i64: 64, 1>}, {transform_indices = @transform_8, window_bounds = array<i64: 1, 64, 256>}]} {
    %c0 = arith.constant 0 : index
    %c0_0 = arith.constant 0 : index
    %c0_1 = arith.constant 0 : index
    %c0_2 = arith.constant 0 : index
    %0 = vector.load %arg2[%c0, %c0_0, %c0_1, %c0_2] : memref<1x18x18x16xbf16, #tpu.memory_space<vmem>>, vector<1x18x18x16xbf16>
    %1 = vector.shape_cast %0 : vector<1x18x18x16xbf16> to vector<18x18x16xbf16>
    %cst = arith.constant 0.000000e+00 : f32
    %2 = vector.broadcast %cst : f32 to vector<256x128xf32>
    %3 = vector.extract_strided_slice %1 {offsets = [0, 0, 0], sizes = [16, 16, 16], strides = [1, 1, 1]} : vector<18x18x16xbf16> to vector<16x16x16xbf16>
    %4 = vector.shape_cast %3 : vector<16x16x16xbf16> to vector<256x16xbf16>
    %c0_3 = arith.constant 0 : index
    %c0_4 = arith.constant 0 : index
    %c0_5 = arith.constant 0 : index
    %5 = vector.load %arg3[%c0_3, %c0_4, %c0_5] : memref<9x16x128xbf16, #tpu.memory_space<vmem>>, vector<1x16x128xbf16>
    %6 = vector.shape_cast %5 : vector<1x16x128xbf16> to vector<16x128xbf16>
    %cst_6 = arith.constant dense<0.000000e+00> : vector<256x128xf32>
    %7 = tpu.matmul %4, %6, %cst_6 {dimension_numbers = #tpu.dot_dimension_numbers<[1], [0], [0], [1], [0, 0, 1, 1], [], []>} : vector<256x16xbf16>, vector<16x128xbf16>, vector<256x128xf32> -> vector<256x128xf32>
    %8 = arith.addf %2, %7 : vector<256x128xf32>
    %9 = vector.extract_strided_slice %1 {offsets = [0, 1, 0], sizes = [16, 16, 16], strides = [1, 1, 1]} : vector<18x18x16xbf16> to vector<16x16x16xbf16>
    %10 = vector.shape_cast %9 : vector<16x16x16xbf16> to vector<256x16xbf16>
    %c1 = arith.constant 1 : index
    %c0_7 = arith.constant 0 : index
    %c0_8 = arith.constant 0 : index
    %11 = vector.load %arg3[%c1, %c0_7, %c0_8] : memref<9x16x128xbf16, #tpu.memory_space<vmem>>, vector<1x16x128xbf16>
    %12 = vector.shape_cast %11 : vector<1x16x128xbf16> to vector<16x128xbf16>
    %cst_9 = arith.constant dense<0.000000e+00> : vector<256x128xf32>
    %13 = tpu.matmul %10, %12, %cst_9 {dimension_numbers = #tpu.dot_dimension_numbers<[1], [0], [0], [1], [0, 0, 1, 1], [], []>} : vector<256x16xbf16>, vector<16x128xbf16>, vector<256x128xf32> -> vector<256x128xf32>
    %14 = arith.addf %8, %13 : vector<256x128xf32>
    %15 = vector.extract_strided_slice %1 {offsets = [0, 2, 0], sizes = [16, 16, 16], strides = [1, 1, 1]} : vector<18x18x16xbf16> to vector<16x16x16xbf16>
    %16 = vector.shape_cast %15 : vector<16x16x16xbf16> to vector<256x16xbf16>
    %c2 = arith.constant 2 : index
    %c0_10 = arith.constant 0 : index
    %c0_11 = arith.constant 0 : index
    %17 = vector.load %arg3[%c2, %c0_10, %c0_11] : memref<9x16x128xbf16, #tpu.memory_space<vmem>>, vector<1x16x128xbf16>
    %18 = vector.shape_cast %17 : vector<1x16x128xbf16> to vector<16x128xbf16>
    %cst_12 = arith.constant dense<0.000000e+00> : vector<256x128xf32>
    %19 = tpu.matmul %16, %18, %cst_12 {dimension_numbers = #tpu.dot_dimension_numbers<[1], [0], [0], [1], [0, 0, 1, 1], [], []>} : vector<256x16xbf16>, vector<16x128xbf16>, vector<256x128xf32> -> vector<256x128xf32>
    %20 = arith.addf %14, %19 : vector<256x128xf32>
    %21 = vector.extract_strided_slice %1 {offsets = [1, 0, 0], sizes = [16, 16, 16], strides = [1, 1, 1]} : vector<18x18x16xbf16> to vector<16x16x16xbf16>
    %22 = vector.shape_cast %21 : vector<16x16x16xbf16> to vector<256x16xbf16>
    %c3 = arith.constant 3 : index
    %c0_13 = arith.constant 0 : index
    %c0_14 = arith.constant 0 : index
    %23 = vector.load %arg3[%c3, %c0_13, %c0_14] : memref<9x16x128xbf16, #tpu.memory_space<vmem>>, vector<1x16x128xbf16>
    %24 = vector.shape_cast %23 : vector<1x16x128xbf16> to vector<16x128xbf16>
    %cst_15 = arith.constant dense<0.000000e+00> : vector<256x128xf32>
    %25 = tpu.matmul %22, %24, %cst_15 {dimension_numbers = #tpu.dot_dimension_numbers<[1], [0], [0], [1], [0, 0, 1, 1], [], []>} : vector<256x16xbf16>, vector<16x128xbf16>, vector<256x128xf32> -> vector<256x128xf32>
    %26 = arith.addf %20, %25 : vector<256x128xf32>
    %27 = vector.extract_strided_slice %1 {offsets = [1, 1, 0], sizes = [16, 16, 16], strides = [1, 1, 1]} : vector<18x18x16xbf16> to vector<16x16x16xbf16>
    %28 = vector.shape_cast %27 : vector<16x16x16xbf16> to vector<256x16xbf16>
    %c4 = arith.constant 4 : index
    %c0_16 = arith.constant 0 : index
    %c0_17 = arith.constant 0 : index
    %29 = vector.load %arg3[%c4, %c0_16, %c0_17] : memref<9x16x128xbf16, #tpu.memory_space<vmem>>, vector<1x16x128xbf16>
    %30 = vector.shape_cast %29 : vector<1x16x128xbf16> to vector<16x128xbf16>
    %cst_18 = arith.constant dense<0.000000e+00> : vector<256x128xf32>
    %31 = tpu.matmul %28, %30, %cst_18 {dimension_numbers = #tpu.dot_dimension_numbers<[1], [0], [0], [1], [0, 0, 1, 1], [], []>} : vector<256x16xbf16>, vector<16x128xbf16>, vector<256x128xf32> -> vector<256x128xf32>
    %32 = arith.addf %26, %31 : vector<256x128xf32>
    %33 = vector.extract_strided_slice %1 {offsets = [1, 2, 0], sizes = [16, 16, 16], strides = [1, 1, 1]} : vector<18x18x16xbf16> to vector<16x16x16xbf16>
    %34 = vector.shape_cast %33 : vector<16x16x16xbf16> to vector<256x16xbf16>
    %c5 = arith.constant 5 : index
    %c0_19 = arith.constant 0 : index
    %c0_20 = arith.constant 0 : index
    %35 = vector.load %arg3[%c5, %c0_19, %c0_20] : memref<9x16x128xbf16, #tpu.memory_space<vmem>>, vector<1x16x128xbf16>
    %36 = vector.shape_cast %35 : vector<1x16x128xbf16> to vector<16x128xbf16>
    %cst_21 = arith.constant dense<0.000000e+00> : vector<256x128xf32>
    %37 = tpu.matmul %34, %36, %cst_21 {dimension_numbers = #tpu.dot_dimension_numbers<[1], [0], [0], [1], [0, 0, 1, 1], [], []>} : vector<256x16xbf16>, vector<16x128xbf16>, vector<256x128xf32> -> vector<256x128xf32>
    %38 = arith.addf %32, %37 : vector<256x128xf32>
    %39 = vector.extract_strided_slice %1 {offsets = [2, 0, 0], sizes = [16, 16, 16], strides = [1, 1, 1]} : vector<18x18x16xbf16> to vector<16x16x16xbf16>
    %40 = vector.shape_cast %39 : vector<16x16x16xbf16> to vector<256x16xbf16>
    %c6 = arith.constant 6 : index
    %c0_22 = arith.constant 0 : index
    %c0_23 = arith.constant 0 : index
    %41 = vector.load %arg3[%c6, %c0_22, %c0_23] : memref<9x16x128xbf16, #tpu.memory_space<vmem>>, vector<1x16x128xbf16>
    %42 = vector.shape_cast %41 : vector<1x16x128xbf16> to vector<16x128xbf16>
    %cst_24 = arith.constant dense<0.000000e+00> : vector<256x128xf32>
    %43 = tpu.matmul %40, %42, %cst_24 {dimension_numbers = #tpu.dot_dimension_numbers<[1], [0], [0], [1], [0, 0, 1, 1], [], []>} : vector<256x16xbf16>, vector<16x128xbf16>, vector<256x128xf32> -> vector<256x128xf32>
    %44 = arith.addf %38, %43 : vector<256x128xf32>
    %45 = vector.extract_strided_slice %1 {offsets = [2, 1, 0], sizes = [16, 16, 16], strides = [1, 1, 1]} : vector<18x18x16xbf16> to vector<16x16x16xbf16>
    %46 = vector.shape_cast %45 : vector<16x16x16xbf16> to vector<256x16xbf16>
    %c7 = arith.constant 7 : index
    %c0_25 = arith.constant 0 : index
    %c0_26 = arith.constant 0 : index
    %47 = vector.load %arg3[%c7, %c0_25, %c0_26] : memref<9x16x128xbf16, #tpu.memory_space<vmem>>, vector<1x16x128xbf16>
    %48 = vector.shape_cast %47 : vector<1x16x128xbf16> to vector<16x128xbf16>
    %cst_27 = arith.constant dense<0.000000e+00> : vector<256x128xf32>
    %49 = tpu.matmul %46, %48, %cst_27 {dimension_numbers = #tpu.dot_dimension_numbers<[1], [0], [0], [1], [0, 0, 1, 1], [], []>} : vector<256x16xbf16>, vector<16x128xbf16>, vector<256x128xf32> -> vector<256x128xf32>
    %50 = arith.addf %44, %49 : vector<256x128xf32>
    %51 = vector.extract_strided_slice %1 {offsets = [2, 2, 0], sizes = [16, 16, 16], strides = [1, 1, 1]} : vector<18x18x16xbf16> to vector<16x16x16xbf16>
    %52 = vector.shape_cast %51 : vector<16x16x16xbf16> to vector<256x16xbf16>
    %c8 = arith.constant 8 : index
    %c0_28 = arith.constant 0 : index
    %c0_29 = arith.constant 0 : index
    %53 = vector.load %arg3[%c8, %c0_28, %c0_29] : memref<9x16x128xbf16, #tpu.memory_space<vmem>>, vector<1x16x128xbf16>
    %54 = vector.shape_cast %53 : vector<1x16x128xbf16> to vector<16x128xbf16>
    %cst_30 = arith.constant dense<0.000000e+00> : vector<256x128xf32>
    %55 = tpu.matmul %52, %54, %cst_30 {dimension_numbers = #tpu.dot_dimension_numbers<[1], [0], [0], [1], [0, 0, 1, 1], [], []>} : vector<256x16xbf16>, vector<16x128xbf16>, vector<256x128xf32> -> vector<256x128xf32>
    %56 = arith.addf %50, %55 : vector<256x128xf32>
    %c0_31 = arith.constant 0 : index
    %c0_32 = arith.constant 0 : index
    %57 = vector.load %arg4[%c0_31, %c0_32] : memref<1x128xf32, #tpu.memory_space<vmem>>, vector<1x128xf32>
    %58 = vector.broadcast %57 : vector<1x128xf32> to vector<256x128xf32>
    %59 = arith.addf %56, %58 : vector<256x128xf32>
    %cst_33 = arith.constant 0.000000e+00 : f32
    %60 = vector.broadcast %cst_33 : f32 to vector<256x128xf32>
    %61 = arith.maximumf %59, %60 : vector<256x128xf32>
    %c0_34 = arith.constant 0 : index
    %c0_35 = arith.constant 0 : index
    %c0_36 = arith.constant 0 : index
    %62 = vector.load %arg5[%c0_34, %c0_35, %c0_36] : memref<1x2x128xf32, #tpu.memory_space<vmem>>, vector<1x2x128xf32>
    %63 = vector.shape_cast %62 : vector<1x2x128xf32> to vector<2x128xf32>
    %64 = vector.extract_strided_slice %63 {offsets = [0, 0], sizes = [1, 128], strides = [1, 1]} : vector<2x128xf32> to vector<1x128xf32>
    %65 = vector.broadcast %64 : vector<1x128xf32> to vector<256x128xf32>
    %66 = arith.mulf %61, %65 : vector<256x128xf32>
    %67 = vector.extract_strided_slice %63 {offsets = [1, 0], sizes = [1, 128], strides = [1, 1]} : vector<2x128xf32> to vector<1x128xf32>
    %68 = vector.broadcast %67 : vector<1x128xf32> to vector<256x128xf32>
    %69 = arith.addf %66, %68 : vector<256x128xf32>
    %cst_37 = arith.constant 0.000000e+00 : f32
    %70 = vector.broadcast %cst_37 : f32 to vector<256x128xf32>
    %71 = arith.maximumf %69, %70 : vector<256x128xf32>
    %72 = arith.truncf %71 : vector<256x128xf32> to vector<256x128xbf16>
    %c0_38 = arith.constant 0 : index
    %c0_39 = arith.constant 0 : index
    %73 = vector.load %arg6[%c0_38, %c0_39] : memref<128x128xbf16, #tpu.memory_space<vmem>>, vector<128x128xbf16>
    %cst_40 = arith.constant dense<0.000000e+00> : vector<256x128xf32>
    %74 = tpu.matmul %72, %73, %cst_40 {dimension_numbers = #tpu.dot_dimension_numbers<[1], [0], [0], [1], [0, 0, 1, 1], [], []>} : vector<256x128xbf16>, vector<128x128xbf16>, vector<256x128xf32> -> vector<256x128xf32>
    %c0_41 = arith.constant 0 : index
    %c0_42 = arith.constant 0 : index
    %75 = vector.load %arg7[%c0_41, %c0_42] : memref<1x128xf32, #tpu.memory_space<vmem>>, vector<1x128xf32>
    %76 = vector.broadcast %75 : vector<1x128xf32> to vector<256x128xf32>
    %77 = arith.addf %74, %76 : vector<256x128xf32>
    %cst_43 = arith.constant 0.000000e+00 : f32
    %78 = vector.broadcast %cst_43 : f32 to vector<256x128xf32>
    %79 = arith.maximumf %77, %78 : vector<256x128xf32>
    %80 = arith.addf %79, %61 : vector<256x128xf32>
    %81 = tpu.transpose %80, [1, 0] : vector<256x128xf32> -> vector<128x256xf32>
    %82 = arith.truncf %81 : vector<128x256xf32> to vector<128x256xbf16>
    %c0_44 = arith.constant 0 : index
    %c0_45 = arith.constant 0 : index
    %83 = vector.load %arg8[%c0_44, %c0_45] : memref<64x128xbf16, #tpu.memory_space<vmem>>, vector<64x128xbf16>
    %cst_46 = arith.constant dense<0.000000e+00> : vector<64x256xf32>
    %84 = tpu.matmul %83, %82, %cst_46 {dimension_numbers = #tpu.dot_dimension_numbers<[1], [0], [0], [1], [0, 0, 1, 1], [], []>} : vector<64x128xbf16>, vector<128x256xbf16>, vector<64x256xf32> -> vector<64x256xf32>
    %c0_47 = arith.constant 0 : index
    %c0_48 = arith.constant 0 : index
    %85 = vector.load %arg9[%c0_47, %c0_48] : memref<64x1xf32, #tpu.memory_space<vmem>>, vector<64x1xf32>
    %86 = vector.broadcast %85 : vector<64x1xf32> to vector<64x256xf32>
    %87 = arith.addf %84, %86 : vector<64x256xf32>
    %c0_49 = arith.constant 0 : index
    %c0_50 = arith.constant 0 : index
    %c0_51 = arith.constant 0 : index
    %88 = vector.load %arg10[%c0_49, %c0_50, %c0_51] : memref<1x64x256xf32, #tpu.memory_space<vmem>>, vector<1x64x256xf32>
    %89 = vector.shape_cast %88 : vector<1x64x256xf32> to vector<64x256xf32>
    %90 = vector.shape_cast %87 : vector<64x256xf32> to vector<1x64x256xf32>
    tpu.vector_store %arg10[%c0_49, %c0_50, %c0_51], %90 {strides = array<i32>} : memref<1x64x256xf32, #tpu.memory_space<vmem>>, vector<1x64x256xf32>,
    return
  }
  func.func @transform_0(%arg0: i32, %arg1: i32) -> (i32, i32, i32, i32) {
    %c1_i32 = arith.constant 1 : i32
    %0 = arith.muli %arg0, %c1_i32 : i32
    %1 = arith.addi %0, %arg1 : i32
    %c0_i32 = arith.constant 0 : i32
    %c0_i32_0 = arith.constant 0 : i32
    %c0_i32_1 = arith.constant 0 : i32
    %c0_i32_2 = arith.constant 0 : i32
    return %1, %c0_i32, %c0_i32_0, %c0_i32_1 : i32, i32, i32, i32
  }
  func.func @transform_1(%arg0: i32, %arg1: i32) -> (i32, i32, i32) {
    %c0_i32 = arith.constant 0 : i32
    %c0_i32_0 = arith.constant 0 : i32
    %c0_i32_1 = arith.constant 0 : i32
    %c0_i32_2 = arith.constant 0 : i32
    return %c0_i32, %c0_i32_0, %c0_i32_1 : i32, i32, i32
  }
  func.func @transform_2(%arg0: i32, %arg1: i32) -> (i32, i32) {
    %c0_i32 = arith.constant 0 : i32
    %c0_i32_0 = arith.constant 0 : i32
    %c0_i32_1 = arith.constant 0 : i32
    return %c0_i32, %c0_i32_0 : i32, i32
  }
  func.func @transform_3(%arg0: i32, %arg1: i32) -> (i32, i32, i32) {
    %c0_i32 = arith.constant 0 : i32
    %c0_i32_0 = arith.constant 0 : i32
    %c0_i32_1 = arith.constant 0 : i32
    return %arg0, %c0_i32, %c0_i32_0 : i32, i32, i32
  }
  func.func @transform_4(%arg0: i32, %arg1: i32) -> (i32, i32) {
    %c0_i32 = arith.constant 0 : i32
    %c0_i32_0 = arith.constant 0 : i32
    %c0_i32_1 = arith.constant 0 : i32
    return %c0_i32, %c0_i32_0 : i32, i32
  }
  func.func @transform_5(%arg0: i32, %arg1: i32) -> (i32, i32) {
    %c0_i32 = arith.constant 0 : i32
    %c0_i32_0 = arith.constant 0 : i32
    %c0_i32_1 = arith.constant 0 : i32
    return %c0_i32, %c0_i32_0 : i32, i32
  }
  func.func @transform_6(%arg0: i32, %arg1: i32) -> (i32, i32) {
    %c0_i32 = arith.constant 0 : i32
    %c0_i32_0 = arith.constant 0 : i32
    %c0_i32_1 = arith.constant 0 : i32
    return %c0_i32, %c0_i32_0 : i32, i32
  }
  func.func @transform_7(%arg0: i32, %arg1: i32) -> (i32, i32) {
    %c0_i32 = arith.constant 0 : i32
    %c0_i32_0 = arith.constant 0 : i32
    %c0_i32_1 = arith.constant 0 : i32
    return %c0_i32, %c0_i32_0 : i32, i32
  }
  func.func @transform_8(%arg0: i32, %arg1: i32) -> (i32, i32, i32) {
    %c0_i32 = arith.constant 0 : i32
    %c0_i32_0 = arith.constant 0 : i32
    return %arg0, %c0_i32, %arg1 : i32, i32, i32
  }
}

</mosaic_0001>

<bundles_post_ra>
// kernel: colorization_baseline_forward.1
= control target key start
LH: loop header
LB: loop body
LE: loop exit
PB: predicated region body
PF: predicated region fallthrough
CT: control target
= control target key end

     0   :  { %s4983_s27 = smov 0   ;;  %s4985_s28 = smov 0   ;;  %s7033_s0 = inlined_call_operand.vmem [shape: bf16[2,18,18,16], index: 0, kind: input, shape index: {}]   ;;  %s7034_s1 = inlined_call_operand.vmem [shape: bf16[9,16,128], index: 1, kind: input, shape index: {}]   ;;  %s7035_s2 = inlined_call_operand.vmem [shape: f32[1,128], index: 2, kind: input, shape index: {}]   ;;  %s7036_s3 = inlined_call_operand.vmem [shape: f32[2,2,128], index: 3, kind: input, shape index: {}]   ;;  %s7037_s4 = inlined_call_operand.vmem [shape: bf16[128,128], index: 4, kind: input, shape index: {}]   ;;  %s7038_s5 = inlined_call_operand.vmem [shape: f32[1,128], index: 5, kind: input, shape index: {}]   ;;  %s7039_s6 = inlined_call_operand.vmem [shape: bf16[64,128], index: 6, kind: input, shape index: {}]   ;;  %s7040_s7 = inlined_call_operand.vmem [shape: f32[64,1], index: 7, kind: input, shape index: {}]   ;;  %s7041_s8 = inlined_call_operand.vmem [shape: f32[2,64,256], index: 8, kind: output, shape index: {}]  }
   0x1   :  { %s4987_s29 = smov 0  }
   0x2 LB: > { %s30_s30 = sadd.s32 1, %s4931_s28  ;;  %p3938_p0 = scmp.ge.s32.totalorder %s4935_s29, 1  ;;  %s4935_s29 = sphi %s4987_s29, %s18_s29   ;;  %s4931_s28 = sphi %s4985_s28, %s7269_s28   ;;  %s4927_s27 = sphi %s4983_s27, %s7268_s27  }
   0x3   : > { %p32_p1 = scmp.ge.s32.totalorder %s30_s30, 2  ;;  %p289_p2 = scmp.lt.s32.totalorder %s4935_s29, 3 }
   0x5   : > { %s7271_s30 = smov (%p32_p1, %s30_s30), 0  ;;  %p290_p3 = pnand %p3938_p0, %p289_p2 }
   0x7   : > { %293 = sbr.rel (%p290_p3) target bundleno = 1192 (0x4a8), region = 52 }
   0xc   : > { %v4874_v0 = vld [vmem:[%s7034_s1 + $0x8] sm:$0xff]   ;;  %p333_p4 = scmp.lt.s32.totalorder %s4927_s27, 1  ;;  %v5007_v1 = vld [vmem:[%s7034_s1] sm:$0xff]   ;;  %v5014_v2 = vld [vmem:[%s7034_s1 + $0x10] sm:$0xff]   ;;  %vm410_vm0 = vsmask.f32 3328 }
   0xd   : > { %4378 = vmatprep.subr.bf16.mxu0 %v4874_v0  ;;  %4732 = vmatprep.subr.bf16.mxu1 %v4874_v0  ;;  %vm411_vm1 = vsmask.f32 7440  ;;  %vm854_vm2 = vcmask 130048   ;;  %vm1375_vm4 = vcmask 1042432   ;;  %vm1376_vm5 = vcmask 1046532  }
   0xe   : > { %s7273_s27 = smov (!%p333_p4, %s4927_s27), 1  ;;  %4379 = vmatpush3.bf16.msra.mxu0 %v4874_v0  ;;  %4733 = vmatpush3.bf16.msra.mxu1 %v4874_v0  ;;  %vm5060_vm3 = vmor %vm410_vm0, %vm411_vm1 }
   0xf   : > { %s4734_s15 = smul.u32 216, %s7273_s27  ;;  %4412 = vmatprep.subr.bf16.mxu1 %v5007_v1  ;;  %4446 = vmatprep.subr.bf16.mxu0 %v5014_v2  ;;  %vm5437_vm6 = vmor %vm1375_vm4, %vm1376_vm5  ;;  %s3940_s11 = sshll.u32 %s7273_s27, 1 }
  0x10   : > { %s342_s14 = scalar_lea.vmem %s7036_s3, %s3940_s11  ;;  %s4200_s25 = sshll.u32 %s7273_s27, 7 }
  0x11   : > { %s5022_s18 = scalar_lea.vmem %s7033_s0, %s4734_s15  ;;  %s7006_s10 = scalar_lea.vmem %s7041_s8, %s4200_s25 }
  0x12   : > { %v5025_v3 = vld [vmem:[%s5022_s18] sm:$0xf]  ;;  %v5028_v4 = vld [vmem:[%s5022_s18 + $0x4] sm:$0xf]  ;;  %v5031_v5 = vld [vmem:[%s5022_s18 + $0x8] sm:$0x1] }
  0x13   : > { %v414_v6 = vshrl.u32 %v5025_v3, 16  ;;  %v417_v7 = vshll.u32 %v5025_v3, 16  ;;  %v423_v8 = vshll.u32 %v5028_v4, 16  ;;  %v427_v9 = vshrl.u32 %v5028_v4, 16  ;;  %v5038_v10 = vld [vmem:[%s5022_s18 + $0x90] sm:$0xf] }
  0x14   : > { %v433_v11 = vshll.u32 %v5031_v5, 16  ;;  %v5042_v12 = vld [vmem:[%s5022_s18 + $0x94] sm:$0xf]  ;;  %v5045_v13 = vld [vmem:[%s5022_s18 + $0x98] sm:$0x1]  ;;  %v702_v19 = vshrl.u32 %v5038_v10, 16  ;;  %v3978_v60 = vcombine.low %v5025_v3, %v5028_v4 }
  0x15   : > { %7123 = vst [vmem:[#allocation2_spill] sm:$0xff] %v5045_v13  ;;  %v416_v14 = vrot.slane %v414_v6, 4  ;;  %v419_v15 = vrot.slane %v417_v7, 5  ;;  %v425_v16 = vrot.slane %v423_v8, 5  ;;  %v429_v17 = vrot.slane %v427_v9, 4 }
  0x16   : > { %v435_v18 = vrot.slane %v433_v11, 5  ;;  %v705_v20 = vshll.u32 %v5038_v10, 16  ;;  %v711_v21 = vshll.u32 %v5042_v12, 16  ;;  %v715_v24 = vshrl.u32 %v5042_v12, 16  ;;  %v5053_v26 = vld [vmem:[%s5022_s18 + $0xc] sm:$0xf] }
  0x17   : > { %v420_v22 = vor.u32 %v419_v15, %v416_v14  ;;  %v430_v23 = vor.u32 %v429_v17, %v425_v16  ;;  %v721_v25 = vshll.u32 %v5045_v13, 16  ;;  %v5056_v27 = vld [vmem:[%s5022_s18 + $0x10] sm:$0xf]  ;;  %v704_v30 = vrot.slane %v702_v19, 4  ;;  %v5066_v38 = vld [vmem:[%s5022_s18 + $0x14] sm:$0x1] }
  0x18   : > { %v707_v31 = vrot.slane %v705_v20, 5  ;;  %v713_v32 = vrot.slane %v711_v21, 5  ;;  %v717_v35 = vrot.slane %v715_v24, 4  ;;  %v438_v39 = vshrl.u32 %v5053_v26, 16  ;;  %v5077_v50 = vld [vmem:[%s5022_s18 + $0x9c] sm:$0xf] }
  0x19   : > { %v421_v33 = vrot.slane %v420_v22, 4  ;;  %v431_v34 = vrot.slane %v430_v23, 4  ;;  %v723_v36 = vrot.slane %v721_v25, 5  ;;  %v441_v40 = vshll.u32 %v5053_v26, 16  ;;  %v5081_v55 = vld [vmem:[%s5022_s18 + $0xa0] sm:$0xf] }
  0x1a   : > { %v708_v37 = vor.u32 %v707_v31, %v704_v30  ;;  %v447_v41 = vshll.u32 %v5056_v27, 16  ;;  %v718_v44 = vor.u32 %v717_v35, %v713_v32  ;;  %v451_v45 = vshrl.u32 %v5056_v27, 16  ;;  %v5088_v59 = vld [vmem:[%s5022_s18 + $0xa4] sm:$0x1]  ;;  %v5096_v6 = vld [vmem:[%s5022_s18 + $0x18] sm:$0xf] }
  0x1b   : > { %v426_v42 = vsel %vm5060_vm3, %v421_v33, %v425_v16  ;;  %v436_v43 = vsel %vm5060_vm3, %v431_v34, %v435_v18  ;;  %v440_v48 = vrot.slane %v438_v39, 4  ;;  %v443_v49 = vrot.slane %v441_v40, 5  ;;  %7126 = vst [vmem:[#allocation3_spill] sm:$0xff] %v5088_v59  ;;  %v5105_v18 = vld [vmem:[%s5022_s18 + $0x1c] sm:$0xf] }
  0x1c   : > { %v3945_v46 = vcombine.low %v426_v42, %v436_v43  ;;  %v709_v47 = vrot.slane %v708_v37, 4  ;;  %v719_v51 = vrot.slane %v718_v44, 4  ;;  %v449_v52 = vrot.slane %v447_v41, 5  ;;  %v5112_v22 = vld [vmem:[%s5022_s18 + $0x20] sm:$0x1] }
  0x1d   : > { %v453_v53 = vrot.slane %v451_v45, 4  ;;  %v457_v54 = vshll.u32 %v5066_v38, 16  ;;  %v444_v57 = vor.u32 %v443_v49, %v440_v48  ;;  %v726_v0 = vshrl.u32 %v5077_v50, 16  ;;  %v5127_v37 = vld [vmem:[%s7034_s1 + $0x20] sm:$0xff]   ;;  %v5132_v43 = vld [vmem:[%s5022_s18 + $0xac] sm:$0xf] }
  0x1e   : > { %4380 = vmatprep.mubr.msk.bf16.mxu0 %vm854_vm2, %v3945_v46  ;;  %v714_v56 = vsel %vm5060_vm3, %v709_v47, %v713_v32  ;;  %v724_v61 = vsel %vm5060_vm3, %v719_v51, %v723_v36  ;;  %v729_v9 = vshll.u32 %v5077_v50, 16  ;;  %v735_v11 = vshll.u32 %v5081_v55, 16  ;;  %v5119_v32 = vld [vmem:[%s5022_s18 + $0xa8] sm:$0xf] }
  0x1f   : > { %v454_v62 = vor.u32 %v453_v53, %v449_v52  ;;  %v459_v63 = vrot.slane %v457_v54, 5  ;;  %v5098_v7 = vcombine.low %v714_v56, %v724_v61  ;;  %v445_v8 = vrot.slane %v444_v57, 4  ;;  %v5139_v53 = vld [vmem:[%s5022_s18 + $0xb0] sm:$0x1] }
  0x20   : > { %v728_v15 = vrot.slane %v726_v0, 4  ;;  %v739_v16 = vshrl.u32 %v5081_v55, 16  ;;  %v745_v17 = vshll.u32 %v5088_v59, 16  ;;  %v731_v20 = vrot.slane %v729_v9, 5  ;;  %7129 = vst [vmem:[#allocation6_spill] sm:$0xff] %v5139_v53 }
  0x21   : > { %7127 = vst [vmem:[#allocation4_spill] sm:$0xff] %v5098_v7  ;;  %v455_v14 = vrot.slane %v454_v62, 4  ;;  %4404 = vmatprep.mubr.msk.bf16.mxu1 %vm854_vm2, %v5098_v7  ;;  %v450_v19 = vsel %vm5060_vm3, %v445_v8, %v449_v52  ;;  %v737_v21 = vrot.slane %v735_v11, 5  ;;  %v462_v23 = vshrl.u32 %v5096_v6, 16  ;;  %v5146_v62 = vld [vmem:[%s5022_s18 + $0x24] sm:$0xf] }
  0x22   : > { %v741_v25 = vrot.slane %v739_v16, 4  ;;  %v747_v30 = vrot.slane %v745_v17, 5  ;;  %v465_v31 = vshll.u32 %v5096_v6, 16  ;;  %v732_v34 = vor.u32 %v731_v20, %v728_v15  ;;  %v5161_v17 = vld [vmem:[%s7034_s1 + $0x18] sm:$0xff]  }
  0x23   : > { %v460_v24 = vsel %vm5060_vm3, %v455_v14, %v459_v63  ;;  %v464_v35 = vrot.slane %v462_v23, 4  ;;  %v471_v36 = vshll.u32 %v5105_v18, 16  ;;  %v475_v41 = vshrl.u32 %v5105_v18, 16  ;;  %v5166_v23 = vld [vmem:[%s5022_s18 + $0x2c] sm:$0x1] }
  0x24   : > { %v5121_v33 = vcombine.low %v450_v19, %v460_v24  ;;  %v742_v39 = vor.u32 %v741_v25, %v737_v21  ;;  %v467_v40 = vrot.slane %v465_v31, 5  ;;  %v481_v42 = vshll.u32 %v5112_v22, 16 }
  0x25   : > { %v733_v44 = vrot.slane %v732_v34, 4  ;;  %v473_v45 = vrot.slane %v471_v36, 5  ;;  %v750_v46 = vshrl.u32 %v5119_v32, 16  ;;  %v753_v47 = vshll.u32 %v5119_v32, 16 }
  0x26   : > { %7128 = vst [vmem:[#allocation5_spill] sm:$0xff] %v5121_v33  ;;  %4381 = vmatmul.mubr.msk.bf16.vlgmr.msra.gmra.mxu0 %vm854_vm2, %v5121_v33  ;;  %v743_v48 = vrot.slane %v742_v39, 4  ;;  %v468_v49 = vor.u32 %v467_v40, %v464_v35  ;;  %v477_v51 = vrot.slane %v475_v41, 4  ;;  %v483_v52 = vrot.slane %v481_v42, 5  ;;  %v5174_v35 = vld [vmem:[%s5022_s18 + $0xb4] sm:$0xf] }
  0x27   : > { %4447 = vmatpush3.bf16.msra.mxu0 %v5014_v2  ;;  %v738_v54 = vsel %vm5060_vm3, %v733_v44, %v737_v21  ;;  %v752_v56 = vrot.slane %v750_v46, 4  ;;  %v755_v57 = vrot.slane %v753_v47, 5  ;;  %v759_v61 = vshll.u32 %v5132_v43, 16  ;;  %v5153_v2 = vld [vmem:[%s5022_s18 + $0x28] sm:$0xf]  ;;  %7131 = vst [vmem:[#allocation8_spill] sm:$0xff] %v5174_v35 }
  0x28   : > { %4514 = vmatprep.subr.bf16.mxu0 %v5127_v37  ;;  %v748_v63 = vsel %vm5060_vm3, %v743_v48, %v747_v30  ;;  %v469_v0 = vrot.slane %v468_v49, 4  ;;  %v478_v8 = vor.u32 %v477_v51, %v473_v45  ;;  %v763_v9 = vshrl.u32 %v5132_v43, 16  ;;  %v5180_v42 = vld [vmem:[%s5022_s18 + $0xb8] sm:$0xf] }
  0x29   : > { %v5155_v11 = vcombine.low %v738_v54, %v748_v63  ;;  %v756_v14 = vor.u32 %v755_v57, %v752_v56  ;;  %v761_v15 = vrot.slane %v759_v61, 5  ;;  %v769_v16 = vshll.u32 %v5139_v53, 16  ;;  %7132 = vst [vmem:[#allocation9_spill] sm:$0xff] %v5180_v42  ;;  %v5199_v63 = vld [vmem:[%s5022_s18 + $0x30] sm:$0xf] }
  0x2a   : > { %v474_v19 = vsel %vm5060_vm3, %v469_v0, %v473_v45  ;;  %v479_v20 = vrot.slane %v478_v8, 4  ;;  %v765_v21 = vrot.slane %v763_v9, 4  ;;  %v486_v24 = vshrl.u32 %v5146_v62, 16 }
  0x2b   : > { %7130 = vst [vmem:[#allocation7_spill] sm:$0xff] %v5155_v11  ;;  %4405 = vmatmul.mubr.msk.bf16.vlgmr.msra.gmra.mxu1 %vm854_vm2, %v5155_v11  ;;  %v757_v25 = vrot.slane %v756_v14, 4  ;;  %v771_v30 = vrot.slane %v769_v16, 5  ;;  %v489_v31 = vshll.u32 %v5146_v62, 16  ;;  %v495_v34 = vshll.u32 %v5153_v2, 16 }
  0x2c   : > { %v484_v36 = vsel %vm5060_vm3, %v479_v20, %v483_v52  ;;  %v766_v39 = vor.u32 %v765_v21, %v761_v15  ;;  %v488_v40 = vrot.slane %v486_v24, 4  ;;  %v499_v41 = vshrl.u32 %v5153_v2, 16  ;;  %4413 = vmatpush3.bf16.msra.mxu1 %v5007_v1  ;;  %v5190_v52 = vld [vmem:[%s5022_s18 + $0xbc] sm:$0x1]  ;;  %v5209_v24 = vld [vmem:[%s5022_s18 + $0x38] sm:$0x1] }
  0x2d   : > { %v5183_v44 = vcombine.low %v474_v19, %v484_v36  ;;  %v762_v45 = vsel %vm5060_vm3, %v757_v25, %v761_v15  ;;  %v491_v46 = vrot.slane %v489_v31, 5  ;;  %v497_v47 = vrot.slane %v495_v34, 5  ;;  %4480 = vmatprep.subr.bf16.mxu1 %v5161_v17  ;;  %7134 = vst [vmem:[#allocation11_spill] sm:$0xff] %v5190_v52  ;;  %v5204_v15 = vld [vmem:[%s5022_s18 + $0x34] sm:$0xf] }
  0x2e   : > { %v767_v48 = vrot.slane %v766_v39, 4  ;;  %v501_v49 = vrot.slane %v499_v41, 4  ;;  %v505_v51 = vshll.u32 %v5166_v23, 16  ;;  %v774_v54 = vshrl.u32 %v5174_v35, 16 }
  0x2f   : > { %7133 = vst [vmem:[#allocation10_spill] sm:$0xff] %v5183_v44  ;;  %4384 = vmatprep.mubr.msk.bf16.mxu0 %vm854_vm2, %v5183_v44  ;;  %v492_v1 = vor.u32 %v491_v46, %v488_v40  ;;  %v777_v56 = vshll.u32 %v5174_v35, 16  ;;  %v783_v57 = vshll.u32 %v5180_v42, 16  ;;  %v787_v61 = vshrl.u32 %v5180_v42, 16  ;;  %v5223_v46 = vld [vmem:[%s5022_s18 + $0x40] sm:$0xf] }
  0x30   : > { %v772_v0 = vsel %vm5060_vm3, %v767_v48, %v771_v30  ;;  %v502_v8 = vor.u32 %v501_v49, %v497_v47  ;;  %v507_v9 = vrot.slane %v505_v51, 5  ;;  %v776_v14 = vrot.slane %v774_v54, 4  ;;  %v5214_v30 = vld [vmem:[%s5022_s18 + $0x3c] sm:$0xf] }
  0x31   : > { %v5206_v16 = vcombine.low %v762_v45, %v772_v0  ;;  %v493_v19 = vrot.slane %v492_v1, 4  ;;  %v779_v20 = vrot.slane %v777_v56, 5  ;;  %v785_v21 = vrot.slane %v783_v57, 5 }
  0x32   : > { %v503_v25 = vrot.slane %v502_v8, 4  ;;  %v789_v31 = vrot.slane %v787_v61, 4  ;;  %v793_v34 = vshll.u32 %v5190_v52, 16  ;;  %v510_v36 = vshrl.u32 %v5199_v63, 16 }
  0x33   : > { %7135 = vst [vmem:[#allocation12_spill] sm:$0xff] %v5206_v16  ;;  %4408 = vmatprep.mubr.msk.bf16.mxu1 %vm854_vm2, %v5206_v16  ;;  %v498_v39 = vsel %vm5060_vm3, %v493_v19, %v497_v47  ;;  %v780_v40 = vor.u32 %v779_v20, %v776_v14  ;;  %v513_v41 = vshll.u32 %v5199_v63, 16  ;;  %v519_v45 = vshll.u32 %v5204_v15, 16  ;;  %v5230_v47 = vld [vmem:[%s5022_s18 + $0x44] sm:$0x1] }
  0x34   : > { %v508_v48 = vsel %vm5060_vm3, %v503_v25, %v507_v9  ;;  %v790_v49 = vor.u32 %v789_v31, %v785_v21  ;;  %v795_v51 = vrot.slane %v793_v34, 5  ;;  %v512_v54 = vrot.slane %v510_v36, 4  ;;  %v5236_v9 = vld [vmem:[%s5022_s18 + $0x48] sm:$0xf] }
  0x35   : > { %v5227_v1 = vcombine.low %v498_v39, %v508_v48  ;;  %v781_v56 = vrot.slane %v780_v40, 4  ;;  %v515_v57 = vrot.slane %v513_v41, 5  ;;  %v521_v61 = vrot.slane %v519_v45, 5  ;;  %v5247_v45 = vld [vmem:[%s5022_s18 + $0x4c] sm:$0xf] }
  0x36   : > { %v791_v0 = vrot.slane %v790_v49, 4  ;;  %v523_v8 = vshrl.u32 %v5204_v15, 16  ;;  %v529_v14 = vshll.u32 %v5209_v24, 16  ;;  %v534_v19 = vshrl.u32 %v5214_v30, 16 }
  0x37   : > { %7136 = vst [vmem:[#allocation13_spill] sm:$0xff] %v5227_v1  ;;  %4385 = vmatmul.mubr.msk.bf16.gmra.mxu0 %vm854_vm2, %v5227_v1  ;;  %v786_v20 = vsel %vm5060_vm3, %v781_v56, %v785_v21  ;;  %v516_v25 = vor.u32 %v515_v57, %v512_v54  ;;  %v537_v31 = vshll.u32 %v5214_v30, 16  ;;  %v543_v34 = vshll.u32 %v5223_v46, 16  ;;  %v5252_v21 = vld [vmem:[%s5022_s18 + $0x50] sm:$0x1] }
  0x38   : > { %v796_v36 = vsel %vm5060_vm3, %v791_v0, %v795_v51  ;;  %v525_v39 = vrot.slane %v523_v8, 4  ;;  %v531_v40 = vrot.slane %v529_v14, 5  ;;  %v536_v41 = vrot.slane %v534_v19, 4 }
  0x39   : > { %v5249_v48 = vcombine.low %v786_v20, %v796_v36  ;;  %v517_v49 = vrot.slane %v516_v25, 4  ;;  %v539_v29 = vrot.slane %v537_v31, 5  ;;  %v545_v58 = vrot.slane %v543_v34, 5  ;;  %v5267_v20 = vld [vmem:[%s5022_s18 + $0x54] sm:$0xf] }
  0x3a   : > { %v526_v54 = vor.u32 %v525_v39, %v521_v61  ;;  %v547_v56 = vshrl.u32 %v5223_v46, 16  ;;  %v553_v57 = vshll.u32 %v5230_v47, 16  ;;  %v5258_v51 = vcombine.low %v5053_v26, %v5056_v27  ;;  %v5275_v39 = vld [vmem:[%s5022_s18 + $0x58] sm:$0xf] }
  0x3b   : > { %7137 = vst [vmem:[#allocation14_spill] sm:$0xff] %v5249_v48  ;;  %4409 = vmatmul.mubr.msk.bf16.gmra.mxu1 %vm854_vm2, %v5249_v48  ;;  %v522_v0 = vsel %vm5060_vm3, %v517_v49, %v521_v61  ;;  %v540_v8 = vor.u32 %v539_v29, %v536_v41  ;;  %v558_v14 = vshrl.u32 %v5236_v9, 16  ;;  %v561_v19 = vshll.u32 %v5236_v9, 16  ;;  %v5279_v48 = vld [vmem:[%s5022_s18 + $0x5c] sm:$0x1] }
  0x3c   : > { %7138 = vst [vmem:[#allocation15_spill] sm:$0xff] %v5258_v51  ;;  %v527_v25 = vrot.slane %v526_v54, 4  ;;  %4414 = vmatprep.mubr.msk.bf16.mxu1 %vm854_vm2, %v3978_v60  ;;  %v549_v31 = vrot.slane %v547_v56, 4  ;;  %v555_v34 = vrot.slane %v553_v57, 5  ;;  %v567_v36 = vshll.u32 %v5247_v45, 16 }
  0x3d   : > { %v541_v61 = vrot.slane %v540_v8, 4  ;;  %v560_v29 = vrot.slane %v558_v14, 4  ;;  %v563_v41 = vrot.slane %v561_v19, 5  ;;  %v571_v49 = vshrl.u32 %v5247_v45, 16 }
  0x3e   : > { %v532_v54 = vsel %vm5060_vm3, %v527_v25, %v531_v40  ;;  %v550_v16 = vor.u32 %v549_v31, %v545_v58  ;;  %v569_v11 = vrot.slane %v567_v36, 5  ;;  %v577_v60 = vshll.u32 %v5252_v21, 16  ;;  %v5294_v25 = vld [vmem:[%s5022_s18 + $0x60] sm:$0xf] }
  0x3f   : > { %v5284_v56 = vcombine.low %v522_v0, %v532_v54  ;;  %v546_v57 = vsel %vm5060_vm3, %v541_v61, %v545_v58  ;;  %v564_v8 = vor.u32 %v563_v41, %v560_v29  ;;  %v573_v14 = vrot.slane %v571_v49, 4  ;;  %v5306_v61 = vld [vmem:[%s7034_s1 + $0x28] sm:$0xff]  }
  0x40   : > { %v551_v19 = vrot.slane %v550_v16, 4  ;;  %v579_v7 = vrot.slane %v577_v60, 5  ;;  %v5290_v1 = vcombine.low %v5096_v6, %v5105_v18  ;;  %v582_v40 = vshrl.u32 %v5267_v20, 16  ;;  %v5301_v16 = vld [vmem:[%s5022_s18 + $0x64] sm:$0xf]  ;;  %7141 = vst [vmem:[#allocation18_spill] sm:$0xff] %v5306_v61 }
  0x41   : > { %7139 = vst [vmem:[#allocation16_spill] sm:$0xff] %v5284_v56  ;;  %4388 = vmatprep.mubr.msk.bf16.mxu0 %vm854_vm2, %v5284_v56  ;;  %v565_v0 = vrot.slane %v564_v8, 4  ;;  %v574_v31 = vor.u32 %v573_v14, %v569_v11  ;;  %v585_v58 = vshll.u32 %v5267_v20, 16  ;;  %v591_v36 = vshll.u32 %v5275_v39, 16  ;;  %v5313_v60 = vld [vmem:[%s5022_s18 + $0x68] sm:$0x1] }
  0x42   : > { %7140 = vst [vmem:[#allocation17_spill] sm:$0xff] %v5290_v1  ;;  %v556_v29 = vsel %vm5060_vm3, %v551_v19, %v555_v34  ;;  %v584_v41 = vrot.slane %v582_v40, 4  ;;  %v595_v49 = vshrl.u32 %v5275_v39, 16  ;;  %v601_v54 = vshll.u32 %v5279_v48, 16 }
  0x43   : > { %v5315_v8 = vcombine.low %v546_v57, %v556_v29  ;;  %4415 = vmatmul.mubr.msk.bf16.vlgmr.msra.gmra.mxu1 %vm854_vm2, %v5258_v51  ;;  %v570_v14 = vsel %vm5060_vm3, %v565_v0, %v569_v11  ;;  %v575_v56 = vrot.slane %v574_v31, 4  ;;  %v587_v44 = vrot.slane %v585_v58, 5  ;;  %v5328_v57 = vld [vmem:[%s5022_s18 + $0x6c] sm:$0xf] }
  0x44   : > { %4418 = vmatprep.mubr.msk.bf16.mxu1 %vm854_vm2, %v5290_v1  ;;  %v593_v34 = vrot.slane %v591_v36, 5  ;;  %v597_v19 = vrot.slane %v595_v49, 4  ;;  %v603_v40 = vrot.slane %v601_v54, 5  ;;  %v5325_v33 = vcombine.low %v5146_v62, %v5153_v2  ;;  %4481 = vmatpush3.bf16.msra.mxu1 %v5161_v17  ;;  %v5338_v36 = vld [vmem:[%s5022_s18 + $0x70] sm:$0xf] }
  0x45   : > { %7142 = vst [vmem:[#allocation19_spill] sm:$0xff] %v5315_v8  ;;  %4389 = vmatmul.mubr.msk.bf16.gmra.mxu0 %vm854_vm2, %v5315_v8  ;;  %v580_v11 = vsel %vm5060_vm3, %v575_v56, %v579_v7  ;;  %v588_v0 = vor.u32 %v587_v44, %v584_v41  ;;  %v606_v31 = vshrl.u32 %v5294_v25, 16  ;;  %v609_v58 = vshll.u32 %v5294_v25, 16  ;;  %4548 = vmatprep.subr.bf16.mxu1 %v5306_v61  ;;  %v5347_v44 = vld [vmem:[%s5022_s18 + $0x74] sm:$0x1] }
  0x46   : > { %7143 = vst [vmem:[#allocation20_spill] sm:$0xff] %v5325_v33  ;;  %v5341_v29 = vcombine.low %v570_v14, %v580_v11  ;;  %v598_v49 = vor.u32 %v597_v19, %v593_v34  ;;  %v615_v17 = vshll.u32 %v5301_v16, 16  ;;  %v619_v54 = vshrl.u32 %v5301_v16, 16  ;;  %7145 = vst [vmem:[#allocation22_spill] sm:$0xff] %v5347_v44  ;;  %v5392_v61 = vld [vmem:[%s5022_s18 + $0x84] sm:$0xf] }
  0x47   : > { %v589_v8 = vrot.slane %v588_v0, 4  ;;  %v608_v52 = vrot.slane %v606_v31, 4  ;;  %v611_v53 = vrot.slane %v609_v58, 5  ;;  %v625_v7 = vshll.u32 %v5313_v60, 16 }
  0x48   : > { %7144 = vst [vmem:[#allocation21_spill] sm:$0xff] %v5341_v29  ;;  %4392 = vmatprep.mubr.msk.bf16.mxu0 %vm854_vm2, %v5341_v29  ;;  %v599_v56 = vrot.slane %v598_v49, 4  ;;  %v617_v41 = vrot.slane %v615_v17, 5  ;;  %v621_v14 = vrot.slane %v619_v54, 4  ;;  %v5353_v19 = vcombine.low %v5199_v63, %v5204_v15  ;;  %v5363_v54 = vld [vmem:[%s5022_s18 + $0x78] sm:$0xf] }
  0x49   : > { %v594_v11 = vsel %vm5060_vm3, %v589_v8, %v593_v34  ;;  %v612_v0 = vor.u32 %v611_v53, %v608_v52  ;;  %v627_v31 = vrot.slane %v625_v7, 5  ;;  %v630_v58 = vshrl.u32 %v5328_v57, 16 }
  0x4a   : > { %7146 = vst [vmem:[#allocation23_spill] sm:$0xff] %v5353_v19  ;;  %v604_v59 = vsel %vm5060_vm3, %v599_v56, %v603_v40  ;;  %v622_v13 = vor.u32 %v621_v14, %v617_v41  ;;  %v633_v49 = vshll.u32 %v5328_v57, 16  ;;  %v639_v17 = vshll.u32 %v5338_v36, 16  ;;  %v5374_v56 = vld [vmem:[%s5022_s18 + $0x7c] sm:$0xf] }
  0x4b   : > { %v5365_v29 = vcombine.low %v594_v11, %v604_v59  ;;  %4419 = vmatmul.mubr.msk.bf16.gmra.mxu1 %vm854_vm2, %v5325_v33  ;;  %v613_v53 = vrot.slane %v612_v0, 4  ;;  %v632_v52 = vrot.slane %v630_v58, 4  ;;  %v643_v8 = vshrl.u32 %v5338_v36, 16  ;;  %v5385_v0 = vld [vmem:[%s5022_s18 + $0x80] sm:$0x1] }
  0x4c   : > { %v623_v34 = vrot.slane %v622_v13, 4  ;;  %4422 = vmatprep.mubr.msk.bf16.mxu1 %vm854_vm2, %v5353_v19  ;;  %v635_v40 = vrot.slane %v633_v49, 5  ;;  %v641_v7 = vrot.slane %v639_v17, 5  ;;  %v649_v59 = vshll.u32 %v5347_v44, 16  ;;  %7149 = vst [vmem:[#allocation26_spill] sm:$0xff] %v5385_v0 }
  0x4d   : > { %7147 = vst [vmem:[#allocation24_spill] sm:$0xff] %v5365_v29  ;;  %4393 = vmatmul.mubr.msk.bf16.gmra.mxu0 %vm854_vm2, %v5365_v29  ;;  %v618_v14 = vsel %vm5060_vm3, %v613_v53, %v617_v41  ;;  %v645_v11 = vrot.slane %v643_v8, 4  ;;  %v5382_v13 = vcombine.low %v5214_v30, %v5223_v46  ;;  %v654_v58 = vshrl.u32 %v5363_v54, 16 }
  0x4e   : > { %v628_v49 = vsel %vm5060_vm3, %v623_v34, %v627_v31  ;;  %v636_v17 = vor.u32 %v635_v40, %v632_v52  ;;  %v651_v19 = vrot.slane %v649_v59, 5  ;;  %v657_v29 = vshll.u32 %v5363_v54, 16  ;;  %v5400_v31 = vld [vmem:[%s5022_s18 + $0x88] sm:$0xf] }
  0x4f   : > { %7148 = vst [vmem:[#allocation25_spill] sm:$0xff] %v5382_v13  ;;  %v5394_v41 = vcombine.low %v618_v14, %v628_v49  ;;  %v646_v53 = vor.u32 %v645_v11, %v641_v7  ;;  %v656_v8 = vrot.slane %v654_v58, 4  ;;  %v663_v33 = vshll.u32 %v5374_v56, 16  ;;  %v5412_v49 = vld [vmem:[%s5022_s18 + $0x8c] sm:$0x1] }
  0x50   : > { %v637_v1 = vrot.slane %v636_v17, 4  ;;  %v659_v44 = vrot.slane %v657_v29, 5  ;;  %v667_v51 = vshrl.u32 %v5374_v56, 16  ;;  %v673_v35 = vshll.u32 %v5385_v0, 16 }
  0x51   : > { %7150 = vst [vmem:[#allocation27_spill] sm:$0xff] %v5394_v41  ;;  %4396 = vmatprep.mubr.msk.bf16.mxu0 %vm854_vm2, %v5394_v41  ;;  %v647_v52 = vrot.slane %v646_v53, 4  ;;  %v665_v34 = vrot.slane %v663_v33, 5  ;;  %v5406_v40 = vcombine.low %v5236_v9, %v5247_v45  ;;  %v678_v59 = vshrl.u32 %v5392_v61, 16 }
  0x52   : > { %v642_v29 = vsel %vm5060_vm3, %v637_v1, %v641_v7  ;;  %v660_v14 = vor.u32 %v659_v44, %v656_v8  ;;  %v669_v11 = vrot.slane %v667_v51, 4  ;;  %v675_v58 = vrot.slane %v673_v35, 5 }
  0x53   : > { %7151 = vst [vmem:[#allocation28_spill] sm:$0xff] %v5406_v40  ;;  %v652_v17 = vsel %vm5060_vm3, %v647_v52, %v651_v19  ;;  %4423 = vmatmul.mubr.msk.bf16.gmra.mxu1 %vm854_vm2, %v5382_v13  ;;  %v680_v33 = vrot.slane %v678_v59, 4  ;;  %v681_v53 = vshll.u32 %v5392_v61, 16  ;;  %v687_v41 = vshll.u32 %v5400_v31, 16 }
  0x54   : > { %v5420_v0 = vcombine.low %v642_v29, %v652_v17  ;;  %v661_v42 = vrot.slane %v660_v14, 4  ;;  %v670_v1 = vor.u32 %v669_v11, %v665_v34  ;;  %4426 = vmatprep.mubr.msk.bf16.mxu1 %vm854_vm2, %v5406_v40  ;;  %v691_v35 = vshrl.u32 %v5400_v31, 16 }
  0x55   : > { %v1390_v51 = vrot.slane %v5066_v38, 5  ;;  %v683_v44 = vrot.slane %v681_v53, 5  ;;  %v689_v19 = vrot.slane %v687_v41, 5  ;;  %v697_v7 = vshll.u32 %v5412_v49, 16 }
  0x56   : > { %7152 = vst [vmem:[#allocation29_spill] sm:$0xff] %v5420_v0  ;;  %4397 = vmatmul.mubr.msk.bf16.gmra.mxu0 %vm854_vm2, %v5420_v0  ;;  %v666_v8 = vsel %vm5060_vm3, %v661_v42, %v665_v34  ;;  %v671_v52 = vrot.slane %v670_v1, 4  ;;  %v693_v59 = vrot.slane %v691_v35, 4  ;;  %v5433_v29 = vcombine.low %v5267_v20, %v5275_v39 }
  0x57   : > { %v684_v41 = vor.u32 %v683_v44, %v680_v33  ;;  %v5443_v14 = vcombine.low %v5294_v25, %v5301_v16  ;;  %v4011_v11 = vrot.slane %v5025_v3, 9  ;;  %v1380_v42 = vrot.slane %v5028_v4, 5 }
  0x58   : > { %v676_v34 = vsel %vm5060_vm3, %v671_v52, %v675_v58  ;;  %v694_v17 = vor.u32 %v693_v59, %v689_v19  ;;  %v699_v53 = vrot.slane %v697_v7, 5  ;;  %v4012_v1 = vrot.slane %v5053_v26, 9 }
  0x59   : > { %v5450_v35 = vcombine.low %v666_v8, %v676_v34  ;;  %v685_v0 = vrot.slane %v684_v41, 4  ;;  %v1381_v33 = vsel %vm5437_vm6, %v4011_v11, %v1380_v42  ;;  %v1382_v44 = vrot.slane %v1380_v42, 4 }
  0x5a   : > { %v695_v40 = vrot.slane %v694_v17, 4  ;;  %v7155_v13 = vrot.slane %v5056_v27, 5  ;;  %v7157_v7 = vrot.slane %v5031_v5, 5  ;;  %v1394_v52 = vrot.slane %v5105_v18, 5 }
  0x5b   : > { %4400 = vmatprep.mubr.msk.bf16.mxu0 %vm854_vm2, %v5450_v35  ;;  %v690_v26 = vsel %vm5060_vm3, %v685_v0, %v689_v19  ;;  %4427 = vmatmul.mubr.msk.bf16.gmra.mxu1 %vm854_vm2, %v5433_v29  ;;  %v4013_v19 = vrot.slane %v5096_v6, 9  ;;  %v1397_v11 = vrot.slane %v5112_v22, 5  ;;  %v5487_v18 = vcombine.low %v5328_v57, %v5338_v36 }
  0x5c   : > { %v1388_v3 = vsel %vm5437_vm6, %v4012_v1, %v7155_v13  ;;  %v7156_v4 = vmov %v7155_v13  ;;  %v1384_v8 = vsel %vm5437_vm6, %v1382_v44, %v7157_v7  ;;  %v700_v27 = vsel %vm5060_vm3, %v695_v40, %v699_v53  ;;  %4430 = vmatprep.mubr.msk.bf16.mxu1 %vm854_vm2, %v5443_v14 }
  0x5d   : > { %v1389_v58 = vrot.slane %v7156_v4, 4  ;;  %v4029_v13 = vcombine.low %v1381_v33, %v1384_v8  ;;  %v5478_v59 = vcombine.low %v690_v26, %v700_v27  ;;  %v1396_v41 = vrot.slane %v1394_v52, 4 }
  0x5e   : > { %v5492_v40 = vcombine.low %v5363_v54, %v5374_v56  ;;  %v1401_v6 = vrot.slane %v5153_v2, 5  ;;  %v1408_v42 = vrot.slane %v5204_v15, 5  ;;  %v4014_v17 = vrot.slane %v5146_v62, 9  ;;  %v5513_v15 = vld [vmem:[%s7034_s1 + $0x30] sm:$0xff]  }
  0x5f   : > { %v1391_v0 = vsel %vm5437_vm6, %v1389_v58, %v1390_v51  ;;  %4401 = vmatmul.mubr.msk.bf16.gmra.mxu0 %vm854_vm2, %v5478_v59  ;;  %v1395_v51 = vsel %vm5437_vm6, %v4013_v19, %v1394_v52  ;;  %v1398_v22 = vsel %vm5437_vm6, %v1396_v41, %v1397_v11  ;;  %v1404_v2 = vrot.slane %v5166_v23, 5 }
  0x60   : > { %v5480_v5 = vcombine.low %v1388_v3, %v1391_v0  ;;  %4448 = vmatprep.mubr.msk.bf16.mxu0 %vm854_vm2, %v4029_v13  ;;  %v5504_v34 = vcombine.low %v1395_v51, %v1398_v22  ;;  %v1403_v53 = vrot.slane %v1401_v6, 4  ;;  %v4015_v1 = vrot.slane %v5199_v63, 9 }
  0x61   : > { %v1410_v33 = vrot.slane %v1408_v42, 4  ;;  %v1411_v44 = vrot.slane %v5209_v24, 5  ;;  %v5519_v3 = vcombine.low %v5392_v61, %v5400_v31  ;;  %v1402_v62 = vsel %vm5437_vm6, %v4014_v17, %v1401_v6 }
  0x62   : > { %v1405_v23 = vsel %vm5437_vm6, %v1403_v53, %v1404_v2  ;;  %v5529_v63 = vcombine.low %v5038_v10, %v5042_v12  ;;  %v1415_v24 = vrot.slane %v5223_v46, 5  ;;  %v1409_v4 = vsel %vm5437_vm6, %v4015_v1, %v1408_v42  ;;  %v7158_v2 = vld [vmem:[#allocation9_spill] sm:$0xff]  ;;  %v7159_v1 = vld [vmem:[#allocation8_spill] sm:$0xff] }
  0x63   : > { %4431 = vmatmul.mubr.msk.bf16.gmra.mxu1 %vm854_vm2, %v5487_v18  ;;  %v1412_v58 = vsel %vm5437_vm6, %v1410_v33, %v1411_v44  ;;  %v1422_v26 = vrot.slane %v5247_v45, 5  ;;  %v5541_v7 = vcombine.low %v1402_v62, %v1405_v23  ;;  %v1418_v52 = vrot.slane %v5230_v47, 5 }
  0x64   : > { %4434 = vmatprep.mubr.msk.bf16.mxu1 %vm854_vm2, %v5492_v40  ;;  %v5545_v46 = vcombine.low %v1409_v4, %v1412_v58  ;;  %v1417_v8 = vrot.slane %v1415_v24, 4  ;;  %v4017_v27 = vrot.slane %v5236_v9, 9  ;;  %v1425_v13 = vrot.slane %v5252_v21, 5  ;;  %v7160_v4 = vld [vmem:[#allocation15_spill] sm:$0xff] }
  0x65   : > { %v1424_v45 = vrot.slane %v1422_v26, 4  ;;  %v5555_v0 = vcombine.low %v5077_v50, %v5081_v55  ;;  %v5565_v9 = vcombine.low %v5119_v32, %v5132_v43  ;;  %v1429_v21 = vrot.slane %v5275_v39, 5 }
  0x66   : > { %v1419_v47 = vsel %vm5437_vm6, %v1417_v8, %v1418_v52  ;;  %v1423_v19 = vsel %vm5437_vm6, %v4017_v27, %v1422_v26  ;;  %v1436_v11 = vrot.slane %v5301_v16, 5  ;;  %v4018_v39 = vrot.slane %v5267_v20, 9  ;;  %v7161_v26 = vld [vmem:[#allocation22_spill] sm:$0xff] }
  0x67   : > { %4449 = vmatmul.mubr.msk.bf16.vlgmr.msra.gmra.mxu0 %vm854_vm2, %v5480_v5  ;;  %v1426_v41 = vsel %vm5437_vm6, %v1424_v45, %v1425_v13  ;;  %v1431_v22 = vrot.slane %v1429_v21, 4  ;;  %v1432_v42 = vrot.slane %v5279_v48, 5  ;;  %v4019_v17 = vrot.slane %v5294_v25, 9  ;;  %v7162_v27 = vld [vmem:[#allocation26_spill] sm:$0xff] }
  0x68   : > { %4452 = vmatprep.mubr.msk.bf16.mxu0 %vm854_vm2, %v5504_v34  ;;  %4515 = vmatpush3.bf16.msra.mxu0 %v5127_v37  ;;  %v4016_v37 = vrot.slane %v5214_v30, 9  ;;  %v5579_v51 = vcombine.low %v1423_v19, %v1426_v41  ;;  %v1438_v53 = vrot.slane %v1436_v11, 4  ;;  %v1439_v16 = vrot.slane %v5313_v60, 5  ;;  %v7163_v41 = vld [vmem:[#allocation17_spill] sm:$0xff] }
  0x69   : > { %4582 = vmatprep.subr.bf16.mxu0 %v5513_v15  ;;  %v5589_v33 = vcombine.low %v7159_v1, %v7158_v2  ;;  %v1430_v20 = vsel %vm5437_vm6, %v4018_v39, %v1429_v21  ;;  %v1433_v48 = vsel %vm5437_vm6, %v1431_v22, %v1432_v42  ;;  %v1443_v25 = vrot.slane %v5338_v36, 5  ;;  %v5632_v21 = vld [vmem:[%s7034_s1 + $0x38] sm:$0xff]   ;;  %v7165_v42 = vld [vmem:[#allocation18_spill] sm:$0xff] }
  0x6a   : > { %v1416_v30 = vsel %vm5437_vm6, %v4016_v37, %v1415_v24  ;;  %v1437_v60 = vsel %vm5437_vm6, %v4019_v17, %v1436_v11  ;;  %v1440_v44 = vsel %vm5437_vm6, %v1438_v53, %v1439_v16  ;;  %v1450_v62 = vrot.slane %v5374_v56, 5  ;;  %v7166_v17 = vld [vmem:[#allocation2_spill] sm:$0xff] }
  0x6b   : > { %4435 = vmatmul.mubr.msk.bf16.gmra.mxu1 %vm854_vm2, %v5519_v3  ;;  %v5575_v6 = vcombine.low %v1416_v30, %v1419_v47  ;;  %v5605_v23 = vcombine.low %v1430_v20, %v1433_v48  ;;  %v5607_v24 = vcombine.low %v1437_v60, %v1440_v44  ;;  %v4020_v36 = vrot.slane %v5328_v57, 9 }
  0x6c   : > { %4438 = vmatprep.mubr.msk.bf16.mxu1 %vm854_vm2, %v5529_v63  ;;  %v1445_v58 = vrot.slane %v1443_v25, 4  ;;  %v1446_v37 = vrot.slane %v7161_v26, 5  ;;  %v4021_v8 = vrot.slane %v5363_v54, 9  ;;  %v1452_v52 = vrot.slane %v1450_v62, 4  ;;  %v7169_v26 = vld [vmem:[#allocation3_spill] sm:$0xff] }
  0x6d   : > { %v1453_v56 = vrot.slane %v7162_v27, 5  ;;  %v1444_v45 = vsel %vm5437_vm6, %v4020_v36, %v1443_v25  ;;  %v1457_v13 = vrot.slane %v5400_v31, 5  ;;  %v1464_v47 = vrot.slane %v5042_v12, 5  ;;  %v7164_v31 = vld [vmem:[#allocation20_spill] sm:$0xff]  ;;  %v7168_v36 = vld [vmem:[#allocation25_spill] sm:$0xff]  ;;  %v7170_v27 = vld [vmem:[#allocation6_spill] sm:$0xff] }
  0x6e   : > { %v1447_v57 = vsel %vm5437_vm6, %v1445_v58, %v1446_v37  ;;  %v1451_v54 = vsel %vm5437_vm6, %v4021_v8, %v1450_v62  ;;  %v4022_v39 = vrot.slane %v5392_v61, 9  ;;  %v1460_v12 = vrot.slane %v5412_v49, 5  ;;  %v7167_v62 = vld [vmem:[#allocation23_spill] sm:$0xff] }
  0x6f   : > { %4453 = vmatmul.mubr.msk.bf16.gmra.mxu0 %vm854_vm2, %v5541_v7  ;;  %v1454_v30 = vsel %vm5437_vm6, %v1452_v52, %v1453_v56  ;;  %v5634_v19 = vcombine.low %v1444_v45, %v1447_v57  ;;  %v1459_v22 = vrot.slane %v1457_v13, 4  ;;  %v1467_v53 = vrot.slane %v7166_v17, 5 }
  0x70   : > { %4456 = vmatprep.mubr.msk.bf16.mxu0 %vm854_vm2, %v5545_v46  ;;  %v5638_v11 = vcombine.low %v1451_v54, %v1454_v30  ;;  %v4023_v16 = vrot.slane %v5038_v10, 9  ;;  %v1466_v20 = vrot.slane %v1464_v47, 4  ;;  %v1458_v61 = vsel %vm5437_vm6, %v4022_v39, %v1457_v13  ;;  %v7171_v54 = vld [vmem:[#allocation28_spill] sm:$0xff] }
  0x71   : > { %v1461_v49 = vsel %vm5437_vm6, %v1459_v22, %v1460_v12  ;;  %v1471_v48 = vrot.slane %v5081_v55, 5  ;;  %v1478_v60 = vrot.slane %v5132_v43, 5  ;;  %v4024_v55 = vrot.slane %v5077_v50, 9 }
  0x72   : > { %v1465_v10 = vsel %vm5437_vm6, %v4023_v16, %v1464_v47  ;;  %v1468_v25 = vsel %vm5437_vm6, %v1466_v20, %v1467_v53  ;;  %v5662_v44 = vcombine.low %v1458_v61, %v1461_v49  ;;  %v1474_v37 = vrot.slane %v7169_v26, 5  ;;  %v4899_v53 = vld [vmem:[%s7034_s1 + $0x40] sm:$0xff]   ;;  %v7175_v20 = vld [vmem:[#allocation13_spill] sm:$0xff]  ;;  %v7176_v61 = vld [vmem:[#allocation16_spill] sm:$0xff] }
  0x73   : > { %4439 = vmatmul.mubr.msk.bf16.gmra.mxu1 %vm854_vm2, %v5555_v0  ;;  %v1473_v58 = vrot.slane %v1471_v48, 4  ;;  %v4025_v8 = vrot.slane %v5119_v32, 9  ;;  %v1480_v52 = vrot.slane %v1478_v60, 4  ;;  %v1481_v43 = vrot.slane %v7170_v27, 5  ;;  %v7174_v16 = vld [vmem:[#allocation10_spill] sm:$0xff]  ;;  %v7177_v49 = vld [vmem:[#allocation19_spill] sm:$0xff] }
  0x74   : > { %4442 = vmatprep.mubr.msk.bf16.mxu1 %vm854_vm2, %v5565_v9  ;;  %v1472_v56 = vsel %vm5437_vm6, %v4024_v55, %v1471_v48  ;;  %v1485_v45 = vrot.slane %v7158_v2, 5  ;;  %v4026_v47 = vrot.slane %v7159_v1, 9  ;;  %v7172_v2 = vld [vmem:[#allocation11_spill] sm:$0xff]  ;;  %v7173_v1 = vld [vmem:[#allocation5_spill] sm:$0xff]  ;;  %v5743_v48 = vld [vmem:[%s5022_s18 + $0xc4] sm:$0xf] }
  0x75   : > { %v1475_v50 = vsel %vm5437_vm6, %v1473_v58, %v1474_v37  ;;  %v1479_v32 = vsel %vm5437_vm6, %v4025_v8, %v1478_v60  ;;  %v1482_v57 = vsel %vm5437_vm6, %v1480_v52, %v1481_v43  ;;  %v1488_v22 = vrot.slane %v7172_v2, 5  ;;  %v7179_v60 = vld [vmem:[#allocation24_spill] sm:$0xff]  ;;  %v7180_v55 = vld [vmem:[#allocation27_spill] sm:$0xff]  ;;  %v7181_v58 = vld [vmem:[#allocation29_spill] sm:$0xff] }
  0x76   : > { %v5687_v13 = vcombine.low %v1472_v56, %v1475_v50  ;;  %v5691_v30 = vcombine.low %v1479_v32, %v1482_v57  ;;  %v1487_v39 = vrot.slane %v1485_v45, 4  ;;  %v1486_v12 = vsel %vm5437_vm6, %v4026_v47, %v1485_v45  ;;  %v404_v56 = vld [vmem:[%s5022_s18 + $0xc8] sm:$0x1]  ;;  %v7182_v50 = vld [vmem:[#allocation4_spill] sm:$0xff] }
  0x77   : > { %4457 = vmatmul.mubr.msk.bf16.gmra.mxu0 %vm854_vm2, %v5575_v6  ;;  %v2012_v37 = vshrl.u32 %v5743_v48, 16  ;;  %v2008_v8 = vshll.u32 %v5743_v48, 16  ;;  %v7183_v45 = vld [vmem:[#allocation7_spill] sm:$0xff]  ;;  %v2018_v47 = vshll.u32 %v404_v56, 16 }
  0x78   : > { %4460 = vmatprep.mubr.msk.bf16.mxu0 %vm854_vm2, %v5579_v51 }
  0x79   : > { %v2010_v27 = vrot.slane %v2008_v8, 5  ;;  %v2014_v43 = vrot.slane %v2012_v37, 4 }
  0x7b   : > { %4443 = vmatmul.mubr.msk.bf16.gmra.mxu1 %vm854_vm2, %v5589_v33  ;;  %v2015_v57 = vor.u32 %v2014_v43, %v2010_v27 }
  0x7c   : > { %4482 = vmatprep.mubr.msk.bf16.mxu1 %vm854_vm2, %v7160_v4  ;;  %v5666_v4 = vcombine.low %v1465_v10, %v1468_v25  ;;  %v7178_v10 = vld [vmem:[#allocation21_spill] sm:$0xff] }
  0x7d   : > { %v2016_v2 = vrot.slane %v2015_v57, 4 }
  0x7f   : > { %4461 = vmatmul.mubr.msk.bf16.gmra.mxu0 %vm854_vm2, %v5605_v23 }
  0x80   : > { %4464 = vmatprep.mubr.msk.bf16.mxu0 %vm854_vm2, %v5607_v24 }
  0x83   : > { %4483 = vmatmul.mubr.msk.bf16.vlgmr.msra.gmra.mxu1 %vm854_vm2, %v7163_v41 }
  0x84   : > { %4486 = vmatprep.mubr.msk.bf16.mxu1 %vm854_vm2, %v7164_v31  ;;  %4549 = vmatpush3.bf16.msra.mxu1 %v7165_v42  ;;  %v1489_v42 = vsel %vm5437_vm6, %v1487_v39, %v1488_v22  ;;  %v2020_v22 = vrot.slane %v2018_v47, 5 }
  0x85   : > { %4616 = vmatprep.subr.bf16.mxu1 %v5632_v21  ;;  %v5705_v17 = vcombine.low %v1486_v12, %v1489_v42  ;;  %v7184_v12 = vld [vmem:[#allocation12_spill] sm:$0xff]  ;;  %v7185_v42 = vld [vmem:[#allocation14_spill] sm:$0xff] }
  0x87   : > { %4465 = vmatmul.mubr.msk.bf16.gmra.mxu0 %vm854_vm2, %v5634_v19 }
  0x88   : > { %4468 = vmatprep.mubr.msk.bf16.mxu0 %vm854_vm2, %v5638_v11 }
  0x8b   : > { %4487 = vmatmul.mubr.msk.bf16.gmra.mxu1 %vm854_vm2, %v7167_v62 }
  0x8c   : > { %4490 = vmatprep.mubr.msk.bf16.mxu1 %vm854_vm2, %v7168_v36 }
  0x8f   : > { %4469 = vmatmul.mubr.msk.bf16.gmra.mxu0 %vm854_vm2, %v5662_v44 }
  0x90   : > { %4472 = vmatprep.mubr.msk.bf16.mxu0 %vm854_vm2, %v5666_v4 }
  0x93   : > { %4491 = vmatmul.mubr.msk.bf16.gmra.mxu1 %vm854_vm2, %v7171_v54 }
  0x94   : > { %4494 = vmatprep.mubr.msk.bf16.mxu1 %vm854_vm2, %v5433_v29 }
  0x97   : > { %4473 = vmatmul.mubr.msk.bf16.gmra.mxu0 %vm854_vm2, %v5687_v13 }
  0x98   : > { %4476 = vmatprep.mubr.msk.bf16.mxu0 %vm854_vm2, %v5691_v30 }
  0x9b   : > { %4495 = vmatmul.mubr.msk.bf16.gmra.mxu1 %vm854_vm2, %v5443_v14 }
  0x9c   : > { %4498 = vmatprep.mubr.msk.bf16.mxu1 %vm854_vm2, %v5487_v18 }
  0x9f   : > { %4477 = vmatmul.mubr.msk.bf16.gmra.mxu0 %vm854_vm2, %v5705_v17 }
  0xa0   : > { %4516 = vmatprep.mubr.msk.bf16.mxu0 %vm854_vm2, %v7173_v1 }
  0xa3   : > { %4499 = vmatmul.mubr.msk.bf16.gmra.mxu1 %vm854_vm2, %v5492_v40 }
  0xa4   : > { %4502 = vmatprep.mubr.msk.bf16.mxu1 %vm854_vm2, %v5519_v3 }
  0xa7   : > { %4517 = vmatmul.mubr.msk.bf16.vlgmr.msra.gmra.mxu0 %vm854_vm2, %v7174_v16 }
  0xa8   : > { %4520 = vmatprep.mubr.msk.bf16.mxu0 %vm854_vm2, %v7175_v20  ;;  %4583 = vmatpush3.bf16.msra.mxu0 %v5513_v15  ;;  %v5740_v15 = vld [vmem:[%s5022_s18 + $0xc0] sm:$0xf] }
  0xa9   : > { %4650 = vmatprep.subr.bf16.mxu0 %v4899_v53  ;;  %v5749_v25 = vcombine.low %v5740_v15, %v5743_v48  ;;  %v2002_v26 = vshll.u32 %v5740_v15, 16 }
  0xab   : > { %4503 = vmatmul.mubr.msk.bf16.gmra.mxu1 %vm854_vm2, %v5529_v63  ;;  %v2004_v52 = vrot.slane %v2002_v26, 5 }
  0xac   : > { %4506 = vmatprep.mubr.msk.bf16.mxu1 %vm854_vm2, %v5555_v0 }
  0xaf   : > { %4521 = vmatmul.mubr.msk.bf16.gmra.mxu0 %vm854_vm2, %v7176_v61 }
  0xb0   : > { %4524 = vmatprep.mubr.msk.bf16.mxu0 %vm854_vm2, %v7177_v49 }
  0xb3   : > { %4507 = vmatmul.mubr.msk.bf16.gmra.mxu1 %vm854_vm2, %v5565_v9 }
  0xb4   : > { %4510 = vmatprep.mubr.msk.bf16.mxu1 %vm854_vm2, %v5589_v33 }
  0xb7   : > { %4525 = vmatmul.mubr.msk.bf16.gmra.mxu0 %vm854_vm2, %v7178_v10 }
  0xb8   : > { %4528 = vmatprep.mubr.msk.bf16.mxu0 %vm854_vm2, %v7179_v60 }
  0xbb   : > { %4511 = vmatmul.mubr.msk.bf16.gmra.mxu1 %vm854_vm2, %v5749_v25 }
  0xbc   : > { %4550 = vmatprep.mubr.msk.bf16.mxu1 %vm854_vm2, %v5480_v5  ;;  %v1999_v5 = vshrl.u32 %v5740_v15, 16 }
  0xbf   : > { %4529 = vmatmul.mubr.msk.bf16.gmra.mxu0 %vm854_vm2, %v7180_v55 }
  0xc0   : > { %4532 = vmatprep.mubr.msk.bf16.mxu0 %vm854_vm2, %v7181_v58 }
  0xc3   : > { %4551 = vmatmul.mubr.msk.bf16.vlgmr.msra.gmra.mxu1 %vm854_vm2, %v5504_v34 }
  0xc4   : > { %4554 = vmatprep.mubr.msk.bf16.mxu1 %vm854_vm2, %v5541_v7  ;;  %4617 = vmatpush3.bf16.msra.mxu1 %v5632_v21  ;;  %v2001_v21 = vrot.slane %v1999_v5, 4  ;;  %v2021_v5 = vsel %vm5060_vm3, %v2016_v2, %v2020_v22 }
  0xc6   : > { %v2005_v32 = vor.u32 %v2004_v52, %v2001_v21  ;;  %v2233_v21 = vrot.slane %v5743_v48, 5 }
  0xc7   : > { %4533 = vmatmul.mubr.msk.bf16.gmra.mxu0 %vm854_vm2, %v5450_v35 }
  0xc8   : > { %4536 = vmatprep.mubr.msk.bf16.mxu0 %vm854_vm2, %v5478_v59  ;;  %v2006_v39 = vrot.slane %v2005_v32, 4 }
  0xca   : > { %v2011_v1 = vsel %vm5060_vm3, %v2006_v39, %v2010_v27  ;;  %v2236_v27 = vrot.slane %v404_v56, 5 }
  0xcb   : > { %4555 = vmatmul.mubr.msk.bf16.gmra.mxu1 %vm854_vm2, %v5545_v46  ;;  %v5795_v26 = vcombine.low %v2011_v1, %v2021_v5 }
  0xcc   : > { %4558 = vmatprep.mubr.msk.bf16.mxu1 %vm854_vm2, %v5575_v6 }
  0xcf   : > { %4537 = vmatmul.mubr.msk.bf16.gmra.mxu0 %vm854_vm2, %v7182_v50 }
  0xd0   : > { %4540 = vmatprep.mubr.msk.bf16.mxu0 %vm854_vm2, %v7183_v45 }
  0xd3   : > { %4559 = vmatmul.mubr.msk.bf16.gmra.mxu1 %vm854_vm2, %v5579_v51 }
  0xd4   : > { %4562 = vmatprep.mubr.msk.bf16.mxu1 %vm854_vm2, %v5605_v23 }
  0xd7   : > { %4541 = vmatmul.mubr.msk.bf16.gmra.mxu0 %vm854_vm2, %v7184_v12 }
  0xd8   : > { %4544 = vmatprep.mubr.msk.bf16.mxu0 %vm854_vm2, %v7185_v42 }
  0xdb   : > { %4563 = vmatmul.mubr.msk.bf16.gmra.mxu1 %vm854_vm2, %v5607_v24 }
  0xdc   : > { %4566 = vmatprep.mubr.msk.bf16.mxu1 %vm854_vm2, %v5634_v19 }
  0xdf   : > { %4545 = vmatmul.mubr.msk.bf16.gmra.mxu0 %vm854_vm2, %v5795_v26 }
  0xe0   : > { %4584 = vmatprep.mubr.msk.bf16.mxu0 %vm854_vm2, %v7163_v41 }
  0xe3   : > { %4567 = vmatmul.mubr.msk.bf16.gmra.mxu1 %vm854_vm2, %v5638_v11 }
  0xe4   : > { %4570 = vmatprep.mubr.msk.bf16.mxu1 %vm854_vm2, %v5662_v44 }
  0xe6   : > { %v4382_v37 = vpop.f32.mrf.mxu0 }
  0xe7   : > { %4585 = vmatmul.mubr.msk.bf16.vlgmr.msra.gmra.mxu0 %vm854_vm2, %v7164_v31 }
  0xe8   : > { %4588 = vmatprep.mubr.msk.bf16.mxu0 %vm854_vm2, %v7167_v62  ;;  %4651 = vmatpush3.bf16.msra.mxu0 %v4899_v53  ;;  %v937_v41 = vpop.f32.mrf.mxu0  ;;  %v4102_v62 = vrot.slane %v5740_v15, 9  ;;  %v2235_v53 = vrot.slane %v2233_v21, 4 }
  0xea   : > { %v4383_v52 = vpop.f32.mrf.mxu0  ;;  %v2237_v48 = vsel %vm5437_vm6, %v2235_v53, %v2236_v27 }
  0xeb   : > { %4571 = vmatmul.mubr.msk.bf16.gmra.mxu1 %vm854_vm2, %v5666_v4  ;;  %v5815_v8 = vpop.f32.mrf.mxu1 }
  0xec   : > { %4574 = vmatprep.mubr.msk.bf16.mxu1 %vm854_vm2, %v5687_v13  ;;  %v940_v32 = vpop.f32.mrf.mxu0 }
  0xed   : > { %v5822_v31 = vpop.f32.mrf.mxu1 }
  0xef   : > { %4589 = vmatmul.mubr.msk.bf16.gmra.mxu0 %vm854_vm2, %v7168_v36  ;;  %v5829_v43 = vpop.f32.mrf.mxu1  ;;  %v2234_v36 = vsel %vm5437_vm6, %v4102_v62, %v2233_v21 }
  0xf0   : > { %4592 = vmatprep.mubr.msk.bf16.mxu0 %vm854_vm2, %v7171_v54  ;;  %7186 = vst [vmem:[#allocation9_spill] sm:$0xff] %v5829_v43  ;;  %v5841_v56 = vcombine.low %v2234_v36, %v2237_v48 }
  0xf1   : > { %v5839_v54 = vpop.f32.mrf.mxu1 }
  0xf2   : > { %7187 = vst [vmem:[#allocation8_spill] sm:$0xff] %v5839_v54 }
  0xf3   : > { %4575 = vmatmul.mubr.msk.bf16.gmra.mxu1 %vm854_vm2, %v5691_v30 }
  0xf4   : > { %4578 = vmatprep.mubr.msk.bf16.mxu1 %vm854_vm2, %v5705_v17 }
  0xf7   : > { %4593 = vmatmul.mubr.msk.bf16.gmra.mxu0 %vm854_vm2, %v5433_v29  ;;  %v4386_v15 = vpop.f32.mrf.mxu0 }
  0xf8   : > { %4596 = vmatprep.mubr.msk.bf16.mxu0 %vm854_vm2, %v5443_v14 }
  0xf9   : > { %v953_v57 = vpop.f32.mrf.mxu0 }
  0xfb   : > { %v5845_v47 = vpop.f32.mrf.mxu1  ;;  %4579 = vmatmul.mubr.msk.bf16.gmra.mxu1 %vm854_vm2, %v5841_v56  ;;  %v4387_v29 = vpop.f32.mrf.mxu0 }
  0xfc   : > { %4618 = vmatprep.mubr.msk.bf16.mxu1 %vm854_vm2, %v7174_v16 }
  0xfd   : > { %v5851_v39 = vpop.f32.mrf.mxu1  ;;  %v956_v14 = vpop.f32.mrf.mxu0 }
  0xff   : > { %4597 = vmatmul.mubr.msk.bf16.gmra.mxu0 %vm854_vm2, %v5487_v18  ;;  %v5855_v2 = vpop.f32.mrf.mxu1 }
 0x100   : > { %4600 = vmatprep.mubr.msk.bf16.mxu0 %vm854_vm2, %v5492_v40 }
 0x101   : > { %v5859_v22 = vpop.f32.mrf.mxu1 }
 0x102   : > { %7188 = vst [vmem:[#allocation15_spill] sm:$0xff] %v5859_v22 }
 0x103   : > { %v4416_v1 = vpop.f32.mrf.mxu1  ;;  %4619 = vmatmul.mubr.msk.bf16.vlgmr.msra.gmra.mxu1 %vm854_vm2, %v7175_v20 }
 0x104   : > { %v5863_v5 = vadd.f32 %v4416_v1, %v4382_v37  ;;  %4622 = vmatprep.mubr.msk.bf16.mxu1 %vm854_vm2, %v7176_v61 }
 0x105   : > { %v4390_v16 = vpop.f32.mrf.mxu0  ;;  %v1232_v21 = vpop.f32.mrf.mxu1 }
 0x106   : > { %v5867_v18 = vadd.f32 %v1232_v21, %v937_v41 }
 0x107   : > { %4601 = vmatmul.mubr.msk.bf16.gmra.mxu0 %vm854_vm2, %v5519_v3  ;;  %v969_v40 = vpop.f32.mrf.mxu0  ;;  %v4417_v62 = vpop.f32.mrf.mxu1 }
 0x108   : > { %v5871_v53 = vadd.f32 %v4417_v62, %v4383_v52  ;;  %4604 = vmatprep.mubr.msk.bf16.mxu0 %vm854_vm2, %v5529_v63 }
 0x109   : > { %v4391_v20 = vpop.f32.mrf.mxu0  ;;  %v1235_v37 = vpop.f32.mrf.mxu1 }
 0x10a   : > { %v5875_v27 = vadd.f32 %v1235_v37, %v940_v32 }
 0x10b   : > { %v972_v36 = vpop.f32.mrf.mxu0  ;;  %v4420_v61 = vpop.f32.mrf.mxu1  ;;  %4623 = vmatmul.mubr.msk.bf16.gmra.mxu1 %vm854_vm2, %v7177_v49 }
 0x10c   : > { %v5879_v41 = vadd.f32 %v4420_v61, %v4386_v15  ;;  %4626 = vmatprep.mubr.msk.bf16.mxu1 %vm854_vm2, %v7178_v10 }
 0x10d   : > { %v4394_v3 = vpop.f32.mrf.mxu0  ;;  %v1248_v52 = vpop.f32.mrf.mxu1 }
 0x10e   : > { %v5883_v48 = vadd.f32 %v1248_v52, %v953_v57 }
 0x10f   : > { %4605 = vmatmul.mubr.msk.bf16.gmra.mxu0 %vm854_vm2, %v5555_v0  ;;  %v985_v63 = vpop.f32.mrf.mxu0  ;;  %v4421_v32 = vpop.f32.mrf.mxu1 }
 0x110   : > { %v5887_v1 = vadd.f32 %v4421_v32, %v4387_v29  ;;  %4608 = vmatprep.mubr.msk.bf16.mxu0 %vm854_vm2, %v5565_v9 }
 0x111   : > { %v4395_v49 = vpop.f32.mrf.mxu0  ;;  %v1251_v15 = vpop.f32.mrf.mxu1 }
 0x112   : > { %v5891_v21 = vadd.f32 %v1251_v15, %v956_v14 }
 0x113   : > { %v988_v10 = vpop.f32.mrf.mxu0  ;;  %v4424_v62 = vpop.f32.mrf.mxu1  ;;  %4627 = vmatmul.mubr.msk.bf16.gmra.mxu1 %vm854_vm2, %v7179_v60  ;;  %v5908_v60 = vld [vmem:[%s5022_s18 + $0xcc] sm:$0xf] }
 0x114   : > { %v5895_v57 = vadd.f32 %v4424_v62, %v4390_v16  ;;  %4630 = vmatprep.mubr.msk.bf16.mxu1 %vm854_vm2, %v7180_v55  ;;  %v5911_v16 = vld [vmem:[%s5022_s18 + $0xd0] sm:$0xf] }
 0x115   : > { %v1264_v0 = vpop.f32.mrf.mxu1  ;;  %v4125_v15 = vcombine.low %v5908_v60, %v5911_v16 }
 0x116   : > { %v4398_v29 = vpop.f32.mrf.mxu0  ;;  %v5899_v37 = vadd.f32 %v1264_v0, %v969_v40 }
 0x117   : > { %4609 = vmatmul.mubr.msk.bf16.gmra.mxu0 %vm854_vm2, %v5589_v33  ;;  %v4425_v9 = vpop.f32.mrf.mxu1 }
 0x118   : > { %v1001_v14 = vpop.f32.mrf.mxu0  ;;  %v5903_v61 = vadd.f32 %v4425_v9, %v4391_v20  ;;  %4612 = vmatprep.mubr.msk.bf16.mxu0 %vm854_vm2, %v5749_v25 }
 0x119   : > { %v1267_v52 = vpop.f32.mrf.mxu1 }
 0x11a   : > { %v4399_v55 = vpop.f32.mrf.mxu0  ;;  %v5913_v32 = vadd.f32 %v1267_v52, %v972_v36 }
 0x11b   : > { %v4428_v40 = vpop.f32.mrf.mxu1  ;;  %4631 = vmatmul.mubr.msk.bf16.gmra.mxu1 %vm854_vm2, %v7181_v58 }
 0x11c   : > { %v5919_v33 = vpop.f32.mrf.mxu0  ;;  %v5921_v20 = vadd.f32 %v4428_v40, %v4394_v3  ;;  %4634 = vmatprep.mubr.msk.bf16.mxu1 %vm854_vm2, %v5450_v35  ;;  %v2657_v3 = vshrl.u32 %v5908_v60, 16  ;;  %v2660_v35 = vshll.u32 %v5908_v60, 16 }
 0x11d   : > { %7189 = vst [vmem:[#allocation22_spill] sm:$0xff] %v5919_v33  ;;  %v1280_v25 = vpop.f32.mrf.mxu1 }
 0x11e   : > { %v5925_v62 = vadd.f32 %v1280_v25, %v985_v63  ;;  %v2659_v54 = vrot.slane %v2657_v3, 4  ;;  %v2662_v33 = vrot.slane %v2660_v35, 5 }
 0x11f   : > { %v4402_v0 = vpop.f32.mrf.mxu0  ;;  %4613 = vmatmul.mubr.msk.bf16.gmra.mxu0 %vm854_vm2, %v4125_v15  ;;  %v4429_v36 = vpop.f32.mrf.mxu1  ;;  %v2670_v15 = vshrl.u32 %v5911_v16, 16 }
 0x120   : > { %v5928_v9 = vadd.f32 %v4429_v36, %v4395_v49  ;;  %4652 = vmatprep.mubr.msk.bf16.mxu0 %vm854_vm2, %v5504_v34  ;;  %v2666_v34 = vshll.u32 %v5911_v16, 16 }
 0x121   : > { %v1017_v58 = vpop.f32.mrf.mxu0  ;;  %v1283_v52 = vpop.f32.mrf.mxu1 }
 0x122   : > { %v5932_v22 = vadd.f32 %v1283_v52, %v988_v10 }
 0x123   : > { %v4403_v40 = vpop.f32.mrf.mxu0  ;;  %v4432_v63 = vpop.f32.mrf.mxu1  ;;  %4635 = vmatmul.mubr.msk.bf16.gmra.mxu1 %vm854_vm2, %v5478_v59 }
 0x124   : > { %v5939_v49 = vadd.f32 %v4432_v63, %v4398_v29  ;;  %4638 = vmatprep.mubr.msk.bf16.mxu1 %vm854_vm2, %v7182_v50  ;;  %v2668_v50 = vrot.slane %v2666_v34, 5 }
 0x125   : > { %v5944_v10 = vpop.f32.mrf.mxu0  ;;  %v1296_v25 = vpop.f32.mrf.mxu1 }
 0x126   : > { %7190 = vst [vmem:[#allocation26_spill] sm:$0xff] %v5944_v10  ;;  %v5946_v36 = vadd.f32 %v1296_v25, %v1001_v14  ;;  %v2672_v10 = vrot.slane %v2670_v15, 4  ;;  %v5960_v25 = vld [vmem:[%s5022_s18 + $0xd4] sm:$0x1] }
 0x127   : > { %v4450_v52 = vpop.f32.mrf.mxu0  ;;  %4653 = vmatmul.mubr.msk.bf16.vlgmr.msra.gmra.mxu0 %vm854_vm2, %v5541_v7  ;;  %v4433_v59 = vpop.f32.mrf.mxu1  ;;  %v2676_v34 = vshll.u32 %v5960_v25, 16 }
 0x128   : > { %v5951_v29 = vadd.f32 %v4450_v52, %v5863_v5  ;;  %v5953_v63 = vadd.f32 %v4433_v59, %v4399_v55  ;;  %4656 = vmatprep.mubr.msk.bf16.mxu0 %vm854_vm2, %v5545_v46  ;;  %v2663_v5 = vor.u32 %v2662_v33, %v2659_v54  ;;  %v2673_v15 = vor.u32 %v2672_v10, %v2668_v50 }
 0x129   : > { %v1629_v43 = vpop.f32.mrf.mxu0  ;;  %v5957_v14 = vpop.f32.mrf.mxu1  ;;  %v2678_v10 = vrot.slane %v2676_v34, 5 }
 0x12a   : > { %v5963_v7 = vadd.f32 %v1629_v43, %v5867_v18 }
 0x12b   : > { %v4451_v3 = vpop.f32.mrf.mxu0  ;;  %v4436_v35 = vpop.f32.mrf.mxu1  ;;  %4639 = vmatmul.mubr.msk.bf16.gmra.mxu1 %vm854_vm2, %v7183_v45 }
 0x12c   : > { %v5968_v55 = vadd.f32 %v4451_v3, %v5871_v53  ;;  %v5970_v46 = vadd.f32 %v4436_v35, %v4402_v0  ;;  %4642 = vmatprep.mubr.msk.bf16.mxu1 %vm854_vm2, %v7184_v12  ;;  %v2664_v53 = vrot.slane %v2663_v5, 4  ;;  %v2674_v0 = vrot.slane %v2673_v15, 4 }
 0x12d   : > { %v1632_v52 = vpop.f32.mrf.mxu0  ;;  %v1312_v43 = vpop.f32.mrf.mxu1 }
 0x12e   : > { %v5976_v18 = vadd.f32 %v1632_v52, %v5875_v27  ;;  %v5978_v59 = vadd.f32 %v1312_v43, %v1017_v58 }
 0x12f   : > { %v4454_v45 = vpop.f32.mrf.mxu0  ;;  %4657 = vmatmul.mubr.msk.bf16.gmra.mxu0 %vm854_vm2, %v5575_v6  ;;  %v4437_v54 = vpop.f32.mrf.mxu1 }
 0x130   : > { %v5983_v33 = vadd.f32 %v4454_v45, %v5879_v41  ;;  %v5985_v12 = vadd.f32 %v4437_v54, %v4403_v40  ;;  %4660 = vmatprep.mubr.msk.bf16.mxu0 %vm854_vm2, %v5579_v51  ;;  %v2669_v51 = vsel %vm5060_vm3, %v2664_v53, %v2668_v50  ;;  %v2679_v41 = vsel %vm5060_vm3, %v2674_v0, %v2678_v10 }
 0x131   : > { %v1645_v27 = vpop.f32.mrf.mxu0  ;;  %v5989_v3 = vpop.f32.mrf.mxu1 }
 0x132   : > { %v1760_v58 = vadd.f32 %v1645_v27, %v5883_v48 }
 0x133   : > { %v4455_v35 = vpop.f32.mrf.mxu0  ;;  %v5992_v52 = vpop.f32.mrf.mxu1  ;;  %4643 = vmatmul.mubr.msk.bf16.gmra.mxu1 %vm854_vm2, %v7185_v42 }
 0x134   : > { %v1763_v6 = vadd.f32 %v4455_v35, %v5887_v1  ;;  %4646 = vmatprep.mubr.msk.bf16.mxu1 %vm854_vm2, %v5795_v26  ;;  %v4145_v1 = vcombine.low %v2669_v51, %v2679_v41 }
 0x135   : > { %v1648_v40 = vpop.f32.mrf.mxu0  ;;  %v6003_v5 = vpop.f32.mrf.mxu1 }
 0x136   : > { %v6006_v48 = vadd.f32 %v1648_v40, %v5891_v21 }
 0x137   : > { %v4458_v15 = vpop.f32.mrf.mxu0  ;;  %4661 = vmatmul.mubr.msk.bf16.gmra.mxu0 %vm854_vm2, %v5605_v23  ;;  %v6010_v42 = vpop.f32.mrf.mxu1 }
 0x138   : > { %v1766_v26 = vadd.f32 %v4458_v15, %v5895_v57  ;;  %4664 = vmatprep.mubr.msk.bf16.mxu0 %vm854_vm2, %v5607_v24 }
 0x139   : > { %v1661_v28 = vpop.f32.mrf.mxu0  ;;  %v6015_v50 = vpop.f32.mrf.mxu1 }
 0x13a   : > { %v6018_v34 = vadd.f32 %v1661_v28, %v5899_v37 }
 0x13b   : > { %v4459_v21 = vpop.f32.mrf.mxu0  ;;  %v4444_v43 = vpop.f32.mrf.mxu1  ;;  %4647 = vmatmul.mubr.msk.bf16.gmra.mxu1 %vm854_vm2, %v4145_v1 }
 0x13c   : > { %v6022_v23 = vadd.f32 %v4459_v21, %v5903_v61  ;;  %v6025_v45 = vadd.f32 %v4444_v43, %v5845_v47 }
 0x13d   : > { %v1664_v57 = vpop.f32.mrf.mxu0  ;;  %v1344_v54 = vpop.f32.mrf.mxu1 }
 0x13e   : > { %v6028_v24 = vadd.f32 %v1664_v57, %v5913_v32  ;;  %v6031_v53 = vadd.f32 %v1344_v54, %v5851_v39 }
 0x13f   : > { %v4462_v37 = vpop.f32.mrf.mxu0  ;;  %4665 = vmatmul.mubr.msk.bf16.gmra.mxu0 %vm854_vm2, %v5634_v19  ;;  %v4445_v0 = vpop.f32.mrf.mxu1 }
 0x140   : > { %v6036_v10 = vadd.f32 %v4462_v37, %v5921_v20  ;;  %v6039_v61 = vadd.f32 %v4445_v0, %v5855_v2  ;;  %4668 = vmatprep.mubr.msk.bf16.mxu0 %vm854_vm2, %v5638_v11 }
 0x141   : > { %v1677_v47 = vpop.f32.mrf.mxu0  ;;  %v6043_v32 = vpop.f32.mrf.mxu1 }
 0x142   : > { %v6046_v39 = vadd.f32 %v1677_v47, %v5925_v62 }
 0x143   : > { %v4463_v27 = vpop.f32.mrf.mxu0  ;;  %v4484_v35 = vpop.f32.mrf.mxu1 }
 0x144   : > { %v6049_v19 = vadd.f32 %v4463_v27, %v5928_v9  ;;  %v6052_v20 = vadd.f32 %v4484_v35, %v5951_v29 }
 0x145   : > { %v1680_v51 = vpop.f32.mrf.mxu0  ;;  %v1839_v2 = vpop.f32.mrf.mxu1 }
 0x146   : > { %v6055_v41 = vadd.f32 %v1680_v51, %v5932_v22  ;;  %v6058_v11 = vadd.f32 %v1839_v2, %v5963_v7  ;;  %v1337_v51 = vadd.f32 %v5992_v52, %v5815_v8 }
 0x147   : > { %v4466_v40 = vpop.f32.mrf.mxu0  ;;  %4669 = vmatmul.mubr.msk.bf16.gmra.mxu0 %vm854_vm2, %v5662_v44  ;;  %v4485_v62 = vpop.f32.mrf.mxu1 }
 0x148   : > { %v6063_v15 = vadd.f32 %v4466_v40, %v5939_v49  ;;  %v6066_v9 = vadd.f32 %v4485_v62, %v5968_v55  ;;  %4672 = vmatprep.mubr.msk.bf16.mxu0 %vm854_vm2, %v5666_v4 }
 0x149   : > { %v1693_v29 = vpop.f32.mrf.mxu0  ;;  %v6070_v22 = vpop.f32.mrf.mxu1 }
 0x14a   : > { %v6073_v7 = vadd.f32 %v1693_v29, %v5946_v36 }
 0x14b   : > { %v4467_v1 = vpop.f32.mrf.mxu0  ;;  %v4488_v28 = vpop.f32.mrf.mxu1 }
 0x14c   : > { %v6076_v44 = vadd.f32 %v4467_v1, %v5953_v63  ;;  %v6079_v49 = vadd.f32 %v4488_v28, %v5983_v33  ;;  %v2891_v63 = vrot.slane %v5911_v16, 5 }
 0x14d   : > { %v6081_v21 = vpop.f32.mrf.mxu0  ;;  %v1855_v55 = vpop.f32.mrf.mxu1 }
 0x14e   : > { %v6083_v43 = vadd.f32 %v1855_v55, %v1760_v58  ;;  %v2893_v27 = vrot.slane %v2891_v63, 4 }
 0x14f   : > { %v4470_v4 = vpop.f32.mrf.mxu0  ;;  %4673 = vmatmul.mubr.msk.bf16.gmra.mxu0 %vm854_vm2, %v5687_v13  ;;  %v4489_v57 = vpop.f32.mrf.mxu1  ;;  %v4163_v13 = vrot.slane %v5908_v60, 9 }
 0x150   : > { %v6088_v36 = vadd.f32 %v4470_v4, %v5970_v46  ;;  %v6090_v54 = vadd.f32 %v4489_v57, %v1763_v6  ;;  %4676 = vmatprep.mubr.msk.bf16.mxu0 %vm854_vm2, %v5691_v30  ;;  %v2894_v30 = vrot.slane %v5960_v25, 5  ;;  %v1329_v25 = vadd.f32 %v6003_v5, %v5822_v31 }
 0x151   : > { %v1709_v33 = vpop.f32.mrf.mxu0  ;;  %v6095_v37 = vpop.f32.mrf.mxu1 }
 0x152   : > { %v6098_v58 = vadd.f32 %v1709_v33, %v5978_v59  ;;  %v2895_v8 = vsel %vm5437_vm6, %v2893_v27, %v2894_v30  ;;  %v4903_v30 = vld [vmem:[%s7037_s4 + $0x28] sm:$0xff]  }
 0x153   : > { %v4471_v0 = vpop.f32.mrf.mxu0  ;;  %v4492_v47 = vpop.f32.mrf.mxu1 }
 0x154   : > { %v6102_v46 = vadd.f32 %v4471_v0, %v5985_v12  ;;  %v6104_v6 = vadd.f32 %v4492_v47, %v1766_v26  ;;  %v2892_v12 = vsel %vm5437_vm6, %v4163_v13, %v2891_v63  ;;  %v4902_v63 = vld [vmem:[%s7037_s4 + $0x30] sm:$0xff]  }
 0x155   : > { %v6107_v35 = vpop.f32.mrf.mxu0  ;;  %v1871_v16 = vpop.f32.mrf.mxu1  ;;  %v4166_v1 = vcombine.low %v2892_v12, %v2895_v8 }
 0x156   : > { %v6112_v59 = vadd.f32 %v1871_v16, %v6018_v34  ;;  %v7191_v34 = vld [vmem:[#allocation9_spill] sm:$0xff] }
 0x157   : > { %v4474_v2 = vpop.f32.mrf.mxu0  ;;  %4677 = vmatmul.mubr.msk.bf16.gmra.mxu0 %vm854_vm2, %v5705_v17  ;;  %v4493_v60 = vpop.f32.mrf.mxu1  ;;  %v1340_v62 = vadd.f32 %v6010_v42, %v7191_v34 }
 0x158   : > { %v6120_v26 = vadd.f32 %v4474_v2, %v1337_v51  ;;  %v6123_v40 = vadd.f32 %v4493_v60, %v6022_v23  ;;  %4680 = vmatprep.mubr.msk.bf16.mxu0 %vm854_vm2, %v5841_v56  ;;  %v4901_v23 = vld [vmem:[%s7037_s4 + $0x38] sm:$0xff]   ;;  %v7192_v2 = vld [vmem:[#allocation22_spill] sm:$0xff] }
 0x159   : > { %v1725_v52 = vpop.f32.mrf.mxu0  ;;  %v6129_v17 = vpop.f32.mrf.mxu1  ;;  %4684 = vmatprep.subr.bf16.mxu1 %v4901_v23 }
 0x15a   : > { %v6133_v29 = vadd.f32 %v1725_v52, %v1329_v25  ;;  %4685 = vmatpush3.bf16.msra.mxu1 %v4901_v23 }
 0x15b   : > { %v4475_v31 = vpop.f32.mrf.mxu0  ;;  %v4496_v5 = vpop.f32.mrf.mxu1  ;;  %4686 = vmatprep.subr.bf16.mxu1 %v4902_v63 }
 0x15c   : > { %v6138_v28 = vadd.f32 %v4475_v31, %v1340_v62  ;;  %v6141_v38 = vadd.f32 %v4496_v5, %v6036_v10 }
 0x15d   : > { %v6143_v56 = vpop.f32.mrf.mxu0  ;;  %v1887_v55 = vpop.f32.mrf.mxu1 }
 0x15e   : > { %v6146_v42 = vadd.f32 %v1887_v55, %v6046_v39  ;;  %4687 = vmatpush3.bf16.msra.mxu1 %v4902_v63  ;;  %v7193_v55 = vld [vmem:[#allocation26_spill] sm:$0xff] }
 0x15f   : > { %v4478_v4 = vpop.f32.mrf.mxu0  ;;  %4681 = vmatmul.mubr.msk.bf16.gmra.mxu0 %vm854_vm2, %v4166_v1  ;;  %v4497_v57 = vpop.f32.mrf.mxu1  ;;  %4688 = vmatprep.subr.bf16.mxu1 %v4903_v30 }
 0x160   : > { %v6153_v33 = vadd.f32 %v4478_v4, %v6025_v45  ;;  %v6156_v10 = vadd.f32 %v4497_v57, %v6049_v19  ;;  %v1316_v4 = vadd.f32 %v5989_v3, %v7193_v55  ;;  %v4906_v3 = vld [vmem:[%s7037_s4 + $0x10] sm:$0xff]  }
 0x161   : > { %v1741_v0 = vpop.f32.mrf.mxu0  ;;  %v6158_v47 = vpop.f32.mrf.mxu1 }
 0x162   : > { %v6161_v39 = vadd.f32 %v1741_v0, %v6031_v53  ;;  %v1300_v53 = vadd.f32 %v5957_v14, %v7192_v2  ;;  %4689 = vmatpush3.bf16.msra.mxu1 %v4903_v30 }
 0x163   : > { %v4479_v13 = vpop.f32.mrf.mxu0  ;;  %v4500_v27 = vpop.f32.mrf.mxu1 }
 0x164   : > { %v6167_v45 = vadd.f32 %v4479_v13, %v6039_v61  ;;  %v6170_v19 = vadd.f32 %v4500_v27, %v6063_v15  ;;  %v4904_v61 = vld [vmem:[%s7037_s4 + $0x20] sm:$0xff]   ;;  %v1773_v15 = vadd.f32 %v6081_v21, %v1300_v53  ;;  %v4905_v21 = vld [vmem:[%s7037_s4 + $0x18] sm:$0xff]  }
 0x165   : > { %v6172_v16 = vpop.f32.mrf.mxu0  ;;  %v1903_v51 = vpop.f32.mrf.mxu1  ;;  %4690 = vmatprep.subr.bf16.mxu1 %v4904_v61 }
 0x166   : > { %v6177_v60 = vadd.f32 %v1903_v51, %v6073_v7  ;;  %4691 = vmatpush3.bf16.msra.mxu1 %v4904_v61 }
 0x167   : > { %v4518_v12 = vpop.f32.mrf.mxu0  ;;  %v4501_v25 = vpop.f32.mrf.mxu1  ;;  %4692 = vmatprep.subr.bf16.mxu1 %v4905_v21 }
 0x168   : > { %v6184_v8 = vadd.f32 %v4518_v12, %v6052_v20  ;;  %v6187_v52 = vadd.f32 %v4501_v25, %v6076_v44  ;;  %v1967_v20 = vadd.f32 %v6070_v22, %v5976_v18  ;;  %v7194_v25 = vld [vmem:[#allocation8_spill] sm:$0xff] }
 0x169   : > { %v2071_v34 = vpop.f32.mrf.mxu0  ;;  %v1906_v14 = vpop.f32.mrf.mxu1  ;;  %v1332_v61 = vadd.f32 %v6015_v50, %v7194_v25  ;;  %v4908_v50 = vld [vmem:[%s7037_s4] sm:$0xff]  }
 0x16a   : > { %v6190_v7 = vadd.f32 %v2071_v34, %v6058_v11  ;;  %v6192_v62 = vadd.f32 %v1906_v14, %v1773_v15  ;;  %4693 = vmatpush3.bf16.msra.mxu1 %v4905_v21 }
 0x16b   : > { %v4519_v31 = vpop.f32.mrf.mxu0  ;;  %v4504_v5 = vpop.f32.mrf.mxu1  ;;  %4694 = vmatprep.subr.bf16.mxu1 %v4906_v3 }
 0x16c   : > { %v6200_v44 = vadd.f32 %v4519_v31, %v6066_v9  ;;  %v6203_v1 = vadd.f32 %v4504_v5, %v6088_v36  ;;  %v1777_v9 = vadd.f32 %v6107_v35, %v1316_v4  ;;  %v7195_v4 = vld [vmem:[#allocation15_spill] sm:$0xff] }
 0x16d   : > { %v2074_v11 = vpop.f32.mrf.mxu0  ;;  %v1919_v23 = vpop.f32.mrf.mxu1 }
 0x16e   : > { %v6207_v57 = vadd.f32 %v2074_v11, %v1967_v20  ;;  %v6210_v63 = vadd.f32 %v1919_v23, %v6098_v58  ;;  %4695 = vmatpush3.bf16.msra.mxu1 %v4906_v3 }
 0x16f   : > { %v4522_v0 = vpop.f32.mrf.mxu0  ;;  %v4505_v18 = vpop.f32.mrf.mxu1 }
 0x170   : > { %v6214_v22 = vadd.f32 %v4522_v0, %v6079_v49  ;;  %v6217_v36 = vadd.f32 %v4505_v18, %v6102_v46  ;;  %v1971_v49 = vadd.f32 %v6095_v37, %v6006_v48  ;;  %v1781_v37 = vadd.f32 %v6143_v56, %v1332_v61 }
 0x171   : > { %v2087_v13 = vpop.f32.mrf.mxu0  ;;  %v1922_v27 = vpop.f32.mrf.mxu1  ;;  %v1348_v0 = vadd.f32 %v6043_v32, %v7195_v4 }
 0x172   : > { %v6223_v58 = vadd.f32 %v2087_v13, %v6083_v43  ;;  %v6225_v30 = vadd.f32 %v1922_v27, %v1777_v9  ;;  %v4907_v43 = vld [vmem:[%s7037_s4 + $0x8] sm:$0xff]  }
 0x173   : > { %v4523_v51 = vpop.f32.mrf.mxu0  ;;  %v4508_v35 = vpop.f32.mrf.mxu1  ;;  %4696 = vmatprep.subr.bf16.mxu1 %v4907_v43  ;;  %v1785_v13 = vadd.f32 %v6172_v16, %v1348_v0 }
 0x174   : > { %v6230_v46 = vadd.f32 %v4523_v51, %v6090_v54  ;;  %v6233_v2 = vadd.f32 %v4508_v35, %v6120_v26  ;;  %4697 = vmatpush3.bf16.msra.mxu1 %v4907_v43 }
 0x175   : > { %v2090_v53 = vpop.f32.mrf.mxu0  ;;  %v1935_v12 = vpop.f32.mrf.mxu1  ;;  %4698 = vmatprep.subr.bf16.mxu1 %v4908_v50 }
 0x176   : > { %v6240_v15 = vadd.f32 %v2090_v53, %v1971_v49  ;;  %v6243_v34 = vadd.f32 %v1935_v12, %v6133_v29 }
 0x177   : > { %v4526_v48 = vpop.f32.mrf.mxu0  ;;  %v4509_v54 = vpop.f32.mrf.mxu1 }
 0x178   : > { %v2208_v26 = vadd.f32 %v4526_v48, %v6104_v6  ;;  %v6248_v14 = vadd.f32 %v4509_v54, %v6138_v28  ;;  %4699 = vmatpush3.bf16.msra.mxu1 %v4908_v50  ;;  %v1975_v6 = vadd.f32 %v6129_v17, %v6028_v24 }
 0x179   : > { %v2103_v31 = vpop.f32.mrf.mxu0  ;;  %v1938_v5 = vpop.f32.mrf.mxu1 }
 0x17a   : > { %v2206_v29 = vadd.f32 %v2103_v31, %v6112_v59  ;;  %v6254_v21 = vadd.f32 %v1938_v5, %v1781_v37 }
 0x17b   : > { %v4527_v20 = vpop.f32.mrf.mxu0  ;;  %v4512_v11 = vpop.f32.mrf.mxu1 }
 0x17c   : > { %v2209_v28 = vadd.f32 %v4527_v20, %v6123_v40  ;;  %v6260_v56 = vadd.f32 %v4512_v11, %v6153_v33 }
 0x17d   : > { %v2106_v23 = vpop.f32.mrf.mxu0  ;;  %v1951_v55 = vpop.f32.mrf.mxu1 }
 0x17e   : > { %v6264_v59 = vadd.f32 %v2106_v23, %v1975_v6  ;;  %v6267_v18 = vadd.f32 %v1951_v55, %v6161_v39  ;;  %v1979_v39 = vadd.f32 %v6158_v47, %v6055_v41 }
 0x17f   : > { %v4530_v9 = vpop.f32.mrf.mxu0  ;;  %v4513_v3 = vpop.f32.mrf.mxu1 }
 0x180   : > { %v2212_v24 = vadd.f32 %v4530_v9, %v6141_v38  ;;  %v6272_v40 = vadd.f32 %v4513_v3, %v6167_v45 }
 0x181   : > { %v2119_v17 = vpop.f32.mrf.mxu0  ;;  %v1954_v33 = vpop.f32.mrf.mxu1 }
 0x182   : > { %v2210_v27 = vadd.f32 %v2119_v17, %v6146_v42  ;;  %v6275_v51 = vadd.f32 %v1954_v33, %v1785_v13 }
 0x183   : > { %v4531_v32 = vpop.f32.mrf.mxu0  ;;  %v4552_v35 = vpop.f32.mrf.mxu1 }
 0x184   : > { %v2213_v49 = vadd.f32 %v4531_v32, %v6156_v10  ;;  %v6281_v16 = vadd.f32 %v4552_v35, %v6184_v8 }
 0x185   : > { %v2122_v38 = vpop.f32.mrf.mxu0  ;;  %v2287_v43 = vpop.f32.mrf.mxu1 }
 0x186   : > { %v6283_v45 = vadd.f32 %v2122_v38, %v1979_v39  ;;  %v6286_v53 = vadd.f32 %v2287_v43, %v6190_v7 }
 0x187   : > { %v4534_v42 = vpop.f32.mrf.mxu0  ;;  %v4553_v12 = vpop.f32.mrf.mxu1 }
 0x188   : > { %v2216_v25 = vadd.f32 %v4534_v42, %v6170_v19  ;;  %v6290_v61 = vadd.f32 %v4553_v12, %v6200_v44 }
 0x189   : > { %v2135_v41 = vpop.f32.mrf.mxu0  ;;  %v6292_v47 = vpop.f32.mrf.mxu1 }
 0x18a   : > { %v2214_v10 = vadd.f32 %v2135_v41, %v6177_v60 }
 0x18b   : > { %v4535_v8 = vpop.f32.mrf.mxu0  ;;  %v4556_v48 = vpop.f32.mrf.mxu1 }
 0x18c   : > { %v2217_v54 = vadd.f32 %v4535_v8, %v6187_v52  ;;  %v6297_v37 = vadd.f32 %v4556_v48, %v6214_v22 }
 0x18d   : > { %v2138_v7 = vpop.f32.mrf.mxu0  ;;  %v2303_v50 = vpop.f32.mrf.mxu1 }
 0x18e   : > { %v6300_v31 = vadd.f32 %v2138_v7, %v6192_v62  ;;  %v6303_v19 = vadd.f32 %v2303_v50, %v6223_v58 }
 0x18f   : > { %v4538_v44 = vpop.f32.mrf.mxu0  ;;  %v4557_v5 = vpop.f32.mrf.mxu1 }
 0x190   : > { %v2220_v20 = vadd.f32 %v4538_v44, %v6203_v1  ;;  %v6307_v60 = vadd.f32 %v4557_v5, %v6230_v46 }
 0x191   : > { %v2151_v11 = vpop.f32.mrf.mxu0  ;;  %v6309_v52 = vpop.f32.mrf.mxu1 }
 0x192   : > { %v2218_v22 = vadd.f32 %v2151_v11, %v6210_v63 }
 0x193   : > { %v4539_v6 = vpop.f32.mrf.mxu0  ;;  %v4560_v23 = vpop.f32.mrf.mxu1 }
 0x194   : > { %v2221_v62 = vadd.f32 %v4539_v6, %v6217_v36  ;;  %v6313_v55 = vadd.f32 %v4560_v23, %v2208_v26 }
 0x195   : > { %v2154_v58 = vpop.f32.mrf.mxu0  ;;  %v2319_v4 = vpop.f32.mrf.mxu1 }
 0x196   : > { %v6316_v0 = vadd.f32 %v2154_v58, %v6225_v30  ;;  %v6318_v1 = vadd.f32 %v2319_v4, %v2206_v29 }
 0x197   : > { %v4542_v46 = vpop.f32.mrf.mxu0  ;;  %v4561_v9 = vpop.f32.mrf.mxu1 }
 0x198   : > { %v2224_v3 = vadd.f32 %v4542_v46, %v6233_v2  ;;  %v6321_v13 = vadd.f32 %v4561_v9, %v2209_v28 }
 0x199   : > { %v2167_v63 = vpop.f32.mrf.mxu0  ;;  %v6323_v17 = vpop.f32.mrf.mxu1 }
 0x19a   : > { %v2222_v36 = vadd.f32 %v2167_v63, %v6243_v34 }
 0x19b   : > { %v4543_v26 = vpop.f32.mrf.mxu0  ;;  %v4564_v33 = vpop.f32.mrf.mxu1 }
 0x19c   : > { %v2225_v32 = vadd.f32 %v4543_v26, %v6248_v14  ;;  %v6327_v35 = vadd.f32 %v4564_v33, %v2212_v24 }
 0x19d   : > { %v2170_v30 = vpop.f32.mrf.mxu0  ;;  %v2335_v29 = vpop.f32.mrf.mxu1 }
 0x19e   : > { %v6330_v39 = vadd.f32 %v2170_v30, %v6254_v21  ;;  %v6332_v38 = vadd.f32 %v2335_v29, %v2210_v27 }
 0x19f   : > { %v4546_v2 = vpop.f32.mrf.mxu0  ;;  %v4565_v28 = vpop.f32.mrf.mxu1 }
 0x1a0   : > { %7196 = vst [vmem:[#allocation17_spill] sm:$0xff] %v6330_v39  ;;  %v2228_v43 = vadd.f32 %v4546_v2, %v6260_v56  ;;  %v6335_v42 = vadd.f32 %v4565_v28, %v2213_v49 }
 0x1a1   : > { %v2183_v34 = vpop.f32.mrf.mxu0  ;;  %v6337_v12 = vpop.f32.mrf.mxu1 }
 0x1a2   : > { %v2226_v14 = vadd.f32 %v2183_v34, %v6267_v18 }
 0x1a3   : > { %v4547_v24 = vpop.f32.mrf.mxu0  ;;  %v4568_v41 = vpop.f32.mrf.mxu1 }
 0x1a4   : > { %v2229_v8 = vadd.f32 %v4547_v24, %v6272_v40  ;;  %v2432_v48 = vadd.f32 %v4568_v41, %v2216_v25 }
 0x1a5   : > { %v2186_v21 = vpop.f32.mrf.mxu0  ;;  %v2351_v7 = vpop.f32.mrf.mxu1 }
 0x1a6   : > { %v6342_v27 = vadd.f32 %v2186_v21, %v6275_v51  ;;  %v2430_v50 = vadd.f32 %v2351_v7, %v2214_v10 }
 0x1a7   : > { %v4586_v44 = vpop.f32.mrf.mxu0  ;;  %v4569_v56 = vpop.f32.mrf.mxu1 }
 0x1a8   : > { %7197 = vst [vmem:[#allocation20_spill] sm:$0xff] %v6342_v27  ;;  %v6345_v49 = vadd.f32 %v4586_v44, %v6281_v16  ;;  %v2433_v5 = vadd.f32 %v4569_v56, %v2217_v54 }
 0x1a9   : > { %v2497_v11 = vpop.f32.mrf.mxu0  ;;  %v6347_v6 = vpop.f32.mrf.mxu1 }
 0x1aa   : > { %v6350_v18 = vadd.f32 %v2497_v11, %v6286_v53 }
 0x1ab   : > { %v4587_v40 = vpop.f32.mrf.mxu0  ;;  %v4572_v25 = vpop.f32.mrf.mxu1 }
 0x1ac   : > { %v6353_v23 = vadd.f32 %v4587_v40, %v6290_v61  ;;  %v2436_v51 = vadd.f32 %v4572_v25, %v2220_v20 }
 0x1ad   : > { %v6355_v58 = vpop.f32.mrf.mxu0  ;;  %v2367_v10 = vpop.f32.mrf.mxu1 }
 0x1ae   : > { %v2434_v4 = vadd.f32 %v2367_v10, %v2218_v22 }
 0x1af   : > { %v4590_v46 = vpop.f32.mrf.mxu0  ;;  %v4573_v16 = vpop.f32.mrf.mxu1 }
 0x1b0   : > { %v6358_v54 = vadd.f32 %v4590_v46, %v6297_v37  ;;  %v2437_v9 = vadd.f32 %v4573_v16, %v2221_v62 }
 0x1b1   : > { %v2513_v63 = vpop.f32.mrf.mxu0  ;;  %v6360_v26 = vpop.f32.mrf.mxu1 }
 0x1b2   : > { %v6363_v53 = vadd.f32 %v2513_v63, %v6303_v19 }
 0x1b3   : > { %v4591_v33 = vpop.f32.mrf.mxu0  ;;  %v4576_v61 = vpop.f32.mrf.mxu1 }
 0x1b4   : > { %v6366_v20 = vadd.f32 %v4591_v33, %v6307_v60  ;;  %v2440_v30 = vadd.f32 %v4576_v61, %v2224_v3 }
 0x1b5   : > { %v6368_v29 = vpop.f32.mrf.mxu0  ;;  %v2383_v22 = vpop.f32.mrf.mxu1 }
 0x1b6   : > { %v2438_v2 = vadd.f32 %v2383_v22, %v2222_v36 }
 0x1b7   : > { %v4594_v28 = vpop.f32.mrf.mxu0  ;;  %v4577_v37 = vpop.f32.mrf.mxu1 }
 0x1b8   : > { %v6371_v62 = vadd.f32 %v4594_v28, %v6313_v55  ;;  %v2441_v34 = vadd.f32 %v4577_v37, %v2225_v32 }
 0x1b9   : > { %v2529_v24 = vpop.f32.mrf.mxu0  ;;  %v6373_v41 = vpop.f32.mrf.mxu1 }
 0x1ba   : > { %7198 = vst [vmem:[#allocation18_spill] sm:$0xff] %v6373_v41  ;;  %v6376_v19 = vadd.f32 %v2529_v24, %v6318_v1 }
 0x1bb   : > { %v4595_v21 = vpop.f32.mrf.mxu0  ;;  %v4580_v60 = vpop.f32.mrf.mxu1 }
 0x1bc   : > { %v6379_v3 = vadd.f32 %v4595_v21, %v6321_v13  ;;  %v2444_v7 = vadd.f32 %v4580_v60, %v2228_v43 }
 0x1bd   : > { %v6381_v44 = vpop.f32.mrf.mxu0  ;;  %v2399_v36 = vpop.f32.mrf.mxu1 }
 0x1be   : > { %v2442_v56 = vadd.f32 %v2399_v36, %v2226_v14 }
 0x1bf   : > { %v4598_v11 = vpop.f32.mrf.mxu0  ;;  %v4581_v55 = vpop.f32.mrf.mxu1 }
 0x1c0   : > { %v6384_v32 = vadd.f32 %v4598_v11, %v6327_v35  ;;  %v2445_v40 = vadd.f32 %v4581_v55, %v2229_v8 }
 0x1c1   : > { %v2545_v25 = vpop.f32.mrf.mxu0  ;;  %v6386_v10 = vpop.f32.mrf.mxu1 }
 0x1c2   : > { %7199 = vst [vmem:[#allocation2_spill] sm:$0xff] %v6386_v10  ;;  %v6389_v1 = vadd.f32 %v2545_v25, %v6332_v38 }
 0x1c3   : > { %v4599_v46 = vpop.f32.mrf.mxu0  ;;  %v4620_v13 = vpop.f32.mrf.mxu1 }
 0x1c4   : > { %v6392_v43 = vadd.f32 %v4599_v46, %v6335_v42 }
 0x1c5   : > { %v6394_v16 = vpop.f32.mrf.mxu0  ;;  %v2729_v14 = vpop.f32.mrf.mxu1 }
 0x1c7   : > { %v4602_v63 = vpop.f32.mrf.mxu0  ;;  %v4621_v33 = vpop.f32.mrf.mxu1 }
 0x1c8   : > { %v6396_v61 = vadd.f32 %v4602_v63, %v2432_v48 }
 0x1c9   : > { %v2561_v35 = vpop.f32.mrf.mxu0  ;;  %v2732_v8 = vpop.f32.mrf.mxu1 }
 0x1ca   : > { %v6398_v22 = vadd.f32 %v2561_v35, %v2430_v50 }
 0x1cb   : > { %v4603_v28 = vpop.f32.mrf.mxu0  ;;  %v6400_v37 = vpop.f32.mrf.mxu1 }
 0x1cc   : > { %v6402_v38 = vadd.f32 %v4603_v28, %v2433_v5 }
 0x1cd   : > { %v6404_v24 = vpop.f32.mrf.mxu0  ;;  %v6406_v42 = vpop.f32.mrf.mxu1 }
 0x1ce   : > { %7200 = vst [vmem:[#allocation23_spill] sm:$0xff] %v6402_v38 }
 0x1cf   : > { %v4606_v21 = vpop.f32.mrf.mxu0  ;;  %v6408_v60 = vpop.f32.mrf.mxu1 }
 0x1d0   : > { %v6410_v36 = vadd.f32 %v4606_v21, %v2436_v51 }
 0x1d1   : > { %v2577_v48 = vpop.f32.mrf.mxu0  ;;  %v6412_v11 = vpop.f32.mrf.mxu1 }
 0x1d2   : > { %7201 = vst [vmem:[#allocation25_spill] sm:$0xff] %v6410_v36  ;;  %v6414_v55 = vadd.f32 %v2577_v48, %v2434_v4 }
 0x1d3   : > { %v4607_v50 = vpop.f32.mrf.mxu0  ;;  %v6416_v25 = vpop.f32.mrf.mxu1 }
 0x1d4   : > { %7202 = vst [vmem:[#allocation3_spill] sm:$0xff] %v6414_v55  ;;  %v6418_v46 = vadd.f32 %v4607_v50, %v2437_v9 }
 0x1d5   : > { %v6420_v5 = vpop.f32.mrf.mxu0  ;;  %v6422_v63 = vpop.f32.mrf.mxu1 }
 0x1d6   : > { %7203 = vst [vmem:[#allocation6_spill] sm:$0xff] %v6418_v46  ;;  %7204 = vst [vmem:[#allocation28_spill] sm:$0xff] %v6420_v5 }
 0x1d7   : > { %v4610_v35 = vpop.f32.mrf.mxu0  ;;  %v6424_v28 = vpop.f32.mrf.mxu1 }
 0x1d8   : > { %v6426_v10 = vadd.f32 %v4610_v35, %v2440_v30  ;;  %v3176_v30 = vlaneseq }
 0x1d9   : > { %v2593_v51 = vpop.f32.mrf.mxu0  ;;  %v6428_v21 = vpop.f32.mrf.mxu1 }
 0x1da   : > { %7205 = vst [vmem:[#allocation11_spill] sm:$0xff] %v6426_v10  ;;  %v6430_v4 = vadd.f32 %v2593_v51, %v2438_v2 }
 0x1db   : > { %v4611_v48 = vpop.f32.mrf.mxu0  ;;  %v6432_v27 = vpop.f32.mrf.mxu1 }
 0x1dc   : > { %7206 = vst [vmem:[#allocation5_spill] sm:$0xff] %v6430_v4  ;;  %v6434_v9 = vadd.f32 %v4611_v48, %v2441_v34  ;;  %v3177_v4 = vshrl.u32 %v3176_v30, 7  ;;  %v2856_v30 = vadd.f32 %v2729_v14, %v6350_v18 }
 0x1dd   : > { %v6436_v50 = vpop.f32.mrf.mxu0  ;;  %v6438_v46 = vpop.f32.mrf.mxu1 }
 0x1de   : > { %7207 = vst [vmem:[#allocation10_spill] sm:$0xff] %v6434_v9  ;;  %7208 = vst [vmem:[#allocation13_spill] sm:$0xff] %v6436_v50  ;;  %v3214_v39 = vsub.s32 1, %v3177_v4 }
 0x1df   : > { %v4614_v55 = vpop.f32.mrf.mxu0  ;;  %v6440_v36 = vpop.f32.mrf.mxu1 }
 0x1e0   : > { %v6442_v35 = vadd.f32 %v4614_v55, %v2444_v7  ;;  %v2858_v7 = vadd.f32 %v4620_v13, %v6345_v49  ;;  %v2859_v49 = vadd.f32 %v4621_v33, %v6353_v23 }
 0x1e1   : > { %v2609_v10 = vpop.f32.mrf.mxu0  ;;  %v6444_v5 = vpop.f32.mrf.mxu1 }
 0x1e2   : > { %7209 = vst [vmem:[#allocation16_spill] sm:$0xff] %v6442_v35  ;;  %v6446_v2 = vadd.f32 %v2609_v10, %v2442_v56  ;;  %v6462_v56 = vld [vmem:[%s7035_s2] ss:$0 sm:$0xff]  ;;  %v3178_v10 = vsub.s32 0, %v3177_v4  ;;  %v2419_v4 = vadd.f32 %v6309_v52, %v6240_v15 }
 0x1e3   : > { %v4615_v51 = vpop.f32.mrf.mxu0  ;;  %v6451_v48 = vpop.f32.mrf.mxu1 }
 0x1e4   : > { %7210 = vst [vmem:[#allocation19_spill] sm:$0xff] %v6446_v2  ;;  %v6449_v34 = vadd.f32 %v4615_v51, %v2445_v40  ;;  %v2415_v40 = vadd.f32 %v6292_v47, %v6207_v57  ;;  %v2629_v15 = vadd.f32 %v6368_v29, %v2419_v4 }
 0x1e5   : > { %v6453_v9 = vpop.f32.mrf.mxu0  ;;  %v6467_v2 = vpop.f32.mrf.mxu1 }
 0x1e6   : > { %7211 = vst [vmem:[#allocation21_spill] sm:$0xff] %v6449_v34  ;;  %7212 = vst [vmem:[#allocation24_spill] sm:$0xff] %v6453_v9  ;;  %v3175_v34 = vld [vmem:[%s342_s14] sm:$0x3]  ;;  %v2625_v9 = vadd.f32 %v6355_v58, %v2415_v40  ;;  %v2861_v29 = vadd.f32 %v6412_v11, %v2629_v15 }
 0x1e7   : > { %v4654_v55 = vpop.f32.mrf.mxu0  ;;  %v6474_v41 = vrot.slane %v3175_v34, %v3178_v10  ;;  %v6480_v14 = vpop.f32.mrf.mxu1 }
 0x1e8   : > { %v3074_v51 = vadd.f32 %v4654_v55, %v2858_v7  ;;  %v2857_v57 = vadd.f32 %v2732_v8, %v2625_v9  ;;  %v2862_v8 = vadd.f32 %v6400_v37, %v6358_v54  ;;  %v2860_v55 = vadd.f32 %v6406_v42, %v6363_v53 }
 0x1e9   : > { %v2945_v35 = vpop.f32.mrf.mxu0  ;;  %v6498_v40 = vpop.f32.mrf.mxu1  ;;  %v2863_v37 = vadd.f32 %v6408_v60, %v6366_v20 }
 0x1ea   : > { %v6472_v13 = vadd.f32 %v6462_v56, %v3074_v51  ;;  %v3072_v50 = vadd.f32 %v2945_v35, %v2856_v30  ;;  %v2423_v51 = vadd.f32 %v6323_v17, %v6264_v59  ;;  %v2427_v17 = vadd.f32 %v6337_v12, %v6283_v45 }
 0x1eb   : > { %v4655_v38 = vpop.f32.mrf.mxu0 }
 0x1ec   : > { %v7115_v47 = vmax.f32 %v6472_v13, 0.0  ;;  %v6478_v18 = vadd.f32 %v6462_v56, %v3072_v50  ;;  %v3075_v7 = vadd.f32 %v4655_v38, %v2859_v49  ;;  %v6493_v50 = vrot.slane %v3175_v34, %v3214_v39 }
 0x1ed   : > { %v2948_v58 = vpop.f32.mrf.mxu0  ;;  %v2633_v11 = vadd.f32 %v6381_v44, %v2423_v51 }
 0x1ee   : > { %v3143_v23 = vmax.f32 %v6478_v18, 0.0  ;;  %v6484_v33 = vadd.f32 %v6462_v56, %v3075_v7  ;;  %v3073_v35 = vadd.f32 %v2948_v58, %v2857_v57  ;;  %v3182_v9 = vmul.f32 %v6474_v41, %v7115_v47  ;;  %v6524_v58 = vpop.f32.mrf.mxu1 }
 0x1ef   : > { %v4658_v38 = vpop.f32.mrf.mxu0 }
 0x1f0   : > { %v7105_v10 = vmax.f32 %v6484_v33, 0.0  ;;  %v6501_v30 = vadd.f32 %v6462_v56, %v3073_v35  ;;  %v3180_v52 = vmul.f32 %v6474_v41, %v3143_v23  ;;  %v3078_v54 = vadd.f32 %v4658_v38, %v2862_v8 }
 0x1f1   : > { %v2961_v39 = vpop.f32.mrf.mxu0  ;;  %v3218_v49 = vadd.f32 %v6493_v50, %v3182_v9  ;;  %v2866_v38 = vadd.f32 %v6416_v25, %v6371_v62  ;;  %v2867_v62 = vadd.f32 %v6424_v28, %v6379_v3 }
 0x1f2   : > { %v3183_v53 = vmul.f32 %v6474_v41, %v7105_v10  ;;  %v7118_v42 = vmax.f32 %v6501_v30, 0.0  ;;  %v3076_v34 = vadd.f32 %v2961_v39, %v2860_v55  ;;  %v6518_v57 = vadd.f32 %v6462_v56, %v3078_v54 }
 0x1f3   : > { %v4659_v7 = vpop.f32.mrf.mxu0  ;;  %v3216_v9 = vadd.f32 %v6493_v50, %v3180_v52  ;;  %v2864_v39 = vadd.f32 %v6422_v63, %v6376_v19  ;;  %v3250_v25 = vmax.f32 %v3218_v49, 0.0 }
 0x1f4   : > { %v3219_v20 = vadd.f32 %v6493_v50, %v3183_v53  ;;  %v3181_v60 = vmul.f32 %v6474_v41, %v7118_v42  ;;  %v6527_v35 = vadd.f32 %v6462_v56, %v3076_v34  ;;  %v3079_v59 = vadd.f32 %v4659_v7, %v2863_v37  ;;  %v6548_v37 = vpop.f32.mrf.mxu1 }
 0x1f5   : > { %v7098_v4 = vmax.f32 %v6518_v57, 0.0  ;;  %v2964_v8 = vpop.f32.mrf.mxu0 }
 0x1f6   : > { %v7100_v55 = vmax.f32 %v6527_v35, 0.0  ;;  %v6538_v15 = vadd.f32 %v6462_v56, %v3079_v59  ;;  %v3077_v54 = vadd.f32 %v2964_v8, %v2861_v29  ;;  %v3251_v45 = vmax.f32 %v3219_v20, 0.0 }
 0x1f7   : > { %v3186_v12 = vmul.f32 %v6474_v41, %v7098_v4  ;;  %v4662_v44 = vpop.f32.mrf.mxu0  ;;  %v3217_v52 = vadd.f32 %v6493_v50, %v3181_v60  ;;  %v3248_v29 = vmax.f32 %v3216_v9, 0.0  ;;  %v2865_v20 = vadd.f32 %v6428_v21, %v2633_v11 }
 0x1f8   : > { %v7097_v53 = vmax.f32 %v6538_v15, 0.0  ;;  %v6552_v34 = vadd.f32 %v6462_v56, %v3077_v54  ;;  %v3184_v19 = vmul.f32 %v6474_v41, %v7100_v55  ;;  %v3082_v63 = vadd.f32 %v4662_v44, %v2866_v38  ;;  %v6566_v44 = vpop.f32.mrf.mxu1 }
 0x1f9   : > { %v2977_v51 = vpop.f32.mrf.mxu0  ;;  %v3249_v7 = vmax.f32 %v3217_v52, 0.0  ;;  %v3281_v60 = vpack.c.bf16 %v3251_v45, %v3250_v25  ;;  %v3222_v59 = vadd.f32 %v6493_v50, %v3186_v12  ;;  %v2431_v45 = vadd.f32 %v6347_v6, %v6300_v31 }
 0x1fa   : > { %v3187_v3 = vmul.f32 %v6474_v41, %v7097_v53  ;;  %v7099_v28 = vmax.f32 %v6552_v34, 0.0  ;;  %v3080_v49 = vadd.f32 %v2977_v51, %v2864_v39  ;;  %v6564_v8 = vadd.f32 %v6462_v56, %v3082_v63 }
 0x1fb   : > { %v4663_v54 = vpop.f32.mrf.mxu0  ;;  %v3280_v38 = vpack.c.bf16 %v3249_v7, %v3248_v29  ;;  %v6579_v12 = vadd.f32 %v6360_v26, %v6316_v0  ;;  %v3220_v63 = vadd.f32 %v6493_v50, %v3184_v19  ;;  %v2870_v51 = vadd.f32 %v6432_v27, %v6384_v32 }
 0x1fc   : > { %v3223_v9 = vadd.f32 %v6493_v50, %v3187_v3  ;;  %v3185_v21 = vmul.f32 %v6474_v41, %v7099_v28  ;;  %v6573_v11 = vadd.f32 %v6462_v56, %v3080_v49  ;;  %v3083_v39 = vadd.f32 %v4663_v54, %v2867_v62  ;;  %v6593_v49 = vpop.f32.mrf.mxu1  ;;  %v7227_v28 = vld [vmem:[#allocation10_spill] sm:$0xff] }
 0x1fd   : > { %v7094_v52 = vmax.f32 %v6564_v8, 0.0  ;;  %4700 = vmatprep.mubr.bf16.mxu1 %v3280_v38  ;;  %v2980_v25 = vpop.f32.mrf.mxu0  ;;  %v2637_v31 = vadd.f32 %v6394_v16, %v2427_v17  ;;  %v2868_v0 = vadd.f32 %v6438_v46, %v6389_v1  ;;  %v3254_v19 = vmax.f32 %v3222_v59, 0.0 }
 0x1fe   : > { %v7096_v29 = vmax.f32 %v6573_v11, 0.0  ;;  %v6587_v62 = vadd.f32 %v6462_v56, %v3083_v39  ;;  %v3081_v7 = vadd.f32 %v2980_v25, %v2865_v20  ;;  %4701 = vmatmul.mubr.bf16.vlgmr.msra.gmra.mxu1 %v3281_v60  ;;  %v3255_v6 = vmax.f32 %v3223_v9, 0.0 }
 0x1ff   : > { %v4666_v26 = vpop.f32.mrf.mxu0  ;;  %v3221_v3 = vadd.f32 %v6493_v50, %v3185_v21  ;;  %v3190_v16 = vmul.f32 %v6474_v41, %v7094_v52  ;;  %v3252_v17 = vmax.f32 %v3220_v63, 0.0  ;;  %v2871_v21 = vadd.f32 %v6440_v36, %v6392_v43  ;;  %v6615_v63 = vpop.f32.mrf.mxu1 }
 0x200   : > { %v7093_v27 = vmax.f32 %v6587_v62, 0.0  ;;  %v6597_v32 = vadd.f32 %v6462_v56, %v3081_v7  ;;  %v3086_v54 = vadd.f32 %v4666_v26, %v2870_v51  ;;  %v3188_v1 = vmul.f32 %v6474_v41, %v7096_v29 }
 0x201   : > { %v2993_v46 = vpop.f32.mrf.mxu0  ;;  %v3253_v20 = vmax.f32 %v3221_v3, 0.0  ;;  %v2869_v39 = vadd.f32 %v6444_v5, %v2637_v31  ;;  %v3283_v7 = vpack.c.bf16 %v3255_v6, %v3254_v19  ;;  %v2641_v43 = vadd.f32 %v6404_v24, %v2431_v45 }
 0x202   : > { %v3191_v60 = vmul.f32 %v6474_v41, %v7093_v27  ;;  %v7095_v59 = vmax.f32 %v6597_v32, 0.0  ;;  %v6610_v38 = vadd.f32 %v6462_v56, %v3086_v54  ;;  %v3084_v9 = vadd.f32 %v2993_v46, %v2868_v0 }
 0x203   : > { %v4667_v25 = vpop.f32.mrf.mxu0  ;;  %v3282_v51 = vpack.c.bf16 %v3253_v20, %v3252_v17  ;;  %v3226_v36 = vadd.f32 %v6493_v50, %v3190_v16  ;;  %v3224_v6 = vadd.f32 %v6493_v50, %v3188_v1  ;;  %v2874_v19 = vadd.f32 %v6451_v48, %v6396_v61  ;;  %v6642_v48 = vpop.f32.mrf.mxu1 }
 0x204   : > { %7213 = vst [vmem:[#allocation27_spill] sm:$0xff] %v6610_v38  ;;  %v3227_v26 = vadd.f32 %v6493_v50, %v3191_v60  ;;  %v3189_v3 = vmul.f32 %v6474_v41, %v7095_v59  ;;  %v7089_v54 = vmax.f32 %v6610_v38, 0.0  ;;  %v6623_v0 = vadd.f32 %v6462_v56, %v3084_v9  ;;  %v7215_v9 = vld [vmem:[#allocation23_spill] sm:$0xff] }
 0x205   : > { %v3087_v5 = vadd.f32 %v4667_v25, %v2871_v21  ;;  %4704 = vmatprep.mubr.bf16.mxu1 %v3282_v51  ;;  %v2996_v31 = vpop.f32.mrf.mxu0  ;;  %v2872_v46 = vadd.f32 %v6467_v2, %v6398_v22  ;;  %v2875_v61 = vadd.f32 %v6480_v14, %v7215_v9 }
 0x206   : > { %v7092_v17 = vmax.f32 %v6623_v0, 0.0  ;;  %v3085_v20 = vadd.f32 %v2996_v31, %v2869_v39  ;;  %4705 = vmatmul.mubr.bf16.gmra.mxu1 %v3283_v7  ;;  %v3259_v60 = vmax.f32 %v3227_v26, 0.0  ;;  %v3194_v24 = vmul.f32 %v6474_v41, %v7089_v54  ;;  %v6660_v54 = vpop.f32.mrf.mxu1 }
 0x207   : > { %v6637_v45 = vadd.f32 %v6462_v56, %v3087_v5  ;;  %v4670_v16 = vpop.f32.mrf.mxu0  ;;  %v3225_v1 = vadd.f32 %v6493_v50, %v3189_v3  ;;  %v3258_v39 = vmax.f32 %v3226_v36, 0.0  ;;  %v3256_v7 = vmax.f32 %v3224_v6, 0.0 }
 0x208   : > { %v3192_v22 = vmul.f32 %v6474_v41, %v7092_v17  ;;  %v6648_v2 = vadd.f32 %v6462_v56, %v3085_v20  ;;  %v3090_v21 = vadd.f32 %v4670_v16, %v2874_v19  ;;  %v2873_v3 = vadd.f32 %v6498_v40, %v2641_v43  ;;  %v2828_v17 = vpop.f32.mrf.mxu1 }
 0x209   : > { %7214 = vst [vmem:[#allocation29_spill] sm:$0xff] %v6637_v45  ;;  %v7090_v25 = vmax.f32 %v6637_v45, 0.0  ;;  %v3009_v51 = vpop.f32.mrf.mxu0  ;;  %v3257_v26 = vmax.f32 %v3225_v1, 0.0  ;;  %v3230_v9 = vadd.f32 %v6493_v50, %v3194_v24  ;;  %v3285_v16 = vpack.c.bf16 %v3259_v60, %v3258_v39  ;;  %v7216_v24 = vld [vmem:[#allocation17_spill] sm:$0xff]  ;;  %v7217_v1 = vld [vmem:[#allocation18_spill] sm:$0xff]  ;;  %v7218_v39 = vld [vmem:[#allocation28_spill] sm:$0xff] }
 0x20a   : > { %v7091_v14 = vmax.f32 %v6648_v2, 0.0  ;;  %v6654_v5 = vadd.f32 %v6462_v56, %v3090_v21  ;;  %v3088_v31 = vadd.f32 %v3009_v51, %v2872_v46  ;;  %v3228_v46 = vadd.f32 %v6493_v50, %v3192_v22  ;;  %v7219_v22 = vld [vmem:[#allocation25_spill] sm:$0xff] }
 0x20b   : > { %v3195_v19 = vmul.f32 %v6474_v41, %v7090_v25  ;;  %v4671_v36 = vpop.f32.mrf.mxu0  ;;  %v3284_v20 = vpack.c.bf16 %v3257_v26, %v3256_v7  ;;  %v2439_v21 = vadd.f32 %v7217_v1, %v7216_v24  ;;  %v2645_v26 = vadd.f32 %v7218_v39, %v6579_v12  ;;  %v7220_v24 = vld [vmem:[#allocation3_spill] sm:$0xff] }
 0x20c   : > { %v3193_v40 = vmul.f32 %v6474_v41, %v7091_v14  ;;  %v6666_v43 = vadd.f32 %v6462_v56, %v3088_v31  ;;  %v3091_v6 = vadd.f32 %v4671_v36, %v2875_v61  ;;  %v7116_v7 = vmax.f32 %v6654_v5, 0.0 }
 0x20d   : > { %v3231_v51 = vadd.f32 %v6493_v50, %v3195_v19  ;;  %4708 = vmatprep.mubr.bf16.mxu1 %v3284_v20  ;;  %v3012_v60 = vpop.f32.mrf.mxu0  ;;  %v2878_v36 = vadd.f32 %v6524_v58, %v7219_v22  ;;  %v2876_v19 = vadd.f32 %v6548_v37, %v7220_v24  ;;  %v3262_v27 = vmax.f32 %v3230_v9, 0.0 }
 0x20e   : > { %v3159_v25 = vmax.f32 %v6666_v43, 0.0  ;;  %v6677_v31 = vadd.f32 %v6462_v56, %v3091_v6  ;;  %v3089_v61 = vadd.f32 %v3012_v60, %v2873_v3  ;;  %4709 = vmatmul.mubr.bf16.gmra.mxu1 %v3285_v16  ;;  %v3229_v20 = vadd.f32 %v6493_v50, %v3193_v40  ;;  %v7221_v40 = vld [vmem:[#allocation6_spill] sm:$0xff] }
 0x20f   : > { %v3263_v1 = vmax.f32 %v3231_v51, 0.0  ;;  %v4674_v14 = vpop.f32.mrf.mxu0  ;;  %v3260_v6 = vmax.f32 %v3228_v46, 0.0  ;;  %v3198_v3 = vmul.f32 %v6474_v41, %v7116_v7  ;;  %v2879_v9 = vadd.f32 %v6566_v44, %v7221_v40 }
 0x210   : > { %v7114_v12 = vmax.f32 %v6677_v31, 0.0  ;;  %v6686_v39 = vadd.f32 %v6462_v56, %v3089_v61  ;;  %v3196_v58 = vmul.f32 %v6474_v41, %v3159_v25  ;;  %v3094_v37 = vadd.f32 %v4674_v14, %v2878_v36  ;;  %v4648_v36 = vpop.f32.mrf.mxu1 }
 0x211   : > { %v3025_v16 = vpop.f32.mrf.mxu0  ;;  %v3261_v51 = vmax.f32 %v3229_v20, 0.0  ;;  %v2877_v22 = vadd.f32 %v6593_v49, %v2645_v26  ;;  %v3287_v14 = vpack.c.bf16 %v3263_v1, %v3262_v27  ;;  %v3234_v26 = vadd.f32 %v6493_v50, %v3198_v3 }
 0x212   : > { %v3199_v60 = vmul.f32 %v6474_v41, %v7114_v12  ;;  %v7117_v46 = vmax.f32 %v6686_v39, 0.0  ;;  %v3092_v61 = vadd.f32 %v3025_v16, %v2876_v19  ;;  %v6702_v24 = vadd.f32 %v6462_v56, %v3094_v37  ;;  %v7222_v19 = vld [vmem:[#allocation20_spill] sm:$0xff]  ;;  %v7223_v16 = vld [vmem:[#allocation2_spill] sm:$0xff] }
 0x213   : > { %v4675_v52 = vpop.f32.mrf.mxu0  ;;  %v3286_v59 = vpack.c.bf16 %v3261_v51, %v3260_v6  ;;  %v2443_v49 = vadd.f32 %v7223_v16, %v7222_v19  ;;  %v3232_v1 = vadd.f32 %v6493_v50, %v3196_v58  ;;  %v7224_v6 = vld [vmem:[#allocation11_spill] sm:$0xff]  ;;  %v7226_v16 = vld [vmem:[#allocation5_spill] sm:$0xff]  ;;  %v2841_v58 = vpop.f32.mrf.mxu1 }
 0x214   : > { %v3235_v20 = vadd.f32 %v6493_v50, %v3199_v60  ;;  %v3197_v44 = vmul.f32 %v6474_v41, %v7117_v46  ;;  %v6709_v40 = vadd.f32 %v6462_v56, %v3092_v61  ;;  %v3095_v29 = vadd.f32 %v4675_v52, %v2879_v9  ;;  %v7225_v9 = vld [vmem:[#allocation13_spill] sm:$0xff] }
 0x215   : > { %v7101_v37 = vmax.f32 %v6702_v24, 0.0  ;;  %4712 = vmatprep.mubr.bf16.mxu1 %v3286_v59  ;;  %v3028_v27 = vpop.f32.mrf.mxu0  ;;  %v2882_v51 = vadd.f32 %v6615_v63, %v7224_v6  ;;  %v2649_v19 = vadd.f32 %v7225_v9, %v2439_v21  ;;  %v2880_v3 = vadd.f32 %v6642_v48, %v7226_v16 }
 0x216   : > { %v7102_v60 = vmax.f32 %v6709_v40, 0.0  ;;  %v6720_v61 = vadd.f32 %v6462_v56, %v3095_v29  ;;  %v3093_v52 = vadd.f32 %v3028_v27, %v2877_v22  ;;  %4713 = vmatmul.mubr.bf16.gmra.mxu1 %v3287_v14  ;;  %v3267_v53 = vmax.f32 %v3235_v20, 0.0 }
 0x217   : > { %v4678_v59 = vpop.f32.mrf.mxu0  ;;  %v3233_v4 = vadd.f32 %v6493_v50, %v3197_v44  ;;  %v3266_v14 = vmax.f32 %v3234_v26, 0.0  ;;  %v3202_v48 = vmul.f32 %v6474_v41, %v7101_v37  ;;  %v3264_v20 = vmax.f32 %v3232_v1, 0.0 }
 0x218   : > { %v3200_v63 = vmul.f32 %v6474_v41, %v7102_v60  ;;  %v7103_v6 = vmax.f32 %v6720_v61, 0.0  ;;  %v6731_v29 = vadd.f32 %v6462_v56, %v3093_v52  ;;  %v3098_v22 = vadd.f32 %v4678_v59, %v2882_v51  ;;  %v4649_v60 = vpop.f32.mrf.mxu1 }
 0x219   : > { %v3041_v21 = vpop.f32.mrf.mxu0  ;;  %v3265_v27 = vmax.f32 %v3233_v4, 0.0  ;;  %v2883_v26 = vadd.f32 %v6660_v54, %v7227_v28  ;;  %v2881_v51 = vadd.f32 %v2828_v17, %v2649_v19  ;;  %v3289_v37 = vpack.c.bf16 %v3267_v53, %v3266_v14  ;;  %v7229_v53 = vld [vmem:[#allocation16_spill] sm:$0xff] }
 0x21a   : > { %v3203_v44 = vmul.f32 %v6474_v41, %v7103_v6  ;;  %v7104_v9 = vmax.f32 %v6731_v29, 0.0  ;;  %v6741_v16 = vadd.f32 %v6462_v56, %v3098_v22  ;;  %v3096_v52 = vadd.f32 %v3041_v21, %v2880_v3  ;;  %v7228_v3 = vld [vmem:[#allocation24_spill] sm:$0xff] }
 0x21b   : > { %v4679_v59 = vpop.f32.mrf.mxu0  ;;  %v3288_v55 = vpack.c.bf16 %v3265_v27, %v3264_v20  ;;  %v3236_v22 = vadd.f32 %v6493_v50, %v3200_v63  ;;  %v2653_v21 = vadd.f32 %v7228_v3, %v2443_v49  ;;  %v2886_v19 = vadd.f32 %v4648_v36, %v7229_v53 }
 0x21c   : > { %v3239_v4 = vadd.f32 %v6493_v50, %v3203_v44  ;;  %v3201_v1 = vmul.f32 %v6474_v41, %v7104_v9  ;;  %v6750_v6 = vadd.f32 %v6462_v56, %v3096_v52  ;;  %v7111_v28 = vmax.f32 %v6741_v16, 0.0  ;;  %v7230_v44 = vld [vmem:[#allocation19_spill] sm:$0xff]  ;;  %v7231_v9 = vld [vmem:[#allocation21_spill] sm:$0xff] }
 0x21d   : > { %v3099_v54 = vadd.f32 %v4679_v59, %v2883_v26  ;;  %4716 = vmatprep.mubr.bf16.mxu1 %v3288_v55  ;;  %v3044_v17 = vpop.f32.mrf.mxu0  ;;  %v3238_v14 = vadd.f32 %v6493_v50, %v3202_v48  ;;  %v2884_v52 = vadd.f32 %v2841_v58, %v7230_v44  ;;  %v2887_v10 = vadd.f32 %v4649_v60, %v7231_v9  ;;  %v2844_v55 = vpop.f32.mrf.mxu1 }
 0x21e   : > { %v7113_v20 = vmax.f32 %v6750_v6, 0.0  ;;  %v3097_v27 = vadd.f32 %v3044_v17, %v2881_v51  ;;  %4717 = vmatmul.mubr.bf16.gmra.mxu1 %v3289_v37  ;;  %v3237_v26 = vadd.f32 %v6493_v50, %v3201_v1  ;;  %v3271_v59 = vmax.f32 %v3239_v4, 0.0 }
 0x21f   : > { %v6761_v63 = vadd.f32 %v6462_v56, %v3099_v54  ;;  %v4682_v49 = vpop.f32.mrf.mxu0  ;;  %v3268_v3 = vmax.f32 %v3236_v22, 0.0  ;;  %v3206_v37 = vmul.f32 %v6474_v41, %v7111_v28  ;;  %v3270_v1 = vmax.f32 %v3238_v14, 0.0 }
 0x220   : > { %v6765_v36 = vadd.f32 %v6462_v56, %v3097_v27  ;;  %v3102_v48 = vadd.f32 %v4682_v49, %v2886_v19  ;;  %v3204_v60 = vmul.f32 %v6474_v41, %v7113_v20  ;;  %v3269_v51 = vmax.f32 %v3237_v26, 0.0 }
 0x221   : > { %v7106_v58 = vmax.f32 %v6761_v63, 0.0  ;;  %v3057_v9 = vpop.f32.mrf.mxu0  ;;  %v2885_v22 = vadd.f32 %v2844_v55, %v2653_v21  ;;  %v3291_v26 = vpack.c.bf16 %v3271_v59, %v3270_v1 }
 0x222   : > { %v7112_v4 = vmax.f32 %v6765_v36, 0.0  ;;  %v6776_v54 = vadd.f32 %v6462_v56, %v3102_v48  ;;  %v3100_v17 = vadd.f32 %v3057_v9, %v2884_v52  ;;  %v3290_v27 = vpack.c.bf16 %v3269_v51, %v3268_v3 }
 0x223   : > { %v3207_v53 = vmul.f32 %v6474_v41, %v7106_v58  ;;  %v4683_v19 = vpop.f32.mrf.mxu0  ;;  %v3242_v48 = vadd.f32 %v6493_v50, %v3206_v37  ;;  %v3240_v55 = vadd.f32 %v6493_v50, %v3204_v60 }
 0x224   : > { %7232 = vst [vmem:[#allocation4_spill] sm:$0xff] %v6776_v54  ;;  %v3205_v44 = vmul.f32 %v6474_v41, %v7112_v4  ;;  %v6785_v49 = vadd.f32 %v6462_v56, %v3100_v17  ;;  %v3103_v14 = vadd.f32 %v4683_v19, %v2887_v10  ;;  %4720 = vmatprep.mubr.bf16.mxu1 %v3290_v27  ;;  %v7108_v9 = vmax.f32 %v6776_v54, 0.0 }
 0x225   : > { %v3243_v52 = vadd.f32 %v6493_v50, %v3207_v53  ;;  %v3060_v21 = vpop.f32.mrf.mxu0  ;;  %v3272_v17 = vmax.f32 %v3240_v55, 0.0  ;;  %v3274_v19 = vmax.f32 %v3242_v48, 0.0 }
 0x226   : > { %v7109_v3 = vmax.f32 %v6785_v49, 0.0  ;;  %v6793_v51 = vadd.f32 %v6462_v56, %v3103_v14  ;;  %v3101_v58 = vadd.f32 %v3060_v21, %v2885_v22  ;;  %4721 = vmatmul.mubr.bf16.gmra.mxu1 %v3291_v26  ;;  %v3241_v10 = vadd.f32 %v6493_v50, %v3205_v44 }
 0x227   : > { %v3275_v59 = vmax.f32 %v3243_v52, 0.0  ;;  %v3210_v22 = vmul.f32 %v6474_v41, %v7108_v9 }
 0x228   : > { %7233 = vst [vmem:[#allocation7_spill] sm:$0xff] %v6793_v51  ;;  %v3208_v37 = vmul.f32 %v6474_v41, %v7109_v3  ;;  %v7107_v1 = vmax.f32 %v6793_v51, 0.0  ;;  %v6801_v60 = vadd.f32 %v6462_v56, %v3101_v58  ;;  %v3273_v53 = vmax.f32 %v3241_v10, 0.0 }
 0x229   : > { %v3293_v58 = vpack.c.bf16 %v3275_v59, %v3274_v19  ;;  %v3246_v52 = vadd.f32 %v6493_v50, %v3210_v22 }
 0x22a   : > { %v3211_v27 = vmul.f32 %v6474_v41, %v7107_v1  ;;  %v7110_v44 = vmax.f32 %v6801_v60, 0.0  ;;  %v3292_v14 = vpack.c.bf16 %v3273_v53, %v3272_v17  ;;  %v3244_v48 = vadd.f32 %v6493_v50, %v3208_v37 }
 0x22b   : > { %v3278_v9 = vmax.f32 %v3246_v52, 0.0  ;;  %v6838_v52 = vld [vmem:[%s7038_s5] ss:$0 sm:$0xff] }
 0x22c   : > { %v3247_v26 = vadd.f32 %v6493_v50, %v3211_v27  ;;  %v3209_v56 = vmul.f32 %v6474_v41, %v7110_v44  ;;  %4724 = vmatprep.mubr.bf16.mxu1 %v3292_v14  ;;  %v3276_v10 = vmax.f32 %v3244_v48, 0.0 }
 0x22e   : > { %4725 = vmatmul.mubr.bf16.gmra.mxu1 %v3293_v58  ;;  %v3245_v21 = vadd.f32 %v6493_v50, %v3209_v56  ;;  %v3279_v55 = vmax.f32 %v3247_v26, 0.0 }
 0x230   : > { %v3277_v1 = vmax.f32 %v3245_v21, 0.0  ;;  %v3295_v53 = vpack.c.bf16 %v3279_v55, %v3278_v9 }
 0x232   : > { %v3294_v17 = vpack.c.bf16 %v3277_v1, %v3276_v10 }
 0x234   : > { %4728 = vmatprep.mubr.bf16.mxu1 %v3294_v17 }
 0x236   : > { %4729 = vmatmul.mubr.bf16.gmra.mxu1 %v3295_v53 }
 0x2be   : > { %v4702_v27 = vpop.f32.mrf.mxu1 }
 0x2bf   : > { %v3410_v47 = vadd.f32 %v4702_v27, %v6838_v52 }
 0x2c0   : > { %v3401_v3 = vpop.f32.mrf.mxu1 }
 0x2c1   : > { %v3402_v55 = vadd.f32 %v6838_v52, %v3401_v3 }
 0x2c2   : > { %v4703_v41 = vpop.f32.mrf.mxu1 }
 0x2c3   : > { %v3528_v53 = vmax.f32 %v3402_v55, 0.0  ;;  %v3413_v27 = vadd.f32 %v4703_v41, %v6838_v52 }
 0x2c4   : > { %v3404_v59 = vpop.f32.mrf.mxu1 }
 0x2c5   : > { %v3405_v44 = vadd.f32 %v6838_v52, %v3404_v59  ;;  %v3560_v3 = vadd.f32 %v3528_v53, %v3143_v23  ;;  %v3531_v41 = vmax.f32 %v3413_v27, 0.0 }
 0x2c6   : > { %v6817_v19 = vpop.f32.mrf.mxu1 }
 0x2c7   : > { %v3529_v46 = vmax.f32 %v3405_v44, 0.0  ;;  %v7234_v44 = vmax.f32 %v6501_v30, 0.0 }
 0x2c8   : > { %v3417_v37 = vpop.f32.mrf.mxu1 }
 0x2c9   : > { %v3561_v54 = vadd.f32 %v3529_v46, %v7234_v44  ;;  %v3418_v30 = vadd.f32 %v6838_v52, %v3417_v37  ;;  %v7240_v37 = vmax.f32 %v6709_v40, 0.0  ;;  %v3426_v44 = vadd.f32 %v6817_v19, %v6838_v52 }
 0x2ca   : > { %v6819_v14 = vpop.f32.mrf.mxu1 }
 0x2cc   : > { %v3420_v22 = vpop.f32.mrf.mxu1 }
 0x2ce   : > { %v6821_v58 = vpop.f32.mrf.mxu1 }
 0x2d0   : > { %v6823_v50 = vpop.f32.mrf.mxu1 }
 0x2d2   : > { %v6825_v26 = vpop.f32.mrf.mxu1 }
 0x2d4   : > { %v6827_v1 = vpop.f32.mrf.mxu1 }
 0x2d6   : > { %v6829_v9 = vpop.f32.mrf.mxu1 }
 0x2d8   : > { %v6831_v56 = vpop.f32.mrf.mxu1 }
 0x2da   : > { %v6833_v48 = vpop.f32.mrf.mxu1 }
 0x2dc   : > { %v6840_v21 = vpop.f32.mrf.mxu1 }
 0x2de   : > { %v4718_v10 = vpop.f32.mrf.mxu1 }
 0x2df   : > { %v3474_v20 = vadd.f32 %v4718_v10, %v6838_v52 }
 0x2e0   : > { %v3465_v17 = vpop.f32.mrf.mxu1 }
 0x2e1   : > { %v3466_v28 = vadd.f32 %v6838_v52, %v3465_v17  ;;  %v3546_v59 = vmax.f32 %v3474_v20, 0.0 }
 0x2e2   : > { %v4719_v4 = vpop.f32.mrf.mxu1 }
 0x2e3   : > { %v3544_v12 = vmax.f32 %v3466_v28, 0.0  ;;  %v3477_v17 = vadd.f32 %v4719_v4, %v6838_v52  ;;  %v3530_v28 = vmax.f32 %v3410_v47, 0.0  ;;  %v7237_v47 = vmax.f32 %v6472_v13, 0.0 }
 0x2e4   : > { %v3468_v7 = vpop.f32.mrf.mxu1 }
 0x2e5   : > { %v3469_v42 = vadd.f32 %v6838_v52, %v3468_v7  ;;  %v3576_v55 = vadd.f32 %v3544_v12, %v3159_v25  ;;  %v7235_v7 = vmax.f32 %v6686_v39, 0.0  ;;  %v7236_v25 = vmax.f32 %v6654_v5, 0.0 }
 0x2e6   : > { %v4722_v45 = vpop.f32.mrf.mxu1  ;;  %v3547_v12 = vmax.f32 %v3477_v17, 0.0  ;;  %v3562_v53 = vadd.f32 %v3530_v28, %v7237_v47  ;;  %v7238_v39 = vmax.f32 %v6677_v31, 0.0  ;;  %v3421_v17 = vadd.f32 %v6838_v52, %v3420_v22 }
 0x2e7   : > { %v3545_v51 = vmax.f32 %v3469_v42, 0.0  ;;  %v4760_v38 = vpack.i.bf16 %v3560_v3, %v3576_v55  ;;  %v3578_v43 = vadd.f32 %v3546_v59, %v7236_v25  ;;  %v7239_v55 = vmax.f32 %v6484_v33, 0.0 }
 0x2e8   : > { %v3481_v10 = vpop.f32.mrf.mxu1  ;;  %v3579_v46 = vadd.f32 %v3547_v12, %v7238_v39  ;;  %v3490_v13 = vadd.f32 %v4722_v45, %v6838_v52  ;;  %v3533_v33 = vmax.f32 %v3421_v17, 0.0 }
 0x2e9   : > { %v3577_v18 = vadd.f32 %v3545_v51, %v7235_v7  ;;  %4761 = vxpose.xlu0.b32.start [1/16] %v4760_v38, 128  ;;  %v3482_v20 = vadd.f32 %v6838_v52, %v3481_v10  ;;  %v4764_v5 = vpack.i.bf16 %v3562_v53, %v3578_v43  ;;  %v3563_v59 = vadd.f32 %v3531_v41, %v7239_v55 }
 0x2ea   : > { %v4723_v23 = vpop.f32.mrf.mxu1  ;;  %v7241_v7 = vmax.f32 %v6527_v35, 0.0  ;;  %v3550_v25 = vmax.f32 %v3490_v13, 0.0  ;;  %v7242_v43 = vmax.f32 %v6731_v29, 0.0  ;;  %v7244_v35 = vmax.f32 %v6702_v24, 0.0 }
 0x2eb   : > { %v4762_v42 = vpack.i.bf16 %v3561_v54, %v3577_v18  ;;  %v3548_v38 = vmax.f32 %v3482_v20, 0.0  ;;  %v3532_v54 = vmax.f32 %v3418_v30, 0.0  ;;  %v4766_v31 = vpack.i.bf16 %v3563_v59, %v3579_v46 }
 0x2ec   : > { %v3484_v4 = vpop.f32.mrf.mxu1  ;;  %v3493_v22 = vadd.f32 %v4723_v23, %v6838_v52  ;;  %v3534_v20 = vmax.f32 %v3426_v44, 0.0  ;;  %v3582_v47 = vadd.f32 %v3550_v25, %v7244_v35  ;;  %v7245_v29 = vmax.f32 %v6518_v57, 0.0 }
 0x2ed   : > { %4763 = vxpose.xlu0.b32.cont [2/16] %v4762_v42, 128  ;;  %v3485_v51 = vadd.f32 %v6838_v52, %v3484_v4  ;;  %v3580_v10 = vadd.f32 %v3548_v38, %v7240_v37  ;;  %v3564_v18 = vadd.f32 %v3532_v54, %v7241_v7  ;;  %v3429_v42 = vadd.f32 %v6819_v14, %v6838_v52 }
 0x2ee   : > { %v4726_v3 = vpop.f32.mrf.mxu1  ;;  %v7243_v4 = vmax.f32 %v6552_v34, 0.0  ;;  %v3551_v53 = vmax.f32 %v3493_v22, 0.0  ;;  %v3566_v39 = vadd.f32 %v3534_v20, %v7245_v29  ;;  %v3434_v38 = vadd.f32 %v6838_v52, %v6823_v50 }
 0x2ef   : > { %v3549_v28 = vmax.f32 %v3485_v51, 0.0  ;;  %v4768_v12 = vpack.i.bf16 %v3564_v18, %v3580_v10  ;;  %v3535_v46 = vmax.f32 %v3429_v42, 0.0  ;;  %v7246_v34 = vmax.f32 %v6720_v61, 0.0 }
 0x2f0   : > { %v3497_v27 = vpop.f32.mrf.mxu1  ;;  %v3565_v19 = vadd.f32 %v3533_v33, %v7243_v4  ;;  %v7247_v59 = vmax.f32 %v6538_v15, 0.0  ;;  %v3536_v17 = vmax.f32 %v3434_v38, 0.0  ;;  %v3437_v57 = vadd.f32 %v6838_v52, %v6827_v1 }
 0x2f1   : > { %4765 = vxpose.xlu0.b32.cont [3/16] %v4764_v5, 128  ;;  %v3581_v45 = vadd.f32 %v3549_v28, %v7242_v43  ;;  %v3498_v41 = vadd.f32 %v6838_v52, %v3497_v27  ;;  %v3583_v14 = vadd.f32 %v3551_v53, %v7246_v34  ;;  %v4772_v5 = vpack.i.bf16 %v3566_v39, %v3582_v47 }
 0x2f2   : > { %v4727_v40 = vpop.f32.mrf.mxu1  ;;  %v3567_v54 = vadd.f32 %v3535_v46, %v7247_v59  ;;  %v3506_v13 = vadd.f32 %v4726_v3, %v6838_v52  ;;  %v7248_v50 = vmax.f32 %v6750_v6, 0.0  ;;  %v7249_v27 = vmax.f32 %v6573_v11, 0.0 }
 0x2f3   : > { %v4770_v23 = vpack.i.bf16 %v3565_v19, %v3581_v45  ;;  %v3552_v51 = vmax.f32 %v3498_v41, 0.0  ;;  %v3537_v44 = vmax.f32 %v3437_v57, 0.0  ;;  %v3509_v1 = vadd.f32 %v4727_v40, %v6838_v52 }
 0x2f4   : > { %v3500_v30 = vpop.f32.mrf.mxu1  ;;  %v4774_v10 = vpack.i.bf16 %v3567_v54, %v3583_v14  ;;  %v3568_v15 = vadd.f32 %v3536_v17, %v7249_v27  ;;  %v3554_v7 = vmax.f32 %v3506_v13, 0.0  ;;  %v7250_v18 = vmax.f32 %v6765_v36, 0.0 }
 0x2f5   : > { %4767 = vxpose.xlu0.b32.cont [4/16] %v4766_v31, 128  ;;  %v3501_v24 = vadd.f32 %v6838_v52, %v3500_v30  ;;  %v3584_v37 = vadd.f32 %v3552_v51, %v7248_v50  ;;  %v3442_v31 = vadd.f32 %v6821_v58, %v6838_v52  ;;  %v3445_v22 = vadd.f32 %v6825_v26, %v6838_v52 }
 0x2f6   : > { %v4730_v55 = vpop.f32.mrf.mxu1  ;;  %v7251_v43 = vmax.f32 %v6597_v32, 0.0  ;;  %v7252_v11 = vmax.f32 %v6741_v16, 0.0  ;;  %v7253_v36 = vmax.f32 %v6564_v8, 0.0  ;;  %v3450_v35 = vadd.f32 %v6838_v52, %v6831_v56 }
 0x2f7   : > { %v3553_v61 = vmax.f32 %v3501_v24, 0.0  ;;  %v4776_v33 = vpack.i.bf16 %v3568_v15, %v3584_v37  ;;  %v3538_v25 = vmax.f32 %v3442_v31, 0.0  ;;  %v3539_v19 = vmax.f32 %v3445_v22, 0.0  ;;  %v7262_v37 = vld [vmem:[#allocation27_spill] sm:$0xff] }
 0x2f8   : > { %v3513_v28 = vpop.f32.mrf.mxu1  ;;  %v3569_v58 = vadd.f32 %v3537_v44, %v7251_v43  ;;  %v3586_v45 = vadd.f32 %v3554_v7, %v7252_v11  ;;  %v7254_v32 = vmax.f32 %v6761_v63, 0.0  ;;  %v7255_v41 = vmax.f32 %v6587_v62, 0.0  ;;  %v7266_v44 = vld [vmem:[#allocation29_spill] sm:$0xff] }
 0x2f9   : > { %4769 = vxpose.xlu0.b32.cont [5/16] %v4768_v12, 128  ;;  %v3585_v3 = vadd.f32 %v3553_v61, %v7250_v18  ;;  %v3555_v12 = vmax.f32 %v3509_v1, 0.0  ;;  %v3514_v20 = vadd.f32 %v6838_v52, %v3513_v28  ;;  %v3570_v4 = vadd.f32 %v3538_v25, %v7253_v36  ;;  %v3680_v1 = vld [vmem:[%s7040_s7] sm:$0xff]  ;;  %v3681_v18 = vld [vmem:[%s7040_s7 + $0x8] sm:$0xff] }
 0x2fa   : > { %v4731_v6 = vpop.f32.mrf.mxu1  ;;  %v3540_v30 = vmax.f32 %v3450_v35, 0.0  ;;  %v3453_v8 = vadd.f32 %v6838_v52, %v6840_v21  ;;  %v3522_v29 = vadd.f32 %v4730_v55, %v6838_v52  ;;  %v7256_v56 = vmax.f32 %v6785_v49, 0.0 }
 0x2fb   : > { %v4778_v40 = vpack.i.bf16 %v3569_v58, %v3585_v3  ;;  %v3587_v26 = vadd.f32 %v3555_v12, %v7254_v32  ;;  %v3556_v47 = vmax.f32 %v3514_v20, 0.0  ;;  %v4780_v53 = vpack.i.bf16 %v3570_v4, %v3586_v45  ;;  %v3682_v3 = vld [vmem:[%s7040_s7 + $0x10] sm:$0xff]  ;;  %v3684_v20 = vld [vmem:[%s7040_s7 + $0x20] sm:$0xff] }
 0x2fc   : > { %v3516_v42 = vpop.f32.mrf.mxu1  ;;  %v3458_v38 = vadd.f32 %v6829_v9, %v6838_v52  ;;  %v7257_v34 = vmax.f32 %v6623_v0, 0.0  ;;  %v3541_v62 = vmax.f32 %v3453_v8, 0.0  ;;  %v3558_v51 = vmax.f32 %v3522_v29, 0.0  ;;  %v7260_v9 = vld [vmem:[#allocation4_spill] sm:$0xff] }
 0x2fd   : > { %4771 = vxpose.xlu0.b32.cont [6/16] %v4770_v23, 128  ;;  %v3517_v16 = vadd.f32 %v6838_v52, %v3516_v42  ;;  %v3571_v23 = vadd.f32 %v3539_v19, %v7255_v41  ;;  %v3588_v39 = vadd.f32 %v3556_v47, %v7256_v56  ;;  %v3525_v24 = vadd.f32 %v4731_v6, %v6838_v52  ;;  %v3683_v6 = vld [vmem:[%s7040_s7 + $0x18] sm:$0xff]  ;;  %v3685_v42 = vld [vmem:[%s7040_s7 + $0x28] sm:$0xff] }
 0x2fe   : > { %v3572_v14 = vadd.f32 %v3540_v30, %v7257_v34  ;;  %v7258_v21 = vmax.f32 %v6801_v60, 0.0  ;;  %v3542_v59 = vmax.f32 %v3458_v38, 0.0  ;;  %v3461_v49 = vadd.f32 %v6833_v48, %v6838_v52  ;;  %v7264_v60 = vld [vmem:[#allocation7_spill] sm:$0xff]  ;;  %v3687_v41 = vld [vmem:[%s7040_s7 + $0x38] sm:$0xff] }
 0x2ff   : > { %v3557_v46 = vmax.f32 %v3517_v16, 0.0  ;;  %v4782_v63 = vpack.i.bf16 %v3571_v23, %v3587_v26  ;;  %v7259_v54 = vmax.f32 %v6648_v2, 0.0  ;;  %v7261_v0 = vmax.f32 %v7260_v9, 0.0  ;;  %v3686_v16 = vld [vmem:[%s7040_s7 + $0x30] sm:$0xff] }
 0x300   : > { %v4784_v55 = vpack.i.bf16 %v3572_v14, %v3588_v39  ;;  %v3559_v13 = vmax.f32 %v3525_v24, 0.0  ;;  %v7263_v61 = vmax.f32 %v7262_v37, 0.0  ;;  %v3543_v28 = vmax.f32 %v3461_v49, 0.0 }
 0x301   : > { %4773 = vxpose.xlu0.b32.cont [7/16] %v4772_v5, 128  ;;  %v3589_v5 = vadd.f32 %v3557_v46, %v7258_v21  ;;  %v3573_v17 = vadd.f32 %v3541_v62, %v7259_v54  ;;  %v3590_v57 = vadd.f32 %v3558_v51, %v7261_v0  ;;  %v7265_v31 = vmax.f32 %v7264_v60, 0.0 }
 0x302   : > { %v7267_v48 = vmax.f32 %v7266_v44, 0.0  ;;  %v4937_v7 = vmov 0  }
 0x303   : > { %v4786_v50 = vpack.i.bf16 %v3573_v17, %v3589_v5  ;;  %v3591_v27 = vadd.f32 %v3559_v13, %v7265_v31  ;;  %3784 = vmatprep.mubr.bf16.mxu0 %v4937_v7  ;;  %4872 = vset.pattern.permute.xlu1 %v4937_v7 }
 0x304   : > { %v3575_v52 = vadd.f32 %v3543_v28, %v7267_v48  ;;  %3690 = vperm.xlu1 %4872, %v3680_v1  }
 0x305   : > { %4775 = vxpose.xlu0.b32.cont [8/16] %v4774_v10, 128  ;;  %v3574_v10 = vadd.f32 %v3542_v59, %v7263_v61 }
 0x306   : > { %v4790_v2 = vpack.i.bf16 %v3575_v52, %v3591_v27 }
 0x307   : > { %v4788_v15 = vpack.i.bf16 %v3574_v10, %v3590_v57 }
 0x308   : > { %3695 = vperm.xlu1 %4872, %v3681_v18  }
 0x309   : > { %4777 = vxpose.xlu0.b32.cont [9/16] %v4776_v33, 128 }
 0x30c   : > { %3700 = vperm.xlu1 %4872, %v3682_v3  }
 0x30d   : > { %4779 = vxpose.xlu0.b32.cont [10/16] %v4778_v40, 128 }
 0x310   : > { %3705 = vperm.xlu1 %4872, %v3683_v6  }
 0x311   : > { %4781 = vxpose.xlu0.b32.cont [11/16] %v4780_v53, 128 }
 0x314   : > { %3710 = vperm.xlu1 %4872, %v3684_v20   ;;  %v4910_v20 = vld [vmem:[%s7039_s6 + $0x8] sm:$0xff]  }
 0x315   : > { %4783 = vxpose.xlu0.b32.cont [12/16] %v4782_v63, 128 }
 0x318   : > { %3715 = vperm.xlu1 %4872, %v3685_v42  }
 0x319   : > { %4785 = vxpose.xlu0.b32.cont [13/16] %v4784_v55, 128 }
 0x31c   : > { %3720 = vperm.xlu1 %4872, %v3686_v16  }
 0x31d   : > { %4787 = vxpose.xlu0.b32.cont [14/16] %v4786_v50, 128 }
 0x320   : > { %3725 = vperm.xlu1 %4872, %v3687_v41  }
 0x321   : > { %4789 = vxpose.xlu0.b32.cont [15/16] %v4788_v15, 128 }
 0x325   : > { %4791 = vxpose.xlu0.b32.end [16/16] %v4790_v2, 128 }
 0x34e   : > { %4873 = vset.pattern.permute.xlu0 %v4937_v7 }
 0x365   : > { %v4792_v33 = vpop.trf.xlu0 }
 0x366   : > { %v4796_v25 = vunpack.i.h.bf16 %v4792_v33  ;;  %v4793_v22 = vunpack.i.l.bf16 %v4792_v33 }
 0x369   : > { %v4797_v43 = vpop.trf.xlu0 }
 0x36a   : > { %v4801_v58 = vunpack.i.h.bf16 %v4797_v43  ;;  %v4798_v11 = vunpack.i.l.bf16 %v4797_v43 }
 0x36c   : > { %v6963_v45 = vpack.c.bf16 %v4798_v11, %v4793_v22  ;;  %v6965_v12 = vpack.c.bf16 %v4801_v58, %v4796_v25  ;;  %v4909_v11 = vld [vmem:[%s7039_s6] sm:$0xff]  }
 0x36d   : > { %v4802_v40 = vpop.trf.xlu0 }
 0x36e   : > { %v4806_v36 = vunpack.i.h.bf16 %v4802_v40  ;;  %v4803_v4 = vunpack.i.l.bf16 %v4802_v40 }
 0x371   : > { %v4807_v19 = vpop.trf.xlu0 }
 0x372   : > { %v4811_v35 = vunpack.i.h.bf16 %v4807_v19  ;;  %v4808_v32 = vunpack.i.l.bf16 %v4807_v19 }
 0x374   : > { %v6973_v26 = vpack.c.bf16 %v4808_v32, %v4803_v4  ;;  %v6975_v47 = vpack.c.bf16 %v4811_v35, %v4806_v36 }
 0x375   : > { %v4812_v53 = vpop.trf.xlu0 }
 0x376   : > { %v4813_v33 = vunpack.i.l.bf16 %v4812_v53  ;;  %v4816_v43 = vunpack.i.h.bf16 %v4812_v53 }
 0x379   : > { %v4817_v23 = vpop.trf.xlu0 }
 0x37a   : > { %v4818_v1 = vunpack.i.l.bf16 %v4817_v23  ;;  %v4821_v6 = vunpack.i.h.bf16 %v4817_v23 }
 0x37c   : > { %v3661_v22 = vpack.c.bf16 %v4818_v1, %v4813_v33  ;;  %v3660_v58 = vpack.c.bf16 %v4821_v6, %v4816_v43 }
 0x37d   : > { %v4822_v30 = vpop.trf.xlu0 }
 0x37e   : > { %v4823_v48 = vunpack.i.l.bf16 %v4822_v30  ;;  %v4826_v3 = vunpack.i.h.bf16 %v4822_v30 }
 0x37f   : > { %v3691_v40 = vpop.permute.xlu1 %3690 }
 0x381   : > { %v4827_v8 = vpop.trf.xlu0 }
 0x382   : > { %v4828_v27 = vunpack.i.l.bf16 %v4827_v8  ;;  %v4831_v52 = vunpack.i.h.bf16 %v4827_v8 }
 0x383   : > { %v3696_v42 = vpop.permute.xlu1 %3695 }
 0x384   : > { %v3663_v18 = vpack.c.bf16 %v4828_v27, %v4823_v48  ;;  %v3662_v25 = vpack.c.bf16 %v4831_v52, %v4826_v3 }
 0x385   : > { %v4832_v29 = vpop.trf.xlu0 }
 0x386   : > { %v4833_v28 = vunpack.i.l.bf16 %v4832_v29  ;;  %v4836_v44 = vunpack.i.h.bf16 %v4832_v29 }
 0x387   : > { %v3701_v36 = vpop.permute.xlu1 %3700 }
 0x389   : > { %v4837_v56 = vpop.trf.xlu0 }
 0x38a   : > { %v4838_v37 = vunpack.i.l.bf16 %v4837_v56  ;;  %v4841_v60 = vunpack.i.h.bf16 %v4837_v56 }
 0x38c   : > { %v3665_v15 = vpack.c.bf16 %v4838_v37, %v4833_v28  ;;  %v3664_v2 = vpack.c.bf16 %v4841_v60, %v4836_v44 }
 0x38d   : > { %v4842_v39 = vpop.trf.xlu0 }
 0x38e   : > { %v4843_v57 = vunpack.i.l.bf16 %v4842_v39  ;;  %v4846_v10 = vunpack.i.h.bf16 %v4842_v39 }
 0x391   : > { %v4847_v46 = vpop.trf.xlu0 }
 0x392   : > { %v4848_v17 = vunpack.i.l.bf16 %v4847_v46  ;;  %v4851_v13 = vunpack.i.h.bf16 %v4847_v46 }
 0x394   : > { %v3667_v61 = vpack.c.bf16 %v4848_v17, %v4843_v57  ;;  %v3666_v31 = vpack.c.bf16 %v4851_v13, %v4846_v10 }
 0x395   : > { %v4852_v63 = vpop.trf.xlu0 }
 0x396   : > { %v4853_v55 = vunpack.i.l.bf16 %v4852_v63  ;;  %v4856_v0 = vunpack.i.h.bf16 %v4852_v63 }
 0x399   : > { %v4857_v38 = vpop.trf.xlu0 }
 0x39a   : > { %v4858_v14 = vunpack.i.l.bf16 %v4857_v38  ;;  %v4861_v54 = vunpack.i.h.bf16 %v4857_v38 }
 0x39c   : > { %v3669_v9 = vpack.c.bf16 %v4858_v14, %v4853_v55  ;;  %v3668_v50 = vpack.c.bf16 %v4861_v54, %v4856_v0 }
 0x39d   : > { %v4862_v34 = vpop.trf.xlu0 }
 0x39e   : > { %v4866_v62 = vunpack.i.h.bf16 %v4862_v34  ;;  %v4863_v51 = vunpack.i.l.bf16 %v4862_v34 }
 0x3a1   : > { %v4867_v24 = vpop.trf.xlu0 }
 0x3a2   : > { %v4871_v21 = vunpack.i.h.bf16 %v4867_v24  ;;  %v4868_v5 = vunpack.i.l.bf16 %v4867_v24 }
 0x3a4   : > { %v3670_v59 = vpack.c.bf16 %v4871_v21, %v4866_v62  ;;  %v3671_v49 = vpack.c.bf16 %v4868_v5, %v4863_v51 }
 0x3a6   : > { %3752 = vmatprep.subr.bf16.mxu0 %v3671_v49 }
 0x3a7   : > { %3753 = vmatpush1.bf16.msra.mxu0 %v3670_v59 }
 0x3a8   : > { %3754 = vmatprep.subr.bf16.mxu0 %v3669_v9 }
 0x3ab   : > { %3755 = vmatpush1.bf16.msra.mxu0 %v3668_v50 }
 0x3ac   : > { %3756 = vmatprep.subr.bf16.mxu0 %v3667_v61 }
 0x3af   : > { %3757 = vmatpush1.bf16.msra.mxu0 %v3666_v31 }
 0x3b0   : > { %3758 = vmatprep.subr.bf16.mxu0 %v3665_v15 }
 0x3b3   : > { %3759 = vmatpush1.bf16.msra.mxu0 %v3664_v2 }
 0x3b4   : > { %3760 = vmatprep.subr.bf16.mxu0 %v3663_v18 }
 0x3b7   : > { %3761 = vmatpush1.bf16.msra.mxu0 %v3662_v25 }
 0x3b8   : > { %3762 = vmatprep.subr.bf16.mxu0 %v3661_v22 }
 0x3bb   : > { %3763 = vmatpush1.bf16.msra.mxu0 %v3660_v58 }
 0x3bc   : > { %3764 = vmatprep.subr.bf16.mxu0 %v6973_v26  ;;  %v3706_v26 = vpop.permute.xlu1 %3705 }
 0x3bf   : > { %3765 = vmatpush1.bf16.msra.mxu0 %v6975_v47 }
 0x3c0   : > { %3766 = vmatprep.subr.bf16.mxu0 %v6963_v45  ;;  %v4911_v45 = vld [vmem:[%s7039_s6 + $0x10] sm:$0xff]   ;;  %v3711_v8 = vpop.permute.xlu1 %3710 }
 0x3c3   : > { %3767 = vmatpush1.bf16.msra.mxu0 %v6965_v12  ;;  %v4912_v12 = vld [vmem:[%s7039_s6 + $0x18] sm:$0xff]  }
 0x3c4   : > { %v3716_v34 = vpop.permute.xlu1 %3715 }
 0x3c6   : > { %3785 = vmatmul.mubr.bf16.vlgmr.msra.gmra.mxu0 %v4909_v11 }
 0x3c7   : > { %3794 = vmatprep.mubr.bf16.mxu0 %v4937_v7 }
 0x3c8   : > { %v3721_v55 = vpop.permute.xlu1 %3720 }
 0x3cc   : > { %v3726_v57 = vpop.permute.xlu1 %3725 }
 0x3ce   : > { %3795 = vmatmul.mubr.bf16.gmra.mxu0 %v4910_v20 }
 0x3cf   : > { %3804 = vmatprep.mubr.bf16.mxu0 %v4937_v7 }
 0x3d6   : > { %3805 = vmatmul.mubr.bf16.gmra.mxu0 %v4911_v45 }
 0x3d7   : > { %3814 = vmatprep.mubr.bf16.mxu0 %v4937_v7 }
 0x3de   : > { %3815 = vmatmul.mubr.bf16.gmra.mxu0 %v4912_v12 }
 0x486   : > { %v3786_v4 = vpop.f32.mrf.mxu0 }
 0x487   : > { %v3787_v7 = vadd.f32 %v3786_v4, %v3691_v40 }
 0x488   : > { %v3788_v19 = vpop.f32.mrf.mxu0 }
 0x489   : > { %3825 = vst [vmem:[%s7006_s10] sm:$0xff] %v3787_v7  ;;  %v3789_v35 = vadd.f32 %v3788_v19, %v3691_v40 }
 0x48a   : > { %v3790_v32 = vpop.f32.mrf.mxu0 }
 0x48b   : > { %3826 = vst [vmem:[%s7006_s10 + $0x8] sm:$0xff] %v3789_v35  ;;  %v3791_v47 = vadd.f32 %v3790_v32, %v3696_v42 }
 0x48c   : > { %v3792_v16 = vpop.f32.mrf.mxu0 }
 0x48d   : > { %3827 = vst [vmem:[%s7006_s10 + $0x10] sm:$0xff] %v3791_v47  ;;  %v3793_v53 = vadd.f32 %v3792_v16, %v3696_v42 }
 0x48e   : > { %v3796_v41 = vpop.f32.mrf.mxu0 }
 0x48f   : > { %3828 = vst [vmem:[%s7006_s10 + $0x18] sm:$0xff] %v3793_v53  ;;  %v3797_v23 = vadd.f32 %v3796_v41, %v3701_v36 }
 0x490   : > { %v3798_v30 = vpop.f32.mrf.mxu0 }
 0x491   : > { %3829 = vst [vmem:[%s7006_s10 + $0x20] sm:$0xff] %v3797_v23  ;;  %v3799_v29 = vadd.f32 %v3798_v30, %v3701_v36 }
 0x492   : > { %v3800_v56 = vpop.f32.mrf.mxu0 }
 0x493   : > { %3830 = vst [vmem:[%s7006_s10 + $0x28] sm:$0xff] %v3799_v29  ;;  %v3801_v39 = vadd.f32 %v3800_v56, %v3706_v26 }
 0x494   : > { %v3802_v46 = vpop.f32.mrf.mxu0 }
 0x495   : > { %3831 = vst [vmem:[%s7006_s10 + $0x30] sm:$0xff] %v3801_v39  ;;  %v3803_v63 = vadd.f32 %v3802_v46, %v3706_v26 }
 0x496   : > { %v3806_v38 = vpop.f32.mrf.mxu0 }
 0x497   : > { %3832 = vst [vmem:[%s7006_s10 + $0x38] sm:$0xff] %v3803_v63  ;;  %v3807_v14 = vadd.f32 %v3806_v38, %v3711_v8 }
 0x498   : > { %v3808_v62 = vpop.f32.mrf.mxu0 }
 0x499   : > { %3833 = vst [vmem:[%s7006_s10 + $0x40] sm:$0xff] %v3807_v14  ;;  %v3809_v51 = vadd.f32 %v3808_v62, %v3711_v8 }
 0x49a   : > { %v3810_v24 = vpop.f32.mrf.mxu0 }
 0x49b   : > { %3834 = vst [vmem:[%s7006_s10 + $0x48] sm:$0xff] %v3809_v51  ;;  %v3811_v21 = vadd.f32 %v3810_v24, %v3716_v34 }
 0x49c   : > { %v3812_v5 = vpop.f32.mrf.mxu0 }
 0x49d   : > { %3835 = vst [vmem:[%s7006_s10 + $0x50] sm:$0xff] %v3811_v21  ;;  %v3813_v59 = vadd.f32 %v3812_v5, %v3716_v34 }
 0x49e   : > { %v3816_v49 = vpop.f32.mrf.mxu0 }
 0x49f   : > { %3836 = vst [vmem:[%s7006_s10 + $0x58] sm:$0xff] %v3813_v59  ;;  %v3817_v54 = vadd.f32 %v3816_v49, %v3721_v55 }
 0x4a0   : > { %v3818_v17 = vpop.f32.mrf.mxu0 }
 0x4a1   : > { %3837 = vst [vmem:[%s7006_s10 + $0x60] sm:$0xff] %v3817_v54  ;;  %v3819_v9 = vadd.f32 %v3818_v17, %v3721_v55 }
 0x4a2   : > { %v3820_v0 = vpop.f32.mrf.mxu0 }
 0x4a3   : > { %3838 = vst [vmem:[%s7006_s10 + $0x68] sm:$0xff] %v3819_v9  ;;  %v3821_v13 = vadd.f32 %v3820_v0, %v3726_v57 }
 0x4a4   : > { %v3822_v50 = vpop.f32.mrf.mxu0 }
 0x4a5   : > { %3839 = vst [vmem:[%s7006_s10 + $0x70] sm:$0xff] %v3821_v13  ;;  %v3823_v37 = vadd.f32 %v3822_v50, %v3726_v57 }
 0x4a7   : > { %3840 = vst [vmem:[%s7006_s10 + $0x78] sm:$0xff] %v3823_v37 }
 0x4a8 PF: > { %s18_s29 = sadd.s32 1, %s4935_s29   ;;  %s7268_s27 = smov %s4931_s28 }
 0x4a9   : > { %p15_p5 = scmp.ge.s32.totalorder %s18_s29, 4   ;;  %s7269_s28 = smov %s7271_s30 }
 0x4ab   :  { %17 = sbr.rel (!%p15_p5) target bundleno = 2 (0x2), region = 93 }

</bundles_post_ra>
